<compile_context>
chip_gen: v6e
topology: v6e:2x2x1
jax: 0.10.0
libtpu: 0.0.40
codegen_flags: <defaults>
</compile_context>

<pallas_src>
import functools
import math

import jax
import jax.numpy as jnp
from jax.experimental import pallas as pl
from jax.experimental.pallas import tpu as pltpu


# ------------------------------ kernel ------------------------------

def _ln(x, a, b, eps):
    """LayerNorm with unbiased std (d-1) and (std + eps) denominator."""
    mean = jnp.mean(x, axis=-1, keepdims=True)
    var = jnp.sum((x - mean) ** 2, axis=-1, keepdims=True) / (x.shape[-1] - 1)
    std = jnp.sqrt(var)
    return a * (x - mean) / (std + eps) + b


def _decoder_kernel(
    # per-batch blocks
    x_ref, mem_ref, tmask_ref, smask_ref,
    # stacked per-layer weights (leading dim = n_layers)
    ln0a_ref, ln0b_ref, wqkv_ref, bqkv_ref, wo0_ref, bo0_ref,
    ln1a_ref, ln1b_ref, wq1_ref, bq1_ref, wkv1_ref, bkv1_ref, wo1_ref, bo1_ref,
    ln2a_ref, ln2b_ref, w1_ref, b1_ref, w2_ref, b2_ref,
    # final norm
    na_ref, nb_ref,
    # output
    o_ref,
    *, n_layers, n_heads, eps):
    x = x_ref[0].astype(jnp.float32)      # (T, D)
    mem = mem_ref[0].astype(jnp.float32)  # (S, D)
    tmask = tmask_ref[0]                  # (T, T) int32
    smask = smask_ref[0]                  # (1, S) int32
    T, D = x.shape
    dk = D // n_heads
    scale = 1.0 / math.sqrt(dk)

    def mha(q, k, v, mask):
        """q:(Tq,D), k/v:(Tk,D), mask:(Mq,Tk) with Mq in {1,Tq} -> (Tq,D)."""
        outs = []
        for hh in range(n_heads):
            sl = slice(hh * dk, (hh + 1) * dk)
            qh, kh, vh = q[:, sl], k[:, sl], v[:, sl]
            # scores = qh @ kh^T (contraction on last dims, no explicit transpose)
            s = jax.lax.dot_general(qh, kh, (((1,), (1,)), ((), ())),
                                    preferred_element_type=jnp.float32) * scale
            s = jnp.where(mask == 0, -1e9, s)
            s = s - jnp.max(s, axis=-1, keepdims=True)
            p = jnp.exp(s)
            p = p * pl.reciprocal(jnp.sum(p, axis=-1, keepdims=True), approx=False)
            outs.append(jnp.dot(p, vh, preferred_element_type=jnp.float32))
        return jnp.concatenate(outs, axis=-1)  # (Tq, D) lane-dense

    for l in range(n_layers):
        # ---- self-attention sublayer: x = x + SA(LN(x)) ----
        y = _ln(x, ln0a_ref[l], ln0b_ref[l], eps)
        qkv = jnp.dot(y, wqkv_ref[l], preferred_element_type=jnp.float32) + bqkv_ref[l]
        att = mha(qkv[:, :D], qkv[:, D:2 * D], qkv[:, 2 * D:], tmask)
        x = x + jnp.dot(att, wo0_ref[l], preferred_element_type=jnp.float32) + bo0_ref[l]

        # ---- cross-attention sublayer: x = x + CA(LN(x), memory) ----
        y = _ln(x, ln1a_ref[l], ln1b_ref[l], eps)
        q = jnp.dot(y, wq1_ref[l], preferred_element_type=jnp.float32) + bq1_ref[l]
        kv = jnp.dot(mem, wkv1_ref[l], preferred_element_type=jnp.float32) + bkv1_ref[l]
        att = mha(q, kv[:, :D], kv[:, D:], smask)
        x = x + jnp.dot(att, wo1_ref[l], preferred_element_type=jnp.float32) + bo1_ref[l]

        # ---- feed-forward sublayer: x = x + W2 relu(W1 LN(x)) ----
        y = _ln(x, ln2a_ref[l], ln2b_ref[l], eps)
        hid = jnp.maximum(
            jnp.dot(y, w1_ref[l], preferred_element_type=jnp.float32) + b1_ref[l], 0.0)
        x = x + jnp.dot(hid, w2_ref[l], preferred_element_type=jnp.float32) + b2_ref[l]

    # ---- final LayerNorm ----
    o_ref[0] = _ln(x, na_ref[...], nb_ref[...], eps).astype(o_ref.dtype)


# ------------------------------ wrapper ------------------------------

_WEIGHT_ORDER = (
    "ln0_a", "ln0_b", "wqkv", "bqkv", "wo0", "bo0",
    "ln1_a", "ln1_b", "wq1", "bq1", "wkv1", "bkv1", "wo1", "bo1",
    "ln2_a", "ln2_b", "w1", "b1", "w2", "b2",
    "norm_a", "norm_b",
)


def prepare_kernel_params(params):
    """Pre-concatenate QKV / KV projections and stack all per-layer weights
    once (outside the forward pass) so the jitted forward does no concat/pad."""
    layers = params["layers"]

    def stack(fn):
        return jnp.stack([fn(lp) for lp in layers], axis=0)

    return {
        "ln0_a": stack(lambda p: p["ln0_a"]),
        "ln0_b": stack(lambda p: p["ln0_b"]),
        "wqkv": stack(lambda p: jnp.concatenate(
            [p["self_attn"]["wq"], p["self_attn"]["wk"], p["self_attn"]["wv"]], axis=1)),
        "bqkv": stack(lambda p: jnp.concatenate(
            [p["self_attn"]["bq"], p["self_attn"]["bk"], p["self_attn"]["bv"]], axis=1)),
        "wo0": stack(lambda p: p["self_attn"]["wo"]),
        "bo0": stack(lambda p: p["self_attn"]["bo"]),
        "ln1_a": stack(lambda p: p["ln1_a"]),
        "ln1_b": stack(lambda p: p["ln1_b"]),
        "wq1": stack(lambda p: p["src_attn"]["wq"]),
        "bq1": stack(lambda p: p["src_attn"]["bq"]),
        "wkv1": stack(lambda p: jnp.concatenate(
            [p["src_attn"]["wk"], p["src_attn"]["wv"]], axis=1)),
        "bkv1": stack(lambda p: jnp.concatenate(
            [p["src_attn"]["bk"], p["src_attn"]["bv"]], axis=1)),
        "wo1": stack(lambda p: p["src_attn"]["wo"]),
        "bo1": stack(lambda p: p["src_attn"]["bo"]),
        "ln2_a": stack(lambda p: p["ln2_a"]),
        "ln2_b": stack(lambda p: p["ln2_b"]),
        "w1": stack(lambda p: p["ff"]["w1"]),
        "b1": stack(lambda p: p["ff"]["b1"]),
        "w2": stack(lambda p: p["ff"]["w2"]),
        "b2": stack(lambda p: p["ff"]["b2"]),
        "norm_a": params["norm_a"],
        "norm_b": params["norm_b"],
    }


def decoder_forward(x, memory, source_mask, target_mask, kp, *, n_heads):
    """x:(B,T,D), memory:(B,S,D), source_mask:(B,1,S), target_mask:(B,T,T)."""
    B, T, D = x.shape
    S = memory.shape[1]
    n_layers = kp["wqkv"].shape[0]
    tmask = target_mask.astype(jnp.int32)
    smask = source_mask.astype(jnp.int32)

    weights = [kp[name] for name in _WEIGHT_ORDER]

    in_specs = [
        pl.BlockSpec((1, T, D), lambda b: (b, 0, 0)),   # x
        pl.BlockSpec((1, S, D), lambda b: (b, 0, 0)),   # memory
        pl.BlockSpec((1, T, T), lambda b: (b, 0, 0)),   # target mask
        pl.BlockSpec((1, 1, S), lambda b: (b, 0, 0)),   # source mask
    ]
    # All weights: full-array blocks with a constant index -> fetched once,
    # kept resident in VMEM across grid steps.
    in_specs += [pl.BlockSpec(w.shape, lambda b, nd=w.ndim: (0,) * nd)
                 for w in weights]

    return pl.pallas_call(
        functools.partial(_decoder_kernel, n_layers=n_layers,
                          n_heads=n_heads, eps=1e-6),
        out_shape=jax.ShapeDtypeStruct((B, T, D), x.dtype),
        grid=(B,),
        in_specs=in_specs,
        out_specs=pl.BlockSpec((1, T, D), lambda b: (b, 0, 0)),
        compiler_params=pltpu.CompilerParams(
            dimension_semantics=("parallel",)),
    )(x, memory, tmask, smask, *weights)


# ------------------------- pure-JAX reference -------------------------

def _ref_ln(x, a, b, eps=1e-6):
    mean = jnp.mean(x, -1, keepdims=True)
    std = jnp.sqrt(jnp.sum((x - mean) ** 2, -1, keepdims=True) / (x.shape[-1] - 1))
    return a * (x - mean) / (std + eps) + b


def _ref_mha(xq, xkv, mask, p, h):
    B, Tq, D = xq.shape
    Tk = xkv.shape[1]
    dk = D // h
    q = (xq @ p["wq"] + p["bq"]).reshape(B, Tq, h, dk).transpose(0, 2, 1, 3)
    k = (xkv @ p["wk"] + p["bk"]).reshape(B, Tk, h, dk).transpose(0, 2, 1, 3)
    v = (xkv @ p["wv"] + p["bv"]).reshape(B, Tk, h, dk).transpose(0, 2, 1, 3)
    s = jnp.einsum("bhqd,bhkd->bhqk", q, k) / math.sqrt(dk)
    s = jnp.where(mask[:, None] == 0, -1e9, s)
    pmat = jax.nn.softmax(s, axis=-1)
    o = jnp.einsum("bhqk,bhkd->bhqd", pmat, v).transpose(0, 2, 1, 3).reshape(B, Tq, D)
    return o @ p["wo"] + p["bo"]


def _ref_decoder(x, memory, src_mask, tgt_mask, params, h):
    for p in params["layers"]:
        y = _ref_ln(x, p["ln0_a"], p["ln0_b"])
        x = x + _ref_mha(y, y, tgt_mask, p["self_attn"], h)
        y = _ref_ln(x, p["ln1_a"], p["ln1_b"])
        x = x + _ref_mha(y, memory, src_mask, p["src_attn"], h)
        y = _ref_ln(x, p["ln2_a"], p["ln2_b"])
        hdn = jnp.maximum(y @ p["ff"]["w1"] + p["ff"]["b1"], 0.0)
        x = x + (hdn @ p["ff"]["w2"] + p["ff"]["b2"])
    return _ref_ln(x, params["norm_a"], params["norm_b"])


# ------------------------------ param init ------------------------------

def _init_linear(key, d_in, d_out, scale=0.1):
    kw, kb = jax.random.split(key)
    w = scale * jax.random.normal(kw, (d_in, d_out), jnp.float32)
    b = scale * jax.random.normal(kb, (d_out,), jnp.float32).reshape(1, d_out)
    return w, b


def init_params(key, n_layers, d_model, d_ff):
    params = {"layers": []}
    for _ in range(n_layers):
        lp = {}
        for name in ("self_attn", "src_attn"):
            sub = {}
            for proj in ("q", "k", "v", "o"):
                key, sk = jax.random.split(key)
                sub["w" + proj], sub["b" + proj] = _init_linear(sk, d_model, d_model)
            lp[name] = sub
        key, k1 = jax.random.split(key)
        key, k2 = jax.random.split(key)
        w1, b1 = _init_linear(k1, d_model, d_ff)
        w2, b2 = _init_linear(k2, d_ff, d_model)
        lp["ff"] = {"w1": w1, "b1": b1, "w2": w2, "b2": b2}
        for i in range(3):
            lp[f"ln{i}_a"] = jnp.ones((1, d_model), jnp.float32)
            lp[f"ln{i}_b"] = jnp.zeros((1, d_model), jnp.float32)
        params["layers"].append(lp)
    params["norm_a"] = jnp.ones((1, d_model), jnp.float32)
    params["norm_b"] = jnp.zeros((1, d_model), jnp.float32)
    return params


# ----------------------------------- main -----------------------------------

if __name__ == "__main__":
    B, T_tgt, T_src = 2, 8, 8
    d_model, n_heads, d_ff, n_layers = 32, 4, 64, 2

    key = jax.random.PRNGKey(0)
    kx, km, kp = jax.random.split(key, 3)
    x = jax.random.normal(kx, (B, T_tgt, d_model), jnp.float32)
    memory = jax.random.normal(km, (B, T_src, d_model), jnp.float32)
    source_mask = jnp.ones((B, 1, T_src), jnp.int32)                      # (B, 1, T_src)
    target_mask = jnp.broadcast_to(                                       # (B, T_tgt, T_tgt)
        jnp.tril(jnp.ones((T_tgt, T_tgt), jnp.int32)), (B, T_tgt, T_tgt))

    params = init_params(kp, n_layers, d_model, d_ff)
    kparams = prepare_kernel_params(params)   # stack / pre-concat once

    fwd = jax.jit(functools.partial(decoder_forward, n_heads=n_heads))
    out = fwd(x, memory, source_mask, target_mask, kparams)
    out = jax.block_until_ready(out)

    ref = _ref_decoder(x, memory, source_mask, target_mask, params, n_heads)
    assert out.shape == (B, T_tgt, d_model)
    assert bool(jnp.allclose(out, ref, atol=1e-4, rtol=1e-4)), "mismatch vs pure-JAX reference"

    print("KERNEL_OK")
</pallas_src>

<mosaic_0001>
module attributes {stable_mosaic.version = 11 : i64} {
  func.func @_decoder_kernel(%arg0: i32, %arg1: memref<1x8x32xf32, #tpu.memory_space<vmem>>, %arg2: memref<1x8x32xf32, #tpu.memory_space<vmem>>, %arg3: memref<1x8x8xi32, #tpu.memory_space<vmem>>, %arg4: memref<1x1x8xi32, #tpu.memory_space<vmem>>, %arg5: memref<2x1x32xf32, #tpu.memory_space<vmem>>, %arg6: memref<2x1x32xf32, #tpu.memory_space<vmem>>, %arg7: memref<2x32x96xf32, #tpu.memory_space<vmem>>, %arg8: memref<2x1x96xf32, #tpu.memory_space<vmem>>, %arg9: memref<2x32x32xf32, #tpu.memory_space<vmem>>, %arg10: memref<2x1x32xf32, #tpu.memory_space<vmem>>, %arg11: memref<2x1x32xf32, #tpu.memory_space<vmem>>, %arg12: memref<2x1x32xf32, #tpu.memory_space<vmem>>, %arg13: memref<2x32x32xf32, #tpu.memory_space<vmem>>, %arg14: memref<2x1x32xf32, #tpu.memory_space<vmem>>, %arg15: memref<2x32x64xf32, #tpu.memory_space<vmem>>, %arg16: memref<2x1x64xf32, #tpu.memory_space<vmem>>, %arg17: memref<2x32x32xf32, #tpu.memory_space<vmem>>, %arg18: memref<2x1x32xf32, #tpu.memory_space<vmem>>, %arg19: memref<2x1x32xf32, #tpu.memory_space<vmem>>, %arg20: memref<2x1x32xf32, #tpu.memory_space<vmem>>, %arg21: memref<2x32x64xf32, #tpu.memory_space<vmem>>, %arg22: memref<2x1x64xf32, #tpu.memory_space<vmem>>, %arg23: memref<2x64x32xf32, #tpu.memory_space<vmem>>, %arg24: memref<2x1x32xf32, #tpu.memory_space<vmem>>, %arg25: memref<1x32xf32, #tpu.memory_space<vmem>>, %arg26: memref<1x32xf32, #tpu.memory_space<vmem>>, %arg27: memref<1x8x32xf32, #tpu.memory_space<vmem>>) attributes {dimension_semantics = [#tpu.dimension_semantics<parallel>], iteration_bounds = array<i64: 2>, scalar_prefetch = 0 : i64, scratch_operands = 0 : i64, tpu.core_type = #tpu.core_type<tc>, window_params = [{transform_indices = @transform_0, window_bounds = array<i64: 1, 8, 32>}, {transform_indices = @transform_1, window_bounds = array<i64: 1, 8, 32>}, {transform_indices = @transform_2, window_bounds = array<i64: 1, 8, 8>}, {transform_indices = @transform_3, window_bounds = array<i64: 1, 1, 8>}, {pipeline_mode = #tpu.pipeline_mode<synchronous>, transform_indices = @transform_4, window_bounds = array<i64: 2, 1, 32>}, {pipeline_mode = #tpu.pipeline_mode<synchronous>, transform_indices = @transform_5, window_bounds = array<i64: 2, 1, 32>}, {pipeline_mode = #tpu.pipeline_mode<synchronous>, transform_indices = @transform_6, window_bounds = array<i64: 2, 32, 96>}, {pipeline_mode = #tpu.pipeline_mode<synchronous>, transform_indices = @transform_7, window_bounds = array<i64: 2, 1, 96>}, {pipeline_mode = #tpu.pipeline_mode<synchronous>, transform_indices = @transform_8, window_bounds = array<i64: 2, 32, 32>}, {pipeline_mode = #tpu.pipeline_mode<synchronous>, transform_indices = @transform_9, window_bounds = array<i64: 2, 1, 32>}, {pipeline_mode = #tpu.pipeline_mode<synchronous>, transform_indices = @transform_10, window_bounds = array<i64: 2, 1, 32>}, {pipeline_mode = #tpu.pipeline_mode<synchronous>, transform_indices = @transform_11, window_bounds = array<i64: 2, 1, 32>}, {pipeline_mode = #tpu.pipeline_mode<synchronous>, transform_indices = @transform_12, window_bounds = array<i64: 2, 32, 32>}, {pipeline_mode = #tpu.pipeline_mode<synchronous>, transform_indices = @transform_13, window_bounds = array<i64: 2, 1, 32>}, {pipeline_mode = #tpu.pipeline_mode<synchronous>, transform_indices = @transform_14, window_bounds = array<i64: 2, 32, 64>}, {pipeline_mode = #tpu.pipeline_mode<synchronous>, transform_indices = @transform_15, window_bounds = array<i64: 2, 1, 64>}, {pipeline_mode = #tpu.pipeline_mode<synchronous>, transform_indices = @transform_16, window_bounds = array<i64: 2, 32, 32>}, {pipeline_mode = #tpu.pipeline_mode<synchronous>, transform_indices = @transform_17, window_bounds = array<i64: 2, 1, 32>}, {pipeline_mode = #tpu.pipeline_mode<synchronous>, transform_indices = @transform_18, window_bounds = array<i64: 2, 1, 32>}, {pipeline_mode = #tpu.pipeline_mode<synchronous>, transform_indices = @transform_19, window_bounds = array<i64: 2, 1, 32>}, {pipeline_mode = #tpu.pipeline_mode<synchronous>, transform_indices = @transform_20, window_bounds = array<i64: 2, 32, 64>}, {pipeline_mode = #tpu.pipeline_mode<synchronous>, transform_indices = @transform_21, window_bounds = array<i64: 2, 1, 64>}, {pipeline_mode = #tpu.pipeline_mode<synchronous>, transform_indices = @transform_22, window_bounds = array<i64: 2, 64, 32>}, {pipeline_mode = #tpu.pipeline_mode<synchronous>, transform_indices = @transform_23, window_bounds = array<i64: 2, 1, 32>}, {pipeline_mode = #tpu.pipeline_mode<synchronous>, transform_indices = @transform_24, window_bounds = array<i64: 1, 32>}, {pipeline_mode = #tpu.pipeline_mode<synchronous>, transform_indices = @transform_25, window_bounds = array<i64: 1, 32>}, {transform_indices = @transform_26, window_bounds = array<i64: 1, 8, 32>}]} {
    %c0 = arith.constant 0 : index
    %c0_0 = arith.constant 0 : index
    %c0_1 = arith.constant 0 : index
    %0 = vector.load %arg1[%c0, %c0_0, %c0_1] : memref<1x8x32xf32, #tpu.memory_space<vmem>>, vector<1x8x32xf32>
    %1 = vector.shape_cast %0 : vector<1x8x32xf32> to vector<8x32xf32>
    %c0_2 = arith.constant 0 : index
    %c0_3 = arith.constant 0 : index
    %c0_4 = arith.constant 0 : index
    %2 = vector.load %arg2[%c0_2, %c0_3, %c0_4] : memref<1x8x32xf32, #tpu.memory_space<vmem>>, vector<1x8x32xf32>
    %3 = vector.shape_cast %2 : vector<1x8x32xf32> to vector<8x32xf32>
    %c0_5 = arith.constant 0 : index
    %c0_6 = arith.constant 0 : index
    %c0_7 = arith.constant 0 : index
    %4 = vector.load %arg3[%c0_5, %c0_6, %c0_7] : memref<1x8x8xi32, #tpu.memory_space<vmem>>, vector<1x8x8xi32>
    %5 = vector.shape_cast %4 : vector<1x8x8xi32> to vector<8x8xi32>
    %c0_8 = arith.constant 0 : index
    %c0_9 = arith.constant 0 : index
    %c0_10 = arith.constant 0 : index
    %6 = vector.load %arg4[%c0_8, %c0_9, %c0_10] : memref<1x1x8xi32, #tpu.memory_space<vmem>>, vector<1x1x8xi32>
    %7 = vector.shape_cast %6 : vector<1x1x8xi32> to vector<1x8xi32>
    %c0_11 = arith.constant 0 : index
    %c0_12 = arith.constant 0 : index
    %c0_13 = arith.constant 0 : index
    %8 = vector.load %arg5[%c0_11, %c0_12, %c0_13] : memref<2x1x32xf32, #tpu.memory_space<vmem>>, vector<1x1x32xf32>
    %9 = vector.shape_cast %8 : vector<1x1x32xf32> to vector<1x32xf32>
    %c0_14 = arith.constant 0 : index
    %c0_15 = arith.constant 0 : index
    %c0_16 = arith.constant 0 : index
    %10 = vector.load %arg6[%c0_14, %c0_15, %c0_16] : memref<2x1x32xf32, #tpu.memory_space<vmem>>, vector<1x1x32xf32>
    %11 = vector.shape_cast %10 : vector<1x1x32xf32> to vector<1x32xf32>
    %cst = arith.constant dense<0.000000e+00> : vector<8xf32>
    %12 = vector.multi_reduction <add>, %1, %cst [1] : vector<8x32xf32> to vector<8xf32>
    %13 = vector.shape_cast %12 : vector<8xf32> to vector<8x1xf32>
    %cst_17 = arith.constant 3.200000e+01 : f32
    %14 = vector.broadcast %cst_17 : f32 to vector<8x1xf32>
    %15 = arith.divf %13, %14 : vector<8x1xf32>
    %16 = vector.broadcast %15 : vector<8x1xf32> to vector<8x32xf32>
    %17 = arith.subf %1, %16 : vector<8x32xf32>
    %18 = arith.mulf %17, %17 : vector<8x32xf32>
    %cst_18 = arith.constant dense<0.000000e+00> : vector<8xf32>
    %19 = vector.multi_reduction <add>, %18, %cst_18 [1] : vector<8x32xf32> to vector<8xf32>
    %20 = vector.shape_cast %19 : vector<8xf32> to vector<8x1xf32>
    %cst_19 = arith.constant 3.100000e+01 : f32
    %21 = vector.broadcast %cst_19 : f32 to vector<8x1xf32>
    %22 = arith.divf %20, %21 : vector<8x1xf32>
    %23 = math.sqrt %22 : vector<8x1xf32>
    %24 = vector.broadcast %15 : vector<8x1xf32> to vector<8x32xf32>
    %25 = arith.subf %1, %24 : vector<8x32xf32>
    %26 = vector.broadcast %9 : vector<1x32xf32> to vector<8x32xf32>
    %27 = arith.mulf %26, %25 : vector<8x32xf32>
    %cst_20 = arith.constant 9.99999997E-7 : f32
    %28 = vector.broadcast %cst_20 : f32 to vector<8x1xf32>
    %29 = arith.addf %23, %28 : vector<8x1xf32>
    %30 = vector.broadcast %29 : vector<8x1xf32> to vector<8x32xf32>
    %31 = arith.divf %27, %30 : vector<8x32xf32>
    %32 = vector.broadcast %11 : vector<1x32xf32> to vector<8x32xf32>
    %33 = arith.addf %31, %32 : vector<8x32xf32>
    %c0_21 = arith.constant 0 : index
    %c0_22 = arith.constant 0 : index
    %c0_23 = arith.constant 0 : index
    %34 = vector.load %arg7[%c0_21, %c0_22, %c0_23] : memref<2x32x96xf32, #tpu.memory_space<vmem>>, vector<1x32x96xf32>
    %35 = vector.shape_cast %34 : vector<1x32x96xf32> to vector<32x96xf32>
    %cst_24 = arith.constant dense<0.000000e+00> : vector<8x96xf32>
    %36 = tpu.matmul %33, %35, %cst_24 {dimension_numbers = #tpu.dot_dimension_numbers<[1], [0], [0], [1], [0, 0, 1, 1], [], []>} : vector<8x32xf32>, vector<32x96xf32>, vector<8x96xf32> -> vector<8x96xf32>
    %c0_25 = arith.constant 0 : index
    %c0_26 = arith.constant 0 : index
    %c0_27 = arith.constant 0 : index
    %37 = vector.load %arg8[%c0_25, %c0_26, %c0_27] : memref<2x1x96xf32, #tpu.memory_space<vmem>>, vector<1x1x96xf32>
    %38 = vector.shape_cast %37 : vector<1x1x96xf32> to vector<1x96xf32>
    %39 = vector.broadcast %38 : vector<1x96xf32> to vector<8x96xf32>
    %40 = arith.addf %36, %39 : vector<8x96xf32>
    %41 = vector.extract_strided_slice %40 {offsets = [0, 0], sizes = [8, 32], strides = [1, 1]} : vector<8x96xf32> to vector<8x32xf32>
    %42 = vector.extract_strided_slice %40 {offsets = [0, 32], sizes = [8, 32], strides = [1, 1]} : vector<8x96xf32> to vector<8x32xf32>
    %43 = vector.extract_strided_slice %40 {offsets = [0, 64], sizes = [8, 32], strides = [1, 1]} : vector<8x96xf32> to vector<8x32xf32>
    %44 = vector.extract_strided_slice %41 {offsets = [0, 0], sizes = [8, 8], strides = [1, 1]} : vector<8x32xf32> to vector<8x8xf32>
    %45 = vector.extract_strided_slice %42 {offsets = [0, 0], sizes = [8, 8], strides = [1, 1]} : vector<8x32xf32> to vector<8x8xf32>
    %46 = vector.extract_strided_slice %43 {offsets = [0, 0], sizes = [8, 8], strides = [1, 1]} : vector<8x32xf32> to vector<8x8xf32>
    %cst_28 = arith.constant dense<0.000000e+00> : vector<8x8xf32>
    %47 = tpu.matmul %44, %45, %cst_28 {dimension_numbers = #tpu.dot_dimension_numbers<[1], [1], [0], [0], [0, 0, 1, 0], [], []>} : vector<8x8xf32>, vector<8x8xf32>, vector<8x8xf32> -> vector<8x8xf32>
    %cst_29 = arith.constant 0.353553385 : f32
    %48 = vector.broadcast %cst_29 : f32 to vector<8x8xf32>
    %49 = arith.mulf %47, %48 : vector<8x8xf32>
    %c0_i32 = arith.constant 0 : i32
    %50 = vector.broadcast %c0_i32 : i32 to vector<8x8xi32>
    %51 = arith.cmpi eq, %5, %50 : vector<8x8xi32>
    %cst_30 = arith.constant -1.000000e+09 : f32
    %52 = vector.broadcast %cst_30 : f32 to vector<8x8xf32>
    %53 = arith.select %51, %52, %49 : vector<8x8xi1>, vector<8x8xf32>
    %cst_31 = arith.constant dense<0xFF800000> : vector<8xf32>
    %54 = vector.multi_reduction <maximumf>, %53, %cst_31 [1] : vector<8x8xf32> to vector<8xf32>
    %55 = vector.shape_cast %54 : vector<8xf32> to vector<8x1xf32>
    %56 = vector.broadcast %55 : vector<8x1xf32> to vector<8x8xf32>
    %57 = arith.subf %53, %56 : vector<8x8xf32>
    %58 = math.exp %57 : vector<8x8xf32>
    %cst_32 = arith.constant dense<0.000000e+00> : vector<8xf32>
    %59 = vector.multi_reduction <add>, %58, %cst_32 [1] : vector<8x8xf32> to vector<8xf32>
    %60 = vector.shape_cast %59 : vector<8xf32> to vector<8x1xf32>
    %61 = tpu.reciprocal %60 : vector<8x1xf32> -> vector<8x1xf32>
    %62 = vector.broadcast %61 : vector<8x1xf32> to vector<8x8xf32>
    %63 = arith.mulf %58, %62 : vector<8x8xf32>
    %cst_33 = arith.constant dense<0.000000e+00> : vector<8x8xf32>
    %64 = tpu.matmul %63, %46, %cst_33 {dimension_numbers = #tpu.dot_dimension_numbers<[1], [0], [0], [1], [0, 0, 1, 1], [], []>} : vector<8x8xf32>, vector<8x8xf32>, vector<8x8xf32> -> vector<8x8xf32>
    %65 = vector.extract_strided_slice %41 {offsets = [0, 8], sizes = [8, 8], strides = [1, 1]} : vector<8x32xf32> to vector<8x8xf32>
    %66 = vector.extract_strided_slice %42 {offsets = [0, 8], sizes = [8, 8], strides = [1, 1]} : vector<8x32xf32> to vector<8x8xf32>
    %67 = vector.extract_strided_slice %43 {offsets = [0, 8], sizes = [8, 8], strides = [1, 1]} : vector<8x32xf32> to vector<8x8xf32>
    %cst_34 = arith.constant dense<0.000000e+00> : vector<8x8xf32>
    %68 = tpu.matmul %65, %66, %cst_34 {dimension_numbers = #tpu.dot_dimension_numbers<[1], [1], [0], [0], [0, 0, 1, 0], [], []>} : vector<8x8xf32>, vector<8x8xf32>, vector<8x8xf32> -> vector<8x8xf32>
    %cst_35 = arith.constant 0.353553385 : f32
    %69 = vector.broadcast %cst_35 : f32 to vector<8x8xf32>
    %70 = arith.mulf %68, %69 : vector<8x8xf32>
    %c0_i32_36 = arith.constant 0 : i32
    %71 = vector.broadcast %c0_i32_36 : i32 to vector<8x8xi32>
    %72 = arith.cmpi eq, %5, %71 : vector<8x8xi32>
    %cst_37 = arith.constant -1.000000e+09 : f32
    %73 = vector.broadcast %cst_37 : f32 to vector<8x8xf32>
    %74 = arith.select %72, %73, %70 : vector<8x8xi1>, vector<8x8xf32>
    %cst_38 = arith.constant dense<0xFF800000> : vector<8xf32>
    %75 = vector.multi_reduction <maximumf>, %74, %cst_38 [1] : vector<8x8xf32> to vector<8xf32>
    %76 = vector.shape_cast %75 : vector<8xf32> to vector<8x1xf32>
    %77 = vector.broadcast %76 : vector<8x1xf32> to vector<8x8xf32>
    %78 = arith.subf %74, %77 : vector<8x8xf32>
    %79 = math.exp %78 : vector<8x8xf32>
    %cst_39 = arith.constant dense<0.000000e+00> : vector<8xf32>
    %80 = vector.multi_reduction <add>, %79, %cst_39 [1] : vector<8x8xf32> to vector<8xf32>
    %81 = vector.shape_cast %80 : vector<8xf32> to vector<8x1xf32>
    %82 = tpu.reciprocal %81 : vector<8x1xf32> -> vector<8x1xf32>
    %83 = vector.broadcast %82 : vector<8x1xf32> to vector<8x8xf32>
    %84 = arith.mulf %79, %83 : vector<8x8xf32>
    %cst_40 = arith.constant dense<0.000000e+00> : vector<8x8xf32>
    %85 = tpu.matmul %84, %67, %cst_40 {dimension_numbers = #tpu.dot_dimension_numbers<[1], [0], [0], [1], [0, 0, 1, 1], [], []>} : vector<8x8xf32>, vector<8x8xf32>, vector<8x8xf32> -> vector<8x8xf32>
    %86 = vector.extract_strided_slice %41 {offsets = [0, 16], sizes = [8, 8], strides = [1, 1]} : vector<8x32xf32> to vector<8x8xf32>
    %87 = vector.extract_strided_slice %42 {offsets = [0, 16], sizes = [8, 8], strides = [1, 1]} : vector<8x32xf32> to vector<8x8xf32>
    %88 = vector.extract_strided_slice %43 {offsets = [0, 16], sizes = [8, 8], strides = [1, 1]} : vector<8x32xf32> to vector<8x8xf32>
    %cst_41 = arith.constant dense<0.000000e+00> : vector<8x8xf32>
    %89 = tpu.matmul %86, %87, %cst_41 {dimension_numbers = #tpu.dot_dimension_numbers<[1], [1], [0], [0], [0, 0, 1, 0], [], []>} : vector<8x8xf32>, vector<8x8xf32>, vector<8x8xf32> -> vector<8x8xf32>
    %cst_42 = arith.constant 0.353553385 : f32
    %90 = vector.broadcast %cst_42 : f32 to vector<8x8xf32>
    %91 = arith.mulf %89, %90 : vector<8x8xf32>
    %c0_i32_43 = arith.constant 0 : i32
    %92 = vector.broadcast %c0_i32_43 : i32 to vector<8x8xi32>
    %93 = arith.cmpi eq, %5, %92 : vector<8x8xi32>
    %cst_44 = arith.constant -1.000000e+09 : f32
    %94 = vector.broadcast %cst_44 : f32 to vector<8x8xf32>
    %95 = arith.select %93, %94, %91 : vector<8x8xi1>, vector<8x8xf32>
    %cst_45 = arith.constant dense<0xFF800000> : vector<8xf32>
    %96 = vector.multi_reduction <maximumf>, %95, %cst_45 [1] : vector<8x8xf32> to vector<8xf32>
    %97 = vector.shape_cast %96 : vector<8xf32> to vector<8x1xf32>
    %98 = vector.broadcast %97 : vector<8x1xf32> to vector<8x8xf32>
    %99 = arith.subf %95, %98 : vector<8x8xf32>
    %100 = math.exp %99 : vector<8x8xf32>
    %cst_46 = arith.constant dense<0.000000e+00> : vector<8xf32>
    %101 = vector.multi_reduction <add>, %100, %cst_46 [1] : vector<8x8xf32> to vector<8xf32>
    %102 = vector.shape_cast %101 : vector<8xf32> to vector<8x1xf32>
    %103 = tpu.reciprocal %102 : vector<8x1xf32> -> vector<8x1xf32>
    %104 = vector.broadcast %103 : vector<8x1xf32> to vector<8x8xf32>
    %105 = arith.mulf %100, %104 : vector<8x8xf32>
    %cst_47 = arith.constant dense<0.000000e+00> : vector<8x8xf32>
    %106 = tpu.matmul %105, %88, %cst_47 {dimension_numbers = #tpu.dot_dimension_numbers<[1], [0], [0], [1], [0, 0, 1, 1], [], []>} : vector<8x8xf32>, vector<8x8xf32>, vector<8x8xf32> -> vector<8x8xf32>
    %107 = vector.extract_strided_slice %41 {offsets = [0, 24], sizes = [8, 8], strides = [1, 1]} : vector<8x32xf32> to vector<8x8xf32>
    %108 = vector.extract_strided_slice %42 {offsets = [0, 24], sizes = [8, 8], strides = [1, 1]} : vector<8x32xf32> to vector<8x8xf32>
    %109 = vector.extract_strided_slice %43 {offsets = [0, 24], sizes = [8, 8], strides = [1, 1]} : vector<8x32xf32> to vector<8x8xf32>
    %cst_48 = arith.constant dense<0.000000e+00> : vector<8x8xf32>
    %110 = tpu.matmul %107, %108, %cst_48 {dimension_numbers = #tpu.dot_dimension_numbers<[1], [1], [0], [0], [0, 0, 1, 0], [], []>} : vector<8x8xf32>, vector<8x8xf32>, vector<8x8xf32> -> vector<8x8xf32>
    %cst_49 = arith.constant 0.353553385 : f32
    %111 = vector.broadcast %cst_49 : f32 to vector<8x8xf32>
    %112 = arith.mulf %110, %111 : vector<8x8xf32>
    %c0_i32_50 = arith.constant 0 : i32
    %113 = vector.broadcast %c0_i32_50 : i32 to vector<8x8xi32>
    %114 = arith.cmpi eq, %5, %113 : vector<8x8xi32>
    %cst_51 = arith.constant -1.000000e+09 : f32
    %115 = vector.broadcast %cst_51 : f32 to vector<8x8xf32>
    %116 = arith.select %114, %115, %112 : vector<8x8xi1>, vector<8x8xf32>
    %cst_52 = arith.constant dense<0xFF800000> : vector<8xf32>
    %117 = vector.multi_reduction <maximumf>, %116, %cst_52 [1] : vector<8x8xf32> to vector<8xf32>
    %118 = vector.shape_cast %117 : vector<8xf32> to vector<8x1xf32>
    %119 = vector.broadcast %118 : vector<8x1xf32> to vector<8x8xf32>
    %120 = arith.subf %116, %119 : vector<8x8xf32>
    %121 = math.exp %120 : vector<8x8xf32>
    %cst_53 = arith.constant dense<0.000000e+00> : vector<8xf32>
    %122 = vector.multi_reduction <add>, %121, %cst_53 [1] : vector<8x8xf32> to vector<8xf32>
    %123 = vector.shape_cast %122 : vector<8xf32> to vector<8x1xf32>
    %124 = tpu.reciprocal %123 : vector<8x1xf32> -> vector<8x1xf32>
    %125 = vector.broadcast %124 : vector<8x1xf32> to vector<8x8xf32>
    %126 = arith.mulf %121, %125 : vector<8x8xf32>
    %cst_54 = arith.constant dense<0.000000e+00> : vector<8x8xf32>
    %127 = tpu.matmul %126, %109, %cst_54 {dimension_numbers = #tpu.dot_dimension_numbers<[1], [0], [0], [1], [0, 0, 1, 1], [], []>} : vector<8x8xf32>, vector<8x8xf32>, vector<8x8xf32> -> vector<8x8xf32>
    %128 = tpu.concatenate %64, %85, %106, %127 in 1 : vector<8x8xf32>, vector<8x8xf32>, vector<8x8xf32>, vector<8x8xf32> -> vector<8x32xf32>
    %c0_55 = arith.constant 0 : index
    %c0_56 = arith.constant 0 : index
    %c0_57 = arith.constant 0 : index
    %129 = vector.load %arg9[%c0_55, %c0_56, %c0_57] : memref<2x32x32xf32, #tpu.memory_space<vmem>>, vector<1x32x32xf32>
    %130 = vector.shape_cast %129 : vector<1x32x32xf32> to vector<32x32xf32>
    %cst_58 = arith.constant dense<0.000000e+00> : vector<8x32xf32>
    %131 = tpu.matmul %128, %130, %cst_58 {dimension_numbers = #tpu.dot_dimension_numbers<[1], [0], [0], [1], [0, 0, 1, 1], [], []>} : vector<8x32xf32>, vector<32x32xf32>, vector<8x32xf32> -> vector<8x32xf32>
    %132 = arith.addf %1, %131 : vector<8x32xf32>
    %c0_59 = arith.constant 0 : index
    %c0_60 = arith.constant 0 : index
    %c0_61 = arith.constant 0 : index
    %133 = vector.load %arg10[%c0_59, %c0_60, %c0_61] : memref<2x1x32xf32, #tpu.memory_space<vmem>>, vector<1x1x32xf32>
    %134 = vector.shape_cast %133 : vector<1x1x32xf32> to vector<1x32xf32>
    %135 = vector.broadcast %134 : vector<1x32xf32> to vector<8x32xf32>
    %136 = arith.addf %132, %135 : vector<8x32xf32>
    %c0_62 = arith.constant 0 : index
    %c0_63 = arith.constant 0 : index
    %c0_64 = arith.constant 0 : index
    %137 = vector.load %arg11[%c0_62, %c0_63, %c0_64] : memref<2x1x32xf32, #tpu.memory_space<vmem>>, vector<1x1x32xf32>
    %138 = vector.shape_cast %137 : vector<1x1x32xf32> to vector<1x32xf32>
    %c0_65 = arith.constant 0 : index
    %c0_66 = arith.constant 0 : index
    %c0_67 = arith.constant 0 : index
    %139 = vector.load %arg12[%c0_65, %c0_66, %c0_67] : memref<2x1x32xf32, #tpu.memory_space<vmem>>, vector<1x1x32xf32>
    %140 = vector.shape_cast %139 : vector<1x1x32xf32> to vector<1x32xf32>
    %cst_68 = arith.constant dense<0.000000e+00> : vector<8xf32>
    %141 = vector.multi_reduction <add>, %136, %cst_68 [1] : vector<8x32xf32> to vector<8xf32>
    %142 = vector.shape_cast %141 : vector<8xf32> to vector<8x1xf32>
    %cst_69 = arith.constant 3.200000e+01 : f32
    %143 = vector.broadcast %cst_69 : f32 to vector<8x1xf32>
    %144 = arith.divf %142, %143 : vector<8x1xf32>
    %145 = vector.broadcast %144 : vector<8x1xf32> to vector<8x32xf32>
    %146 = arith.subf %136, %145 : vector<8x32xf32>
    %147 = arith.mulf %146, %146 : vector<8x32xf32>
    %cst_70 = arith.constant dense<0.000000e+00> : vector<8xf32>
    %148 = vector.multi_reduction <add>, %147, %cst_70 [1] : vector<8x32xf32> to vector<8xf32>
    %149 = vector.shape_cast %148 : vector<8xf32> to vector<8x1xf32>
    %cst_71 = arith.constant 3.100000e+01 : f32
    %150 = vector.broadcast %cst_71 : f32 to vector<8x1xf32>
    %151 = arith.divf %149, %150 : vector<8x1xf32>
    %152 = math.sqrt %151 : vector<8x1xf32>
    %153 = vector.broadcast %144 : vector<8x1xf32> to vector<8x32xf32>
    %154 = arith.subf %136, %153 : vector<8x32xf32>
    %155 = vector.broadcast %138 : vector<1x32xf32> to vector<8x32xf32>
    %156 = arith.mulf %155, %154 : vector<8x32xf32>
    %cst_72 = arith.constant 9.99999997E-7 : f32
    %157 = vector.broadcast %cst_72 : f32 to vector<8x1xf32>
    %158 = arith.addf %152, %157 : vector<8x1xf32>
    %159 = vector.broadcast %158 : vector<8x1xf32> to vector<8x32xf32>
    %160 = arith.divf %156, %159 : vector<8x32xf32>
    %161 = vector.broadcast %140 : vector<1x32xf32> to vector<8x32xf32>
    %162 = arith.addf %160, %161 : vector<8x32xf32>
    %c0_73 = arith.constant 0 : index
    %c0_74 = arith.constant 0 : index
    %c0_75 = arith.constant 0 : index
    %163 = vector.load %arg13[%c0_73, %c0_74, %c0_75] : memref<2x32x32xf32, #tpu.memory_space<vmem>>, vector<1x32x32xf32>
    %164 = vector.shape_cast %163 : vector<1x32x32xf32> to vector<32x32xf32>
    %cst_76 = arith.constant dense<0.000000e+00> : vector<8x32xf32>
    %165 = tpu.matmul %162, %164, %cst_76 {dimension_numbers = #tpu.dot_dimension_numbers<[1], [0], [0], [1], [0, 0, 1, 1], [], []>} : vector<8x32xf32>, vector<32x32xf32>, vector<8x32xf32> -> vector<8x32xf32>
    %c0_77 = arith.constant 0 : index
    %c0_78 = arith.constant 0 : index
    %c0_79 = arith.constant 0 : index
    %166 = vector.load %arg14[%c0_77, %c0_78, %c0_79] : memref<2x1x32xf32, #tpu.memory_space<vmem>>, vector<1x1x32xf32>
    %167 = vector.shape_cast %166 : vector<1x1x32xf32> to vector<1x32xf32>
    %168 = vector.broadcast %167 : vector<1x32xf32> to vector<8x32xf32>
    %169 = arith.addf %165, %168 : vector<8x32xf32>
    %c0_80 = arith.constant 0 : index
    %c0_81 = arith.constant 0 : index
    %c0_82 = arith.constant 0 : index
    %170 = vector.load %arg15[%c0_80, %c0_81, %c0_82] : memref<2x32x64xf32, #tpu.memory_space<vmem>>, vector<1x32x64xf32>
    %171 = vector.shape_cast %170 : vector<1x32x64xf32> to vector<32x64xf32>
    %cst_83 = arith.constant dense<0.000000e+00> : vector<8x64xf32>
    %172 = tpu.matmul %3, %171, %cst_83 {dimension_numbers = #tpu.dot_dimension_numbers<[1], [0], [0], [1], [0, 0, 1, 1], [], []>} : vector<8x32xf32>, vector<32x64xf32>, vector<8x64xf32> -> vector<8x64xf32>
    %c0_84 = arith.constant 0 : index
    %c0_85 = arith.constant 0 : index
    %c0_86 = arith.constant 0 : index
    %173 = vector.load %arg16[%c0_84, %c0_85, %c0_86] : memref<2x1x64xf32, #tpu.memory_space<vmem>>, vector<1x1x64xf32>
    %174 = vector.shape_cast %173 : vector<1x1x64xf32> to vector<1x64xf32>
    %175 = vector.broadcast %174 : vector<1x64xf32> to vector<8x64xf32>
    %176 = arith.addf %172, %175 : vector<8x64xf32>
    %177 = vector.extract_strided_slice %176 {offsets = [0, 0], sizes = [8, 32], strides = [1, 1]} : vector<8x64xf32> to vector<8x32xf32>
    %178 = vector.extract_strided_slice %176 {offsets = [0, 32], sizes = [8, 32], strides = [1, 1]} : vector<8x64xf32> to vector<8x32xf32>
    %179 = vector.extract_strided_slice %169 {offsets = [0, 0], sizes = [8, 8], strides = [1, 1]} : vector<8x32xf32> to vector<8x8xf32>
    %180 = vector.extract_strided_slice %177 {offsets = [0, 0], sizes = [8, 8], strides = [1, 1]} : vector<8x32xf32> to vector<8x8xf32>
    %181 = vector.extract_strided_slice %178 {offsets = [0, 0], sizes = [8, 8], strides = [1, 1]} : vector<8x32xf32> to vector<8x8xf32>
    %cst_87 = arith.constant dense<0.000000e+00> : vector<8x8xf32>
    %182 = tpu.matmul %179, %180, %cst_87 {dimension_numbers = #tpu.dot_dimension_numbers<[1], [1], [0], [0], [0, 0, 1, 0], [], []>} : vector<8x8xf32>, vector<8x8xf32>, vector<8x8xf32> -> vector<8x8xf32>
    %cst_88 = arith.constant 0.353553385 : f32
    %183 = vector.broadcast %cst_88 : f32 to vector<8x8xf32>
    %184 = arith.mulf %182, %183 : vector<8x8xf32>
    %c0_i32_89 = arith.constant 0 : i32
    %185 = vector.broadcast %c0_i32_89 : i32 to vector<1x8xi32>
    %186 = arith.cmpi eq, %7, %185 : vector<1x8xi32>
    %cst_90 = arith.constant -1.000000e+09 : f32
    %187 = vector.shape_cast %186 : vector<1x8xi1> to vector<1x8xi1>
    %188 = vector.broadcast %187 : vector<1x8xi1> to vector<8x8xi1>
    %189 = vector.broadcast %cst_90 : f32 to vector<8x8xf32>
    %190 = arith.select %188, %189, %184 : vector<8x8xi1>, vector<8x8xf32>
    %cst_91 = arith.constant dense<0xFF800000> : vector<8xf32>
    %191 = vector.multi_reduction <maximumf>, %190, %cst_91 [1] : vector<8x8xf32> to vector<8xf32>
    %192 = vector.shape_cast %191 : vector<8xf32> to vector<8x1xf32>
    %193 = vector.broadcast %192 : vector<8x1xf32> to vector<8x8xf32>
    %194 = arith.subf %190, %193 : vector<8x8xf32>
    %195 = math.exp %194 : vector<8x8xf32>
    %cst_92 = arith.constant dense<0.000000e+00> : vector<8xf32>
    %196 = vector.multi_reduction <add>, %195, %cst_92 [1] : vector<8x8xf32> to vector<8xf32>
    %197 = vector.shape_cast %196 : vector<8xf32> to vector<8x1xf32>
    %198 = tpu.reciprocal %197 : vector<8x1xf32> -> vector<8x1xf32>
    %199 = vector.broadcast %198 : vector<8x1xf32> to vector<8x8xf32>
    %200 = arith.mulf %195, %199 : vector<8x8xf32>
    %cst_93 = arith.constant dense<0.000000e+00> : vector<8x8xf32>
    %201 = tpu.matmul %200, %181, %cst_93 {dimension_numbers = #tpu.dot_dimension_numbers<[1], [0], [0], [1], [0, 0, 1, 1], [], []>} : vector<8x8xf32>, vector<8x8xf32>, vector<8x8xf32> -> vector<8x8xf32>
    %202 = vector.extract_strided_slice %169 {offsets = [0, 8], sizes = [8, 8], strides = [1, 1]} : vector<8x32xf32> to vector<8x8xf32>
    %203 = vector.extract_strided_slice %177 {offsets = [0, 8], sizes = [8, 8], strides = [1, 1]} : vector<8x32xf32> to vector<8x8xf32>
    %204 = vector.extract_strided_slice %178 {offsets = [0, 8], sizes = [8, 8], strides = [1, 1]} : vector<8x32xf32> to vector<8x8xf32>
    %cst_94 = arith.constant dense<0.000000e+00> : vector<8x8xf32>
    %205 = tpu.matmul %202, %203, %cst_94 {dimension_numbers = #tpu.dot_dimension_numbers<[1], [1], [0], [0], [0, 0, 1, 0], [], []>} : vector<8x8xf32>, vector<8x8xf32>, vector<8x8xf32> -> vector<8x8xf32>
    %cst_95 = arith.constant 0.353553385 : f32
    %206 = vector.broadcast %cst_95 : f32 to vector<8x8xf32>
    %207 = arith.mulf %205, %206 : vector<8x8xf32>
    %c0_i32_96 = arith.constant 0 : i32
    %208 = vector.broadcast %c0_i32_96 : i32 to vector<1x8xi32>
    %209 = arith.cmpi eq, %7, %208 : vector<1x8xi32>
    %cst_97 = arith.constant -1.000000e+09 : f32
    %210 = vector.shape_cast %209 : vector<1x8xi1> to vector<1x8xi1>
    %211 = vector.broadcast %210 : vector<1x8xi1> to vector<8x8xi1>
    %212 = vector.broadcast %cst_97 : f32 to vector<8x8xf32>
    %213 = arith.select %211, %212, %207 : vector<8x8xi1>, vector<8x8xf32>
    %cst_98 = arith.constant dense<0xFF800000> : vector<8xf32>
    %214 = vector.multi_reduction <maximumf>, %213, %cst_98 [1] : vector<8x8xf32> to vector<8xf32>
    %215 = vector.shape_cast %214 : vector<8xf32> to vector<8x1xf32>
    %216 = vector.broadcast %215 : vector<8x1xf32> to vector<8x8xf32>
    %217 = arith.subf %213, %216 : vector<8x8xf32>
    %218 = math.exp %217 : vector<8x8xf32>
    %cst_99 = arith.constant dense<0.000000e+00> : vector<8xf32>
    %219 = vector.multi_reduction <add>, %218, %cst_99 [1] : vector<8x8xf32> to vector<8xf32>
    %220 = vector.shape_cast %219 : vector<8xf32> to vector<8x1xf32>
    %221 = tpu.reciprocal %220 : vector<8x1xf32> -> vector<8x1xf32>
    %222 = vector.broadcast %221 : vector<8x1xf32> to vector<8x8xf32>
    %223 = arith.mulf %218, %222 : vector<8x8xf32>
    %cst_100 = arith.constant dense<0.000000e+00> : vector<8x8xf32>
    %224 = tpu.matmul %223, %204, %cst_100 {dimension_numbers = #tpu.dot_dimension_numbers<[1], [0], [0], [1], [0, 0, 1, 1], [], []>} : vector<8x8xf32>, vector<8x8xf32>, vector<8x8xf32> -> vector<8x8xf32>
    %225 = vector.extract_strided_slice %169 {offsets = [0, 16], sizes = [8, 8], strides = [1, 1]} : vector<8x32xf32> to vector<8x8xf32>
    %226 = vector.extract_strided_slice %177 {offsets = [0, 16], sizes = [8, 8], strides = [1, 1]} : vector<8x32xf32> to vector<8x8xf32>
    %227 = vector.extract_strided_slice %178 {offsets = [0, 16], sizes = [8, 8], strides = [1, 1]} : vector<8x32xf32> to vector<8x8xf32>
    %cst_101 = arith.constant dense<0.000000e+00> : vector<8x8xf32>
    %228 = tpu.matmul %225, %226, %cst_101 {dimension_numbers = #tpu.dot_dimension_numbers<[1], [1], [0], [0], [0, 0, 1, 0], [], []>} : vector<8x8xf32>, vector<8x8xf32>, vector<8x8xf32> -> vector<8x8xf32>
    %cst_102 = arith.constant 0.353553385 : f32
    %229 = vector.broadcast %cst_102 : f32 to vector<8x8xf32>
    %230 = arith.mulf %228, %229 : vector<8x8xf32>
    %c0_i32_103 = arith.constant 0 : i32
    %231 = vector.broadcast %c0_i32_103 : i32 to vector<1x8xi32>
    %232 = arith.cmpi eq, %7, %231 : vector<1x8xi32>
    %cst_104 = arith.constant -1.000000e+09 : f32
    %233 = vector.shape_cast %232 : vector<1x8xi1> to vector<1x8xi1>
    %234 = vector.broadcast %233 : vector<1x8xi1> to vector<8x8xi1>
    %235 = vector.broadcast %cst_104 : f32 to vector<8x8xf32>
    %236 = arith.select %234, %235, %230 : vector<8x8xi1>, vector<8x8xf32>
    %cst_105 = arith.constant dense<0xFF800000> : vector<8xf32>
    %237 = vector.multi_reduction <maximumf>, %236, %cst_105 [1] : vector<8x8xf32> to vector<8xf32>
    %238 = vector.shape_cast %237 : vector<8xf32> to vector<8x1xf32>
    %239 = vector.broadcast %238 : vector<8x1xf32> to vector<8x8xf32>
    %240 = arith.subf %236, %239 : vector<8x8xf32>
    %241 = math.exp %240 : vector<8x8xf32>
    %cst_106 = arith.constant dense<0.000000e+00> : vector<8xf32>
    %242 = vector.multi_reduction <add>, %241, %cst_106 [1] : vector<8x8xf32> to vector<8xf32>
    %243 = vector.shape_cast %242 : vector<8xf32> to vector<8x1xf32>
    %244 = tpu.reciprocal %243 : vector<8x1xf32> -> vector<8x1xf32>
    %245 = vector.broadcast %244 : vector<8x1xf32> to vector<8x8xf32>
    %246 = arith.mulf %241, %245 : vector<8x8xf32>
    %cst_107 = arith.constant dense<0.000000e+00> : vector<8x8xf32>
    %247 = tpu.matmul %246, %227, %cst_107 {dimension_numbers = #tpu.dot_dimension_numbers<[1], [0], [0], [1], [0, 0, 1, 1], [], []>} : vector<8x8xf32>, vector<8x8xf32>, vector<8x8xf32> -> vector<8x8xf32>
    %248 = vector.extract_strided_slice %169 {offsets = [0, 24], sizes = [8, 8], strides = [1, 1]} : vector<8x32xf32> to vector<8x8xf32>
    %249 = vector.extract_strided_slice %177 {offsets = [0, 24], sizes = [8, 8], strides = [1, 1]} : vector<8x32xf32> to vector<8x8xf32>
    %250 = vector.extract_strided_slice %178 {offsets = [0, 24], sizes = [8, 8], strides = [1, 1]} : vector<8x32xf32> to vector<8x8xf32>
    %cst_108 = arith.constant dense<0.000000e+00> : vector<8x8xf32>
    %251 = tpu.matmul %248, %249, %cst_108 {dimension_numbers = #tpu.dot_dimension_numbers<[1], [1], [0], [0], [0, 0, 1, 0], [], []>} : vector<8x8xf32>, vector<8x8xf32>, vector<8x8xf32> -> vector<8x8xf32>
    %cst_109 = arith.constant 0.353553385 : f32
    %252 = vector.broadcast %cst_109 : f32 to vector<8x8xf32>
    %253 = arith.mulf %251, %252 : vector<8x8xf32>
    %c0_i32_110 = arith.constant 0 : i32
    %254 = vector.broadcast %c0_i32_110 : i32 to vector<1x8xi32>
    %255 = arith.cmpi eq, %7, %254 : vector<1x8xi32>
    %cst_111 = arith.constant -1.000000e+09 : f32
    %256 = vector.shape_cast %255 : vector<1x8xi1> to vector<1x8xi1>
    %257 = vector.broadcast %256 : vector<1x8xi1> to vector<8x8xi1>
    %258 = vector.broadcast %cst_111 : f32 to vector<8x8xf32>
    %259 = arith.select %257, %258, %253 : vector<8x8xi1>, vector<8x8xf32>
    %cst_112 = arith.constant dense<0xFF800000> : vector<8xf32>
    %260 = vector.multi_reduction <maximumf>, %259, %cst_112 [1] : vector<8x8xf32> to vector<8xf32>
    %261 = vector.shape_cast %260 : vector<8xf32> to vector<8x1xf32>
    %262 = vector.broadcast %261 : vector<8x1xf32> to vector<8x8xf32>
    %263 = arith.subf %259, %262 : vector<8x8xf32>
    %264 = math.exp %263 : vector<8x8xf32>
    %cst_113 = arith.constant dense<0.000000e+00> : vector<8xf32>
    %265 = vector.multi_reduction <add>, %264, %cst_113 [1] : vector<8x8xf32> to vector<8xf32>
    %266 = vector.shape_cast %265 : vector<8xf32> to vector<8x1xf32>
    %267 = tpu.reciprocal %266 : vector<8x1xf32> -> vector<8x1xf32>
    %268 = vector.broadcast %267 : vector<8x1xf32> to vector<8x8xf32>
    %269 = arith.mulf %264, %268 : vector<8x8xf32>
    %cst_114 = arith.constant dense<0.000000e+00> : vector<8x8xf32>
    %270 = tpu.matmul %269, %250, %cst_114 {dimension_numbers = #tpu.dot_dimension_numbers<[1], [0], [0], [1], [0, 0, 1, 1], [], []>} : vector<8x8xf32>, vector<8x8xf32>, vector<8x8xf32> -> vector<8x8xf32>
    %271 = tpu.concatenate %201, %224, %247, %270 in 1 : vector<8x8xf32>, vector<8x8xf32>, vector<8x8xf32>, vector<8x8xf32> -> vector<8x32xf32>
    %c0_115 = arith.constant 0 : index
    %c0_116 = arith.constant 0 : index
    %c0_117 = arith.constant 0 : index
    %272 = vector.load %arg17[%c0_115, %c0_116, %c0_117] : memref<2x32x32xf32, #tpu.memory_space<vmem>>, vector<1x32x32xf32>
    %273 = vector.shape_cast %272 : vector<1x32x32xf32> to vector<32x32xf32>
    %cst_118 = arith.constant dense<0.000000e+00> : vector<8x32xf32>
    %274 = tpu.matmul %271, %273, %cst_118 {dimension_numbers = #tpu.dot_dimension_numbers<[1], [0], [0], [1], [0, 0, 1, 1], [], []>} : vector<8x32xf32>, vector<32x32xf32>, vector<8x32xf32> -> vector<8x32xf32>
    %275 = arith.addf %136, %274 : vector<8x32xf32>
    %c0_119 = arith.constant 0 : index
    %c0_120 = arith.constant 0 : index
    %c0_121 = arith.constant 0 : index
    %276 = vector.load %arg18[%c0_119, %c0_120, %c0_121] : memref<2x1x32xf32, #tpu.memory_space<vmem>>, vector<1x1x32xf32>
    %277 = vector.shape_cast %276 : vector<1x1x32xf32> to vector<1x32xf32>
    %278 = vector.broadcast %277 : vector<1x32xf32> to vector<8x32xf32>
    %279 = arith.addf %275, %278 : vector<8x32xf32>
    %c0_122 = arith.constant 0 : index
    %c0_123 = arith.constant 0 : index
    %c0_124 = arith.constant 0 : index
    %280 = vector.load %arg19[%c0_122, %c0_123, %c0_124] : memref<2x1x32xf32, #tpu.memory_space<vmem>>, vector<1x1x32xf32>
    %281 = vector.shape_cast %280 : vector<1x1x32xf32> to vector<1x32xf32>
    %c0_125 = arith.constant 0 : index
    %c0_126 = arith.constant 0 : index
    %c0_127 = arith.constant 0 : index
    %282 = vector.load %arg20[%c0_125, %c0_126, %c0_127] : memref<2x1x32xf32, #tpu.memory_space<vmem>>, vector<1x1x32xf32>
    %283 = vector.shape_cast %282 : vector<1x1x32xf32> to vector<1x32xf32>
    %cst_128 = arith.constant dense<0.000000e+00> : vector<8xf32>
    %284 = vector.multi_reduction <add>, %279, %cst_128 [1] : vector<8x32xf32> to vector<8xf32>
    %285 = vector.shape_cast %284 : vector<8xf32> to vector<8x1xf32>
    %cst_129 = arith.constant 3.200000e+01 : f32
    %286 = vector.broadcast %cst_129 : f32 to vector<8x1xf32>
    %287 = arith.divf %285, %286 : vector<8x1xf32>
    %288 = vector.broadcast %287 : vector<8x1xf32> to vector<8x32xf32>
    %289 = arith.subf %279, %288 : vector<8x32xf32>
    %290 = arith.mulf %289, %289 : vector<8x32xf32>
    %cst_130 = arith.constant dense<0.000000e+00> : vector<8xf32>
    %291 = vector.multi_reduction <add>, %290, %cst_130 [1] : vector<8x32xf32> to vector<8xf32>
    %292 = vector.shape_cast %291 : vector<8xf32> to vector<8x1xf32>
    %cst_131 = arith.constant 3.100000e+01 : f32
    %293 = vector.broadcast %cst_131 : f32 to vector<8x1xf32>
    %294 = arith.divf %292, %293 : vector<8x1xf32>
    %295 = math.sqrt %294 : vector<8x1xf32>
    %296 = vector.broadcast %287 : vector<8x1xf32> to vector<8x32xf32>
    %297 = arith.subf %279, %296 : vector<8x32xf32>
    %298 = vector.broadcast %281 : vector<1x32xf32> to vector<8x32xf32>
    %299 = arith.mulf %298, %297 : vector<8x32xf32>
    %cst_132 = arith.constant 9.99999997E-7 : f32
    %300 = vector.broadcast %cst_132 : f32 to vector<8x1xf32>
    %301 = arith.addf %295, %300 : vector<8x1xf32>
    %302 = vector.broadcast %301 : vector<8x1xf32> to vector<8x32xf32>
    %303 = arith.divf %299, %302 : vector<8x32xf32>
    %304 = vector.broadcast %283 : vector<1x32xf32> to vector<8x32xf32>
    %305 = arith.addf %303, %304 : vector<8x32xf32>
    %c0_133 = arith.constant 0 : index
    %c0_134 = arith.constant 0 : index
    %c0_135 = arith.constant 0 : index
    %306 = vector.load %arg21[%c0_133, %c0_134, %c0_135] : memref<2x32x64xf32, #tpu.memory_space<vmem>>, vector<1x32x64xf32>
    %307 = vector.shape_cast %306 : vector<1x32x64xf32> to vector<32x64xf32>
    %cst_136 = arith.constant dense<0.000000e+00> : vector<8x64xf32>
    %308 = tpu.matmul %305, %307, %cst_136 {dimension_numbers = #tpu.dot_dimension_numbers<[1], [0], [0], [1], [0, 0, 1, 1], [], []>} : vector<8x32xf32>, vector<32x64xf32>, vector<8x64xf32> -> vector<8x64xf32>
    %c0_137 = arith.constant 0 : index
    %c0_138 = arith.constant 0 : index
    %c0_139 = arith.constant 0 : index
    %309 = vector.load %arg22[%c0_137, %c0_138, %c0_139] : memref<2x1x64xf32, #tpu.memory_space<vmem>>, vector<1x1x64xf32>
    %310 = vector.shape_cast %309 : vector<1x1x64xf32> to vector<1x64xf32>
    %311 = vector.broadcast %310 : vector<1x64xf32> to vector<8x64xf32>
    %312 = arith.addf %308, %311 : vector<8x64xf32>
    %cst_140 = arith.constant 0.000000e+00 : f32
    %313 = vector.broadcast %cst_140 : f32 to vector<8x64xf32>
    %314 = arith.maximumf %312, %313 : vector<8x64xf32>
    %c0_141 = arith.constant 0 : index
    %c0_142 = arith.constant 0 : index
    %c0_143 = arith.constant 0 : index
    %315 = vector.load %arg23[%c0_141, %c0_142, %c0_143] : memref<2x64x32xf32, #tpu.memory_space<vmem>>, vector<1x64x32xf32>
    %316 = vector.shape_cast %315 : vector<1x64x32xf32> to vector<64x32xf32>
    %cst_144 = arith.constant dense<0.000000e+00> : vector<8x32xf32>
    %317 = tpu.matmul %314, %316, %cst_144 {dimension_numbers = #tpu.dot_dimension_numbers<[1], [0], [0], [1], [0, 0, 1, 1], [], []>} : vector<8x64xf32>, vector<64x32xf32>, vector<8x32xf32> -> vector<8x32xf32>
    %318 = arith.addf %279, %317 : vector<8x32xf32>
    %c0_145 = arith.constant 0 : index
    %c0_146 = arith.constant 0 : index
    %c0_147 = arith.constant 0 : index
    %319 = vector.load %arg24[%c0_145, %c0_146, %c0_147] : memref<2x1x32xf32, #tpu.memory_space<vmem>>, vector<1x1x32xf32>
    %320 = vector.shape_cast %319 : vector<1x1x32xf32> to vector<1x32xf32>
    %321 = vector.broadcast %320 : vector<1x32xf32> to vector<8x32xf32>
    %322 = arith.addf %318, %321 : vector<8x32xf32>
    %c1 = arith.constant 1 : index
    %c0_148 = arith.constant 0 : index
    %c0_149 = arith.constant 0 : index
    %323 = vector.load %arg5[%c1, %c0_148, %c0_149] : memref<2x1x32xf32, #tpu.memory_space<vmem>>, vector<1x1x32xf32>
    %324 = vector.shape_cast %323 : vector<1x1x32xf32> to vector<1x32xf32>
    %c1_150 = arith.constant 1 : index
    %c0_151 = arith.constant 0 : index
    %c0_152 = arith.constant 0 : index
    %325 = vector.load %arg6[%c1_150, %c0_151, %c0_152] : memref<2x1x32xf32, #tpu.memory_space<vmem>>, vector<1x1x32xf32>
    %326 = vector.shape_cast %325 : vector<1x1x32xf32> to vector<1x32xf32>
    %cst_153 = arith.constant dense<0.000000e+00> : vector<8xf32>
    %327 = vector.multi_reduction <add>, %322, %cst_153 [1] : vector<8x32xf32> to vector<8xf32>
    %328 = vector.shape_cast %327 : vector<8xf32> to vector<8x1xf32>
    %cst_154 = arith.constant 3.200000e+01 : f32
    %329 = vector.broadcast %cst_154 : f32 to vector<8x1xf32>
    %330 = arith.divf %328, %329 : vector<8x1xf32>
    %331 = vector.broadcast %330 : vector<8x1xf32> to vector<8x32xf32>
    %332 = arith.subf %322, %331 : vector<8x32xf32>
    %333 = arith.mulf %332, %332 : vector<8x32xf32>
    %cst_155 = arith.constant dense<0.000000e+00> : vector<8xf32>
    %334 = vector.multi_reduction <add>, %333, %cst_155 [1] : vector<8x32xf32> to vector<8xf32>
    %335 = vector.shape_cast %334 : vector<8xf32> to vector<8x1xf32>
    %cst_156 = arith.constant 3.100000e+01 : f32
    %336 = vector.broadcast %cst_156 : f32 to vector<8x1xf32>
    %337 = arith.divf %335, %336 : vector<8x1xf32>
    %338 = math.sqrt %337 : vector<8x1xf32>
    %339 = vector.broadcast %330 : vector<8x1xf32> to vector<8x32xf32>
    %340 = arith.subf %322, %339 : vector<8x32xf32>
    %341 = vector.broadcast %324 : vector<1x32xf32> to vector<8x32xf32>
    %342 = arith.mulf %341, %340 : vector<8x32xf32>
    %cst_157 = arith.constant 9.99999997E-7 : f32
    %343 = vector.broadcast %cst_157 : f32 to vector<8x1xf32>
    %344 = arith.addf %338, %343 : vector<8x1xf32>
    %345 = vector.broadcast %344 : vector<8x1xf32> to vector<8x32xf32>
    %346 = arith.divf %342, %345 : vector<8x32xf32>
    %347 = vector.broadcast %326 : vector<1x32xf32> to vector<8x32xf32>
    %348 = arith.addf %346, %347 : vector<8x32xf32>
    %c1_158 = arith.constant 1 : index
    %c0_159 = arith.constant 0 : index
    %c0_160 = arith.constant 0 : index
    %349 = vector.load %arg7[%c1_158, %c0_159, %c0_160] : memref<2x32x96xf32, #tpu.memory_space<vmem>>, vector<1x32x96xf32>
    %350 = vector.shape_cast %349 : vector<1x32x96xf32> to vector<32x96xf32>
    %cst_161 = arith.constant dense<0.000000e+00> : vector<8x96xf32>
    %351 = tpu.matmul %348, %350, %cst_161 {dimension_numbers = #tpu.dot_dimension_numbers<[1], [0], [0], [1], [0, 0, 1, 1], [], []>} : vector<8x32xf32>, vector<32x96xf32>, vector<8x96xf32> -> vector<8x96xf32>
    %c1_162 = arith.constant 1 : index
    %c0_163 = arith.constant 0 : index
    %c0_164 = arith.constant 0 : index
    %352 = vector.load %arg8[%c1_162, %c0_163, %c0_164] : memref<2x1x96xf32, #tpu.memory_space<vmem>>, vector<1x1x96xf32>
    %353 = vector.shape_cast %352 : vector<1x1x96xf32> to vector<1x96xf32>
    %354 = vector.broadcast %353 : vector<1x96xf32> to vector<8x96xf32>
    %355 = arith.addf %351, %354 : vector<8x96xf32>
    %356 = vector.extract_strided_slice %355 {offsets = [0, 0], sizes = [8, 32], strides = [1, 1]} : vector<8x96xf32> to vector<8x32xf32>
    %357 = vector.extract_strided_slice %355 {offsets = [0, 32], sizes = [8, 32], strides = [1, 1]} : vector<8x96xf32> to vector<8x32xf32>
    %358 = vector.extract_strided_slice %355 {offsets = [0, 64], sizes = [8, 32], strides = [1, 1]} : vector<8x96xf32> to vector<8x32xf32>
    %359 = vector.extract_strided_slice %356 {offsets = [0, 0], sizes = [8, 8], strides = [1, 1]} : vector<8x32xf32> to vector<8x8xf32>
    %360 = vector.extract_strided_slice %357 {offsets = [0, 0], sizes = [8, 8], strides = [1, 1]} : vector<8x32xf32> to vector<8x8xf32>
    %361 = vector.extract_strided_slice %358 {offsets = [0, 0], sizes = [8, 8], strides = [1, 1]} : vector<8x32xf32> to vector<8x8xf32>
    %cst_165 = arith.constant dense<0.000000e+00> : vector<8x8xf32>
    %362 = tpu.matmul %359, %360, %cst_165 {dimension_numbers = #tpu.dot_dimension_numbers<[1], [1], [0], [0], [0, 0, 1, 0], [], []>} : vector<8x8xf32>, vector<8x8xf32>, vector<8x8xf32> -> vector<8x8xf32>
    %cst_166 = arith.constant 0.353553385 : f32
    %363 = vector.broadcast %cst_166 : f32 to vector<8x8xf32>
    %364 = arith.mulf %362, %363 : vector<8x8xf32>
    %c0_i32_167 = arith.constant 0 : i32
    %365 = vector.broadcast %c0_i32_167 : i32 to vector<8x8xi32>
    %366 = arith.cmpi eq, %5, %365 : vector<8x8xi32>
    %cst_168 = arith.constant -1.000000e+09 : f32
    %367 = vector.broadcast %cst_168 : f32 to vector<8x8xf32>
    %368 = arith.select %366, %367, %364 : vector<8x8xi1>, vector<8x8xf32>
    %cst_169 = arith.constant dense<0xFF800000> : vector<8xf32>
    %369 = vector.multi_reduction <maximumf>, %368, %cst_169 [1] : vector<8x8xf32> to vector<8xf32>
    %370 = vector.shape_cast %369 : vector<8xf32> to vector<8x1xf32>
    %371 = vector.broadcast %370 : vector<8x1xf32> to vector<8x8xf32>
    %372 = arith.subf %368, %371 : vector<8x8xf32>
    %373 = math.exp %372 : vector<8x8xf32>
    %cst_170 = arith.constant dense<0.000000e+00> : vector<8xf32>
    %374 = vector.multi_reduction <add>, %373, %cst_170 [1] : vector<8x8xf32> to vector<8xf32>
    %375 = vector.shape_cast %374 : vector<8xf32> to vector<8x1xf32>
    %376 = tpu.reciprocal %375 : vector<8x1xf32> -> vector<8x1xf32>
    %377 = vector.broadcast %376 : vector<8x1xf32> to vector<8x8xf32>
    %378 = arith.mulf %373, %377 : vector<8x8xf32>
    %cst_171 = arith.constant dense<0.000000e+00> : vector<8x8xf32>
    %379 = tpu.matmul %378, %361, %cst_171 {dimension_numbers = #tpu.dot_dimension_numbers<[1], [0], [0], [1], [0, 0, 1, 1], [], []>} : vector<8x8xf32>, vector<8x8xf32>, vector<8x8xf32> -> vector<8x8xf32>
    %380 = vector.extract_strided_slice %356 {offsets = [0, 8], sizes = [8, 8], strides = [1, 1]} : vector<8x32xf32> to vector<8x8xf32>
    %381 = vector.extract_strided_slice %357 {offsets = [0, 8], sizes = [8, 8], strides = [1, 1]} : vector<8x32xf32> to vector<8x8xf32>
    %382 = vector.extract_strided_slice %358 {offsets = [0, 8], sizes = [8, 8], strides = [1, 1]} : vector<8x32xf32> to vector<8x8xf32>
    %cst_172 = arith.constant dense<0.000000e+00> : vector<8x8xf32>
    %383 = tpu.matmul %380, %381, %cst_172 {dimension_numbers = #tpu.dot_dimension_numbers<[1], [1], [0], [0], [0, 0, 1, 0], [], []>} : vector<8x8xf32>, vector<8x8xf32>, vector<8x8xf32> -> vector<8x8xf32>
    %cst_173 = arith.constant 0.353553385 : f32
    %384 = vector.broadcast %cst_173 : f32 to vector<8x8xf32>
    %385 = arith.mulf %383, %384 : vector<8x8xf32>
    %c0_i32_174 = arith.constant 0 : i32
    %386 = vector.broadcast %c0_i32_174 : i32 to vector<8x8xi32>
    %387 = arith.cmpi eq, %5, %386 : vector<8x8xi32>
    %cst_175 = arith.constant -1.000000e+09 : f32
    %388 = vector.broadcast %cst_175 : f32 to vector<8x8xf32>
    %389 = arith.select %387, %388, %385 : vector<8x8xi1>, vector<8x8xf32>
    %cst_176 = arith.constant dense<0xFF800000> : vector<8xf32>
    %390 = vector.multi_reduction <maximumf>, %389, %cst_176 [1] : vector<8x8xf32> to vector<8xf32>
    %391 = vector.shape_cast %390 : vector<8xf32> to vector<8x1xf32>
    %392 = vector.broadcast %391 : vector<8x1xf32> to vector<8x8xf32>
    %393 = arith.subf %389, %392 : vector<8x8xf32>
    %394 = math.exp %393 : vector<8x8xf32>
    %cst_177 = arith.constant dense<0.000000e+00> : vector<8xf32>
    %395 = vector.multi_reduction <add>, %394, %cst_177 [1] : vector<8x8xf32> to vector<8xf32>
    %396 = vector.shape_cast %395 : vector<8xf32> to vector<8x1xf32>
    %397 = tpu.reciprocal %396 : vector<8x1xf32> -> vector<8x1xf32>
    %398 = vector.broadcast %397 : vector<8x1xf32> to vector<8x8xf32>
    %399 = arith.mulf %394, %398 : vector<8x8xf32>
    %cst_178 = arith.constant dense<0.000000e+00> : vector<8x8xf32>
    %400 = tpu.matmul %399, %382, %cst_178 {dimension_numbers = #tpu.dot_dimension_numbers<[1], [0], [0], [1], [0, 0, 1, 1], [], []>} : vector<8x8xf32>, vector<8x8xf32>, vector<8x8xf32> -> vector<8x8xf32>
    %401 = vector.extract_strided_slice %356 {offsets = [0, 16], sizes = [8, 8], strides = [1, 1]} : vector<8x32xf32> to vector<8x8xf32>
    %402 = vector.extract_strided_slice %357 {offsets = [0, 16], sizes = [8, 8], strides = [1, 1]} : vector<8x32xf32> to vector<8x8xf32>
    %403 = vector.extract_strided_slice %358 {offsets = [0, 16], sizes = [8, 8], strides = [1, 1]} : vector<8x32xf32> to vector<8x8xf32>
    %cst_179 = arith.constant dense<0.000000e+00> : vector<8x8xf32>
    %404 = tpu.matmul %401, %402, %cst_179 {dimension_numbers = #tpu.dot_dimension_numbers<[1], [1], [0], [0], [0, 0, 1, 0], [], []>} : vector<8x8xf32>, vector<8x8xf32>, vector<8x8xf32> -> vector<8x8xf32>
    %cst_180 = arith.constant 0.353553385 : f32
    %405 = vector.broadcast %cst_180 : f32 to vector<8x8xf32>
    %406 = arith.mulf %404, %405 : vector<8x8xf32>
    %c0_i32_181 = arith.constant 0 : i32
    %407 = vector.broadcast %c0_i32_181 : i32 to vector<8x8xi32>
    %408 = arith.cmpi eq, %5, %407 : vector<8x8xi32>
    %cst_182 = arith.constant -1.000000e+09 : f32
    %409 = vector.broadcast %cst_182 : f32 to vector<8x8xf32>
    %410 = arith.select %408, %409, %406 : vector<8x8xi1>, vector<8x8xf32>
    %cst_183 = arith.constant dense<0xFF800000> : vector<8xf32>
    %411 = vector.multi_reduction <maximumf>, %410, %cst_183 [1] : vector<8x8xf32> to vector<8xf32>
    %412 = vector.shape_cast %411 : vector<8xf32> to vector<8x1xf32>
    %413 = vector.broadcast %412 : vector<8x1xf32> to vector<8x8xf32>
    %414 = arith.subf %410, %413 : vector<8x8xf32>
    %415 = math.exp %414 : vector<8x8xf32>
    %cst_184 = arith.constant dense<0.000000e+00> : vector<8xf32>
    %416 = vector.multi_reduction <add>, %415, %cst_184 [1] : vector<8x8xf32> to vector<8xf32>
    %417 = vector.shape_cast %416 : vector<8xf32> to vector<8x1xf32>
    %418 = tpu.reciprocal %417 : vector<8x1xf32> -> vector<8x1xf32>
    %419 = vector.broadcast %418 : vector<8x1xf32> to vector<8x8xf32>
    %420 = arith.mulf %415, %419 : vector<8x8xf32>
    %cst_185 = arith.constant dense<0.000000e+00> : vector<8x8xf32>
    %421 = tpu.matmul %420, %403, %cst_185 {dimension_numbers = #tpu.dot_dimension_numbers<[1], [0], [0], [1], [0, 0, 1, 1], [], []>} : vector<8x8xf32>, vector<8x8xf32>, vector<8x8xf32> -> vector<8x8xf32>
    %422 = vector.extract_strided_slice %356 {offsets = [0, 24], sizes = [8, 8], strides = [1, 1]} : vector<8x32xf32> to vector<8x8xf32>
    %423 = vector.extract_strided_slice %357 {offsets = [0, 24], sizes = [8, 8], strides = [1, 1]} : vector<8x32xf32> to vector<8x8xf32>
    %424 = vector.extract_strided_slice %358 {offsets = [0, 24], sizes = [8, 8], strides = [1, 1]} : vector<8x32xf32> to vector<8x8xf32>
    %cst_186 = arith.constant dense<0.000000e+00> : vector<8x8xf32>
    %425 = tpu.matmul %422, %423, %cst_186 {dimension_numbers = #tpu.dot_dimension_numbers<[1], [1], [0], [0], [0, 0, 1, 0], [], []>} : vector<8x8xf32>, vector<8x8xf32>, vector<8x8xf32> -> vector<8x8xf32>
    %cst_187 = arith.constant 0.353553385 : f32
    %426 = vector.broadcast %cst_187 : f32 to vector<8x8xf32>
    %427 = arith.mulf %425, %426 : vector<8x8xf32>
    %c0_i32_188 = arith.constant 0 : i32
    %428 = vector.broadcast %c0_i32_188 : i32 to vector<8x8xi32>
    %429 = arith.cmpi eq, %5, %428 : vector<8x8xi32>
    %cst_189 = arith.constant -1.000000e+09 : f32
    %430 = vector.broadcast %cst_189 : f32 to vector<8x8xf32>
    %431 = arith.select %429, %430, %427 : vector<8x8xi1>, vector<8x8xf32>
    %cst_190 = arith.constant dense<0xFF800000> : vector<8xf32>
    %432 = vector.multi_reduction <maximumf>, %431, %cst_190 [1] : vector<8x8xf32> to vector<8xf32>
    %433 = vector.shape_cast %432 : vector<8xf32> to vector<8x1xf32>
    %434 = vector.broadcast %433 : vector<8x1xf32> to vector<8x8xf32>
    %435 = arith.subf %431, %434 : vector<8x8xf32>
    %436 = math.exp %435 : vector<8x8xf32>
    %cst_191 = arith.constant dense<0.000000e+00> : vector<8xf32>
    %437 = vector.multi_reduction <add>, %436, %cst_191 [1] : vector<8x8xf32> to vector<8xf32>
    %438 = vector.shape_cast %437 : vector<8xf32> to vector<8x1xf32>
    %439 = tpu.reciprocal %438 : vector<8x1xf32> -> vector<8x1xf32>
    %440 = vector.broadcast %439 : vector<8x1xf32> to vector<8x8xf32>
    %441 = arith.mulf %436, %440 : vector<8x8xf32>
    %cst_192 = arith.constant dense<0.000000e+00> : vector<8x8xf32>
    %442 = tpu.matmul %441, %424, %cst_192 {dimension_numbers = #tpu.dot_dimension_numbers<[1], [0], [0], [1], [0, 0, 1, 1], [], []>} : vector<8x8xf32>, vector<8x8xf32>, vector<8x8xf32> -> vector<8x8xf32>
    %443 = tpu.concatenate %379, %400, %421, %442 in 1 : vector<8x8xf32>, vector<8x8xf32>, vector<8x8xf32>, vector<8x8xf32> -> vector<8x32xf32>
    %c1_193 = arith.constant 1 : index
    %c0_194 = arith.constant 0 : index
    %c0_195 = arith.constant 0 : index
    %444 = vector.load %arg9[%c1_193, %c0_194, %c0_195] : memref<2x32x32xf32, #tpu.memory_space<vmem>>, vector<1x32x32xf32>
    %445 = vector.shape_cast %444 : vector<1x32x32xf32> to vector<32x32xf32>
    %cst_196 = arith.constant dense<0.000000e+00> : vector<8x32xf32>
    %446 = tpu.matmul %443, %445, %cst_196 {dimension_numbers = #tpu.dot_dimension_numbers<[1], [0], [0], [1], [0, 0, 1, 1], [], []>} : vector<8x32xf32>, vector<32x32xf32>, vector<8x32xf32> -> vector<8x32xf32>
    %447 = arith.addf %322, %446 : vector<8x32xf32>
    %c1_197 = arith.constant 1 : index
    %c0_198 = arith.constant 0 : index
    %c0_199 = arith.constant 0 : index
    %448 = vector.load %arg10[%c1_197, %c0_198, %c0_199] : memref<2x1x32xf32, #tpu.memory_space<vmem>>, vector<1x1x32xf32>
    %449 = vector.shape_cast %448 : vector<1x1x32xf32> to vector<1x32xf32>
    %450 = vector.broadcast %449 : vector<1x32xf32> to vector<8x32xf32>
    %451 = arith.addf %447, %450 : vector<8x32xf32>
    %c1_200 = arith.constant 1 : index
    %c0_201 = arith.constant 0 : index
    %c0_202 = arith.constant 0 : index
    %452 = vector.load %arg11[%c1_200, %c0_201, %c0_202] : memref<2x1x32xf32, #tpu.memory_space<vmem>>, vector<1x1x32xf32>
    %453 = vector.shape_cast %452 : vector<1x1x32xf32> to vector<1x32xf32>
    %c1_203 = arith.constant 1 : index
    %c0_204 = arith.constant 0 : index
    %c0_205 = arith.constant 0 : index
    %454 = vector.load %arg12[%c1_203, %c0_204, %c0_205] : memref<2x1x32xf32, #tpu.memory_space<vmem>>, vector<1x1x32xf32>
    %455 = vector.shape_cast %454 : vector<1x1x32xf32> to vector<1x32xf32>
    %cst_206 = arith.constant dense<0.000000e+00> : vector<8xf32>
    %456 = vector.multi_reduction <add>, %451, %cst_206 [1] : vector<8x32xf32> to vector<8xf32>
    %457 = vector.shape_cast %456 : vector<8xf32> to vector<8x1xf32>
    %cst_207 = arith.constant 3.200000e+01 : f32
    %458 = vector.broadcast %cst_207 : f32 to vector<8x1xf32>
    %459 = arith.divf %457, %458 : vector<8x1xf32>
    %460 = vector.broadcast %459 : vector<8x1xf32> to vector<8x32xf32>
    %461 = arith.subf %451, %460 : vector<8x32xf32>
    %462 = arith.mulf %461, %461 : vector<8x32xf32>
    %cst_208 = arith.constant dense<0.000000e+00> : vector<8xf32>
    %463 = vector.multi_reduction <add>, %462, %cst_208 [1] : vector<8x32xf32> to vector<8xf32>
    %464 = vector.shape_cast %463 : vector<8xf32> to vector<8x1xf32>
    %cst_209 = arith.constant 3.100000e+01 : f32
    %465 = vector.broadcast %cst_209 : f32 to vector<8x1xf32>
    %466 = arith.divf %464, %465 : vector<8x1xf32>
    %467 = math.sqrt %466 : vector<8x1xf32>
    %468 = vector.broadcast %459 : vector<8x1xf32> to vector<8x32xf32>
    %469 = arith.subf %451, %468 : vector<8x32xf32>
    %470 = vector.broadcast %453 : vector<1x32xf32> to vector<8x32xf32>
    %471 = arith.mulf %470, %469 : vector<8x32xf32>
    %cst_210 = arith.constant 9.99999997E-7 : f32
    %472 = vector.broadcast %cst_210 : f32 to vector<8x1xf32>
    %473 = arith.addf %467, %472 : vector<8x1xf32>
    %474 = vector.broadcast %473 : vector<8x1xf32> to vector<8x32xf32>
    %475 = arith.divf %471, %474 : vector<8x32xf32>
    %476 = vector.broadcast %455 : vector<1x32xf32> to vector<8x32xf32>
    %477 = arith.addf %475, %476 : vector<8x32xf32>
    %c1_211 = arith.constant 1 : index
    %c0_212 = arith.constant 0 : index
    %c0_213 = arith.constant 0 : index
    %478 = vector.load %arg13[%c1_211, %c0_212, %c0_213] : memref<2x32x32xf32, #tpu.memory_space<vmem>>, vector<1x32x32xf32>
    %479 = vector.shape_cast %478 : vector<1x32x32xf32> to vector<32x32xf32>
    %cst_214 = arith.constant dense<0.000000e+00> : vector<8x32xf32>
    %480 = tpu.matmul %477, %479, %cst_214 {dimension_numbers = #tpu.dot_dimension_numbers<[1], [0], [0], [1], [0, 0, 1, 1], [], []>} : vector<8x32xf32>, vector<32x32xf32>, vector<8x32xf32> -> vector<8x32xf32>
    %c1_215 = arith.constant 1 : index
    %c0_216 = arith.constant 0 : index
    %c0_217 = arith.constant 0 : index
    %481 = vector.load %arg14[%c1_215, %c0_216, %c0_217] : memref<2x1x32xf32, #tpu.memory_space<vmem>>, vector<1x1x32xf32>
    %482 = vector.shape_cast %481 : vector<1x1x32xf32> to vector<1x32xf32>
    %483 = vector.broadcast %482 : vector<1x32xf32> to vector<8x32xf32>
    %484 = arith.addf %480, %483 : vector<8x32xf32>
    %c1_218 = arith.constant 1 : index
    %c0_219 = arith.constant 0 : index
    %c0_220 = arith.constant 0 : index
    %485 = vector.load %arg15[%c1_218, %c0_219, %c0_220] : memref<2x32x64xf32, #tpu.memory_space<vmem>>, vector<1x32x64xf32>
    %486 = vector.shape_cast %485 : vector<1x32x64xf32> to vector<32x64xf32>
    %cst_221 = arith.constant dense<0.000000e+00> : vector<8x64xf32>
    %487 = tpu.matmul %3, %486, %cst_221 {dimension_numbers = #tpu.dot_dimension_numbers<[1], [0], [0], [1], [0, 0, 1, 1], [], []>} : vector<8x32xf32>, vector<32x64xf32>, vector<8x64xf32> -> vector<8x64xf32>
    %c1_222 = arith.constant 1 : index
    %c0_223 = arith.constant 0 : index
    %c0_224 = arith.constant 0 : index
    %488 = vector.load %arg16[%c1_222, %c0_223, %c0_224] : memref<2x1x64xf32, #tpu.memory_space<vmem>>, vector<1x1x64xf32>
    %489 = vector.shape_cast %488 : vector<1x1x64xf32> to vector<1x64xf32>
    %490 = vector.broadcast %489 : vector<1x64xf32> to vector<8x64xf32>
    %491 = arith.addf %487, %490 : vector<8x64xf32>
    %492 = vector.extract_strided_slice %491 {offsets = [0, 0], sizes = [8, 32], strides = [1, 1]} : vector<8x64xf32> to vector<8x32xf32>
    %493 = vector.extract_strided_slice %491 {offsets = [0, 32], sizes = [8, 32], strides = [1, 1]} : vector<8x64xf32> to vector<8x32xf32>
    %494 = vector.extract_strided_slice %484 {offsets = [0, 0], sizes = [8, 8], strides = [1, 1]} : vector<8x32xf32> to vector<8x8xf32>
    %495 = vector.extract_strided_slice %492 {offsets = [0, 0], sizes = [8, 8], strides = [1, 1]} : vector<8x32xf32> to vector<8x8xf32>
    %496 = vector.extract_strided_slice %493 {offsets = [0, 0], sizes = [8, 8], strides = [1, 1]} : vector<8x32xf32> to vector<8x8xf32>
    %cst_225 = arith.constant dense<0.000000e+00> : vector<8x8xf32>
    %497 = tpu.matmul %494, %495, %cst_225 {dimension_numbers = #tpu.dot_dimension_numbers<[1], [1], [0], [0], [0, 0, 1, 0], [], []>} : vector<8x8xf32>, vector<8x8xf32>, vector<8x8xf32> -> vector<8x8xf32>
    %cst_226 = arith.constant 0.353553385 : f32
    %498 = vector.broadcast %cst_226 : f32 to vector<8x8xf32>
    %499 = arith.mulf %497, %498 : vector<8x8xf32>
    %c0_i32_227 = arith.constant 0 : i32
    %500 = vector.broadcast %c0_i32_227 : i32 to vector<1x8xi32>
    %501 = arith.cmpi eq, %7, %500 : vector<1x8xi32>
    %cst_228 = arith.constant -1.000000e+09 : f32
    %502 = vector.shape_cast %501 : vector<1x8xi1> to vector<1x8xi1>
    %503 = vector.broadcast %502 : vector<1x8xi1> to vector<8x8xi1>
    %504 = vector.broadcast %cst_228 : f32 to vector<8x8xf32>
    %505 = arith.select %503, %504, %499 : vector<8x8xi1>, vector<8x8xf32>
    %cst_229 = arith.constant dense<0xFF800000> : vector<8xf32>
    %506 = vector.multi_reduction <maximumf>, %505, %cst_229 [1] : vector<8x8xf32> to vector<8xf32>
    %507 = vector.shape_cast %506 : vector<8xf32> to vector<8x1xf32>
    %508 = vector.broadcast %507 : vector<8x1xf32> to vector<8x8xf32>
    %509 = arith.subf %505, %508 : vector<8x8xf32>
    %510 = math.exp %509 : vector<8x8xf32>
    %cst_230 = arith.constant dense<0.000000e+00> : vector<8xf32>
    %511 = vector.multi_reduction <add>, %510, %cst_230 [1] : vector<8x8xf32> to vector<8xf32>
    %512 = vector.shape_cast %511 : vector<8xf32> to vector<8x1xf32>
    %513 = tpu.reciprocal %512 : vector<8x1xf32> -> vector<8x1xf32>
    %514 = vector.broadcast %513 : vector<8x1xf32> to vector<8x8xf32>
    %515 = arith.mulf %510, %514 : vector<8x8xf32>
    %cst_231 = arith.constant dense<0.000000e+00> : vector<8x8xf32>
    %516 = tpu.matmul %515, %496, %cst_231 {dimension_numbers = #tpu.dot_dimension_numbers<[1], [0], [0], [1], [0, 0, 1, 1], [], []>} : vector<8x8xf32>, vector<8x8xf32>, vector<8x8xf32> -> vector<8x8xf32>
    %517 = vector.extract_strided_slice %484 {offsets = [0, 8], sizes = [8, 8], strides = [1, 1]} : vector<8x32xf32> to vector<8x8xf32>
    %518 = vector.extract_strided_slice %492 {offsets = [0, 8], sizes = [8, 8], strides = [1, 1]} : vector<8x32xf32> to vector<8x8xf32>
    %519 = vector.extract_strided_slice %493 {offsets = [0, 8], sizes = [8, 8], strides = [1, 1]} : vector<8x32xf32> to vector<8x8xf32>
    %cst_232 = arith.constant dense<0.000000e+00> : vector<8x8xf32>
    %520 = tpu.matmul %517, %518, %cst_232 {dimension_numbers = #tpu.dot_dimension_numbers<[1], [1], [0], [0], [0, 0, 1, 0], [], []>} : vector<8x8xf32>, vector<8x8xf32>, vector<8x8xf32> -> vector<8x8xf32>
    %cst_233 = arith.constant 0.353553385 : f32
    %521 = vector.broadcast %cst_233 : f32 to vector<8x8xf32>
    %522 = arith.mulf %520, %521 : vector<8x8xf32>
    %c0_i32_234 = arith.constant 0 : i32
    %523 = vector.broadcast %c0_i32_234 : i32 to vector<1x8xi32>
    %524 = arith.cmpi eq, %7, %523 : vector<1x8xi32>
    %cst_235 = arith.constant -1.000000e+09 : f32
    %525 = vector.shape_cast %524 : vector<1x8xi1> to vector<1x8xi1>
    %526 = vector.broadcast %525 : vector<1x8xi1> to vector<8x8xi1>
    %527 = vector.broadcast %cst_235 : f32 to vector<8x8xf32>
    %528 = arith.select %526, %527, %522 : vector<8x8xi1>, vector<8x8xf32>
    %cst_236 = arith.constant dense<0xFF800000> : vector<8xf32>
    %529 = vector.multi_reduction <maximumf>, %528, %cst_236 [1] : vector<8x8xf32> to vector<8xf32>
    %530 = vector.shape_cast %529 : vector<8xf32> to vector<8x1xf32>
    %531 = vector.broadcast %530 : vector<8x1xf32> to vector<8x8xf32>
    %532 = arith.subf %528, %531 : vector<8x8xf32>
    %533 = math.exp %532 : vector<8x8xf32>
    %cst_237 = arith.constant dense<0.000000e+00> : vector<8xf32>
    %534 = vector.multi_reduction <add>, %533, %cst_237 [1] : vector<8x8xf32> to vector<8xf32>
    %535 = vector.shape_cast %534 : vector<8xf32> to vector<8x1xf32>
    %536 = tpu.reciprocal %535 : vector<8x1xf32> -> vector<8x1xf32>
    %537 = vector.broadcast %536 : vector<8x1xf32> to vector<8x8xf32>
    %538 = arith.mulf %533, %537 : vector<8x8xf32>
    %cst_238 = arith.constant dense<0.000000e+00> : vector<8x8xf32>
    %539 = tpu.matmul %538, %519, %cst_238 {dimension_numbers = #tpu.dot_dimension_numbers<[1], [0], [0], [1], [0, 0, 1, 1], [], []>} : vector<8x8xf32>, vector<8x8xf32>, vector<8x8xf32> -> vector<8x8xf32>
    %540 = vector.extract_strided_slice %484 {offsets = [0, 16], sizes = [8, 8], strides = [1, 1]} : vector<8x32xf32> to vector<8x8xf32>
    %541 = vector.extract_strided_slice %492 {offsets = [0, 16], sizes = [8, 8], strides = [1, 1]} : vector<8x32xf32> to vector<8x8xf32>
    %542 = vector.extract_strided_slice %493 {offsets = [0, 16], sizes = [8, 8], strides = [1, 1]} : vector<8x32xf32> to vector<8x8xf32>
    %cst_239 = arith.constant dense<0.000000e+00> : vector<8x8xf32>
    %543 = tpu.matmul %540, %541, %cst_239 {dimension_numbers = #tpu.dot_dimension_numbers<[1], [1], [0], [0], [0, 0, 1, 0], [], []>} : vector<8x8xf32>, vector<8x8xf32>, vector<8x8xf32> -> vector<8x8xf32>
    %cst_240 = arith.constant 0.353553385 : f32
    %544 = vector.broadcast %cst_240 : f32 to vector<8x8xf32>
    %545 = arith.mulf %543, %544 : vector<8x8xf32>
    %c0_i32_241 = arith.constant 0 : i32
    %546 = vector.broadcast %c0_i32_241 : i32 to vector<1x8xi32>
    %547 = arith.cmpi eq, %7, %546 : vector<1x8xi32>
    %cst_242 = arith.constant -1.000000e+09 : f32
    %548 = vector.shape_cast %547 : vector<1x8xi1> to vector<1x8xi1>
    %549 = vector.broadcast %548 : vector<1x8xi1> to vector<8x8xi1>
    %550 = vector.broadcast %cst_242 : f32 to vector<8x8xf32>
    %551 = arith.select %549, %550, %545 : vector<8x8xi1>, vector<8x8xf32>
    %cst_243 = arith.constant dense<0xFF800000> : vector<8xf32>
    %552 = vector.multi_reduction <maximumf>, %551, %cst_243 [1] : vector<8x8xf32> to vector<8xf32>
    %553 = vector.shape_cast %552 : vector<8xf32> to vector<8x1xf32>
    %554 = vector.broadcast %553 : vector<8x1xf32> to vector<8x8xf32>
    %555 = arith.subf %551, %554 : vector<8x8xf32>
    %556 = math.exp %555 : vector<8x8xf32>
    %cst_244 = arith.constant dense<0.000000e+00> : vector<8xf32>
    %557 = vector.multi_reduction <add>, %556, %cst_244 [1] : vector<8x8xf32> to vector<8xf32>
    %558 = vector.shape_cast %557 : vector<8xf32> to vector<8x1xf32>
    %559 = tpu.reciprocal %558 : vector<8x1xf32> -> vector<8x1xf32>
    %560 = vector.broadcast %559 : vector<8x1xf32> to vector<8x8xf32>
    %561 = arith.mulf %556, %560 : vector<8x8xf32>
    %cst_245 = arith.constant dense<0.000000e+00> : vector<8x8xf32>
    %562 = tpu.matmul %561, %542, %cst_245 {dimension_numbers = #tpu.dot_dimension_numbers<[1], [0], [0], [1], [0, 0, 1, 1], [], []>} : vector<8x8xf32>, vector<8x8xf32>, vector<8x8xf32> -> vector<8x8xf32>
    %563 = vector.extract_strided_slice %484 {offsets = [0, 24], sizes = [8, 8], strides = [1, 1]} : vector<8x32xf32> to vector<8x8xf32>
    %564 = vector.extract_strided_slice %492 {offsets = [0, 24], sizes = [8, 8], strides = [1, 1]} : vector<8x32xf32> to vector<8x8xf32>
    %565 = vector.extract_strided_slice %493 {offsets = [0, 24], sizes = [8, 8], strides = [1, 1]} : vector<8x32xf32> to vector<8x8xf32>
    %cst_246 = arith.constant dense<0.000000e+00> : vector<8x8xf32>
    %566 = tpu.matmul %563, %564, %cst_246 {dimension_numbers = #tpu.dot_dimension_numbers<[1], [1], [0], [0], [0, 0, 1, 0], [], []>} : vector<8x8xf32>, vector<8x8xf32>, vector<8x8xf32> -> vector<8x8xf32>
    %cst_247 = arith.constant 0.353553385 : f32
    %567 = vector.broadcast %cst_247 : f32 to vector<8x8xf32>
    %568 = arith.mulf %566, %567 : vector<8x8xf32>
    %c0_i32_248 = arith.constant 0 : i32
    %569 = vector.broadcast %c0_i32_248 : i32 to vector<1x8xi32>
    %570 = arith.cmpi eq, %7, %569 : vector<1x8xi32>
    %cst_249 = arith.constant -1.000000e+09 : f32
    %571 = vector.shape_cast %570 : vector<1x8xi1> to vector<1x8xi1>
    %572 = vector.broadcast %571 : vector<1x8xi1> to vector<8x8xi1>
    %573 = vector.broadcast %cst_249 : f32 to vector<8x8xf32>
    %574 = arith.select %572, %573, %568 : vector<8x8xi1>, vector<8x8xf32>
    %cst_250 = arith.constant dense<0xFF800000> : vector<8xf32>
    %575 = vector.multi_reduction <maximumf>, %574, %cst_250 [1] : vector<8x8xf32> to vector<8xf32>
    %576 = vector.shape_cast %575 : vector<8xf32> to vector<8x1xf32>
    %577 = vector.broadcast %576 : vector<8x1xf32> to vector<8x8xf32>
    %578 = arith.subf %574, %577 : vector<8x8xf32>
    %579 = math.exp %578 : vector<8x8xf32>
    %cst_251 = arith.constant dense<0.000000e+00> : vector<8xf32>
    %580 = vector.multi_reduction <add>, %579, %cst_251 [1] : vector<8x8xf32> to vector<8xf32>
    %581 = vector.shape_cast %580 : vector<8xf32> to vector<8x1xf32>
    %582 = tpu.reciprocal %581 : vector<8x1xf32> -> vector<8x1xf32>
    %583 = vector.broadcast %582 : vector<8x1xf32> to vector<8x8xf32>
    %584 = arith.mulf %579, %583 : vector<8x8xf32>
    %cst_252 = arith.constant dense<0.000000e+00> : vector<8x8xf32>
    %585 = tpu.matmul %584, %565, %cst_252 {dimension_numbers = #tpu.dot_dimension_numbers<[1], [0], [0], [1], [0, 0, 1, 1], [], []>} : vector<8x8xf32>, vector<8x8xf32>, vector<8x8xf32> -> vector<8x8xf32>
    %586 = tpu.concatenate %516, %539, %562, %585 in 1 : vector<8x8xf32>, vector<8x8xf32>, vector<8x8xf32>, vector<8x8xf32> -> vector<8x32xf32>
    %c1_253 = arith.constant 1 : index
    %c0_254 = arith.constant 0 : index
    %c0_255 = arith.constant 0 : index
    %587 = vector.load %arg17[%c1_253, %c0_254, %c0_255] : memref<2x32x32xf32, #tpu.memory_space<vmem>>, vector<1x32x32xf32>
    %588 = vector.shape_cast %587 : vector<1x32x32xf32> to vector<32x32xf32>
    %cst_256 = arith.constant dense<0.000000e+00> : vector<8x32xf32>
    %589 = tpu.matmul %586, %588, %cst_256 {dimension_numbers = #tpu.dot_dimension_numbers<[1], [0], [0], [1], [0, 0, 1, 1], [], []>} : vector<8x32xf32>, vector<32x32xf32>, vector<8x32xf32> -> vector<8x32xf32>
    %590 = arith.addf %451, %589 : vector<8x32xf32>
    %c1_257 = arith.constant 1 : index
    %c0_258 = arith.constant 0 : index
    %c0_259 = arith.constant 0 : index
    %591 = vector.load %arg18[%c1_257, %c0_258, %c0_259] : memref<2x1x32xf32, #tpu.memory_space<vmem>>, vector<1x1x32xf32>
    %592 = vector.shape_cast %591 : vector<1x1x32xf32> to vector<1x32xf32>
    %593 = vector.broadcast %592 : vector<1x32xf32> to vector<8x32xf32>
    %594 = arith.addf %590, %593 : vector<8x32xf32>
    %c1_260 = arith.constant 1 : index
    %c0_261 = arith.constant 0 : index
    %c0_262 = arith.constant 0 : index
    %595 = vector.load %arg19[%c1_260, %c0_261, %c0_262] : memref<2x1x32xf32, #tpu.memory_space<vmem>>, vector<1x1x32xf32>
    %596 = vector.shape_cast %595 : vector<1x1x32xf32> to vector<1x32xf32>
    %c1_263 = arith.constant 1 : index
    %c0_264 = arith.constant 0 : index
    %c0_265 = arith.constant 0 : index
    %597 = vector.load %arg20[%c1_263, %c0_264, %c0_265] : memref<2x1x32xf32, #tpu.memory_space<vmem>>, vector<1x1x32xf32>
    %598 = vector.shape_cast %597 : vector<1x1x32xf32> to vector<1x32xf32>
    %cst_266 = arith.constant dense<0.000000e+00> : vector<8xf32>
    %599 = vector.multi_reduction <add>, %594, %cst_266 [1] : vector<8x32xf32> to vector<8xf32>
    %600 = vector.shape_cast %599 : vector<8xf32> to vector<8x1xf32>
    %cst_267 = arith.constant 3.200000e+01 : f32
    %601 = vector.broadcast %cst_267 : f32 to vector<8x1xf32>
    %602 = arith.divf %600, %601 : vector<8x1xf32>
    %603 = vector.broadcast %602 : vector<8x1xf32> to vector<8x32xf32>
    %604 = arith.subf %594, %603 : vector<8x32xf32>
    %605 = arith.mulf %604, %604 : vector<8x32xf32>
    %cst_268 = arith.constant dense<0.000000e+00> : vector<8xf32>
    %606 = vector.multi_reduction <add>, %605, %cst_268 [1] : vector<8x32xf32> to vector<8xf32>
    %607 = vector.shape_cast %606 : vector<8xf32> to vector<8x1xf32>
    %cst_269 = arith.constant 3.100000e+01 : f32
    %608 = vector.broadcast %cst_269 : f32 to vector<8x1xf32>
    %609 = arith.divf %607, %608 : vector<8x1xf32>
    %610 = math.sqrt %609 : vector<8x1xf32>
    %611 = vector.broadcast %602 : vector<8x1xf32> to vector<8x32xf32>
    %612 = arith.subf %594, %611 : vector<8x32xf32>
    %613 = vector.broadcast %596 : vector<1x32xf32> to vector<8x32xf32>
    %614 = arith.mulf %613, %612 : vector<8x32xf32>
    %cst_270 = arith.constant 9.99999997E-7 : f32
    %615 = vector.broadcast %cst_270 : f32 to vector<8x1xf32>
    %616 = arith.addf %610, %615 : vector<8x1xf32>
    %617 = vector.broadcast %616 : vector<8x1xf32> to vector<8x32xf32>
    %618 = arith.divf %614, %617 : vector<8x32xf32>
    %619 = vector.broadcast %598 : vector<1x32xf32> to vector<8x32xf32>
    %620 = arith.addf %618, %619 : vector<8x32xf32>
    %c1_271 = arith.constant 1 : index
    %c0_272 = arith.constant 0 : index
    %c0_273 = arith.constant 0 : index
    %621 = vector.load %arg21[%c1_271, %c0_272, %c0_273] : memref<2x32x64xf32, #tpu.memory_space<vmem>>, vector<1x32x64xf32>
    %622 = vector.shape_cast %621 : vector<1x32x64xf32> to vector<32x64xf32>
    %cst_274 = arith.constant dense<0.000000e+00> : vector<8x64xf32>
    %623 = tpu.matmul %620, %622, %cst_274 {dimension_numbers = #tpu.dot_dimension_numbers<[1], [0], [0], [1], [0, 0, 1, 1], [], []>} : vector<8x32xf32>, vector<32x64xf32>, vector<8x64xf32> -> vector<8x64xf32>
    %c1_275 = arith.constant 1 : index
    %c0_276 = arith.constant 0 : index
    %c0_277 = arith.constant 0 : index
    %624 = vector.load %arg22[%c1_275, %c0_276, %c0_277] : memref<2x1x64xf32, #tpu.memory_space<vmem>>, vector<1x1x64xf32>
    %625 = vector.shape_cast %624 : vector<1x1x64xf32> to vector<1x64xf32>
    %626 = vector.broadcast %625 : vector<1x64xf32> to vector<8x64xf32>
    %627 = arith.addf %623, %626 : vector<8x64xf32>
    %cst_278 = arith.constant 0.000000e+00 : f32
    %628 = vector.broadcast %cst_278 : f32 to vector<8x64xf32>
    %629 = arith.maximumf %627, %628 : vector<8x64xf32>
    %c1_279 = arith.constant 1 : index
    %c0_280 = arith.constant 0 : index
    %c0_281 = arith.constant 0 : index
    %630 = vector.load %arg23[%c1_279, %c0_280, %c0_281] : memref<2x64x32xf32, #tpu.memory_space<vmem>>, vector<1x64x32xf32>
    %631 = vector.shape_cast %630 : vector<1x64x32xf32> to vector<64x32xf32>
    %cst_282 = arith.constant dense<0.000000e+00> : vector<8x32xf32>
    %632 = tpu.matmul %629, %631, %cst_282 {dimension_numbers = #tpu.dot_dimension_numbers<[1], [0], [0], [1], [0, 0, 1, 1], [], []>} : vector<8x64xf32>, vector<64x32xf32>, vector<8x32xf32> -> vector<8x32xf32>
    %633 = arith.addf %594, %632 : vector<8x32xf32>
    %c1_283 = arith.constant 1 : index
    %c0_284 = arith.constant 0 : index
    %c0_285 = arith.constant 0 : index
    %634 = vector.load %arg24[%c1_283, %c0_284, %c0_285] : memref<2x1x32xf32, #tpu.memory_space<vmem>>, vector<1x1x32xf32>
    %635 = vector.shape_cast %634 : vector<1x1x32xf32> to vector<1x32xf32>
    %636 = vector.broadcast %635 : vector<1x32xf32> to vector<8x32xf32>
    %637 = arith.addf %633, %636 : vector<8x32xf32>
    %c0_286 = arith.constant 0 : index
    %c0_287 = arith.constant 0 : index
    %638 = vector.load %arg25[%c0_286, %c0_287] : memref<1x32xf32, #tpu.memory_space<vmem>>, vector<1x32xf32>
    %c0_288 = arith.constant 0 : index
    %c0_289 = arith.constant 0 : index
    %639 = vector.load %arg26[%c0_288, %c0_289] : memref<1x32xf32, #tpu.memory_space<vmem>>, vector<1x32xf32>
    %cst_290 = arith.constant dense<0.000000e+00> : vector<8xf32>
    %640 = vector.multi_reduction <add>, %637, %cst_290 [1] : vector<8x32xf32> to vector<8xf32>
    %641 = vector.shape_cast %640 : vector<8xf32> to vector<8x1xf32>
    %cst_291 = arith.constant 3.200000e+01 : f32
    %642 = vector.broadcast %cst_291 : f32 to vector<8x1xf32>
    %643 = arith.divf %641, %642 : vector<8x1xf32>
    %644 = vector.broadcast %643 : vector<8x1xf32> to vector<8x32xf32>
    %645 = arith.subf %637, %644 : vector<8x32xf32>
    %646 = arith.mulf %645, %645 : vector<8x32xf32>
    %cst_292 = arith.constant dense<0.000000e+00> : vector<8xf32>
    %647 = vector.multi_reduction <add>, %646, %cst_292 [1] : vector<8x32xf32> to vector<8xf32>
    %648 = vector.shape_cast %647 : vector<8xf32> to vector<8x1xf32>
    %cst_293 = arith.constant 3.100000e+01 : f32
    %649 = vector.broadcast %cst_293 : f32 to vector<8x1xf32>
    %650 = arith.divf %648, %649 : vector<8x1xf32>
    %651 = math.sqrt %650 : vector<8x1xf32>
    %652 = vector.broadcast %643 : vector<8x1xf32> to vector<8x32xf32>
    %653 = arith.subf %637, %652 : vector<8x32xf32>
    %654 = vector.broadcast %638 : vector<1x32xf32> to vector<8x32xf32>
    %655 = arith.mulf %654, %653 : vector<8x32xf32>
    %cst_294 = arith.constant 9.99999997E-7 : f32
    %656 = vector.broadcast %cst_294 : f32 to vector<8x1xf32>
    %657 = arith.addf %651, %656 : vector<8x1xf32>
    %658 = vector.broadcast %657 : vector<8x1xf32> to vector<8x32xf32>
    %659 = arith.divf %655, %658 : vector<8x32xf32>
    %660 = vector.broadcast %639 : vector<1x32xf32> to vector<8x32xf32>
    %661 = arith.addf %659, %660 : vector<8x32xf32>
    %c0_295 = arith.constant 0 : index
    %c0_296 = arith.constant 0 : index
    %c0_297 = arith.constant 0 : index
    %662 = vector.load %arg27[%c0_295, %c0_296, %c0_297] : memref<1x8x32xf32, #tpu.memory_space<vmem>>, vector<1x8x32xf32>
    %663 = vector.shape_cast %662 : vector<1x8x32xf32> to vector<8x32xf32>
    %664 = vector.shape_cast %661 : vector<8x32xf32> to vector<1x8x32xf32>
    tpu.vector_store %arg27[%c0_295, %c0_296, %c0_297], %664 {strides = array<i32>} : memref<1x8x32xf32, #tpu.memory_space<vmem>>, vector<1x8x32xf32>,
    return
  }
  func.func @transform_0(%arg0: i32) -> (i32, i32, i32) {
    %c0_i32 = arith.constant 0 : i32
    %c0_i32_0 = arith.constant 0 : i32
    %c0_i32_1 = arith.constant 0 : i32
    return %arg0, %c0_i32, %c0_i32_0 : i32, i32, i32
  }
  func.func @transform_1(%arg0: i32) -> (i32, i32, i32) {
    %c0_i32 = arith.constant 0 : i32
    %c0_i32_0 = arith.constant 0 : i32
    %c0_i32_1 = arith.constant 0 : i32
    return %arg0, %c0_i32, %c0_i32_0 : i32, i32, i32
  }
  func.func @transform_2(%arg0: i32) -> (i32, i32, i32) {
    %c0_i32 = arith.constant 0 : i32
    %c0_i32_0 = arith.constant 0 : i32
    %c0_i32_1 = arith.constant 0 : i32
    return %arg0, %c0_i32, %c0_i32_0 : i32, i32, i32
  }
  func.func @transform_3(%arg0: i32) -> (i32, i32, i32) {
    %c0_i32 = arith.constant 0 : i32
    %c0_i32_0 = arith.constant 0 : i32
    %c0_i32_1 = arith.constant 0 : i32
    return %arg0, %c0_i32, %c0_i32_0 : i32, i32, i32
  }
  func.func @transform_4(%arg0: i32) -> (i32, i32, i32) {
    %c0_i32 = arith.constant 0 : i32
    %c0_i32_0 = arith.constant 0 : i32
    %c0_i32_1 = arith.constant 0 : i32
    %c0_i32_2 = arith.constant 0 : i32
    return %c0_i32, %c0_i32_0, %c0_i32_1 : i32, i32, i32
  }
  func.func @transform_5(%arg0: i32) -> (i32, i32, i32) {
    %c0_i32 = arith.constant 0 : i32
    %c0_i32_0 = arith.constant 0 : i32
    %c0_i32_1 = arith.constant 0 : i32
    %c0_i32_2 = arith.constant 0 : i32
    return %c0_i32, %c0_i32_0, %c0_i32_1 : i32, i32, i32
  }
  func.func @transform_6(%arg0: i32) -> (i32, i32, i32) {
    %c0_i32 = arith.constant 0 : i32
    %c0_i32_0 = arith.constant 0 : i32
    %c0_i32_1 = arith.constant 0 : i32
    %c0_i32_2 = arith.constant 0 : i32
    return %c0_i32, %c0_i32_0, %c0_i32_1 : i32, i32, i32
  }
  func.func @transform_7(%arg0: i32) -> (i32, i32, i32) {
    %c0_i32 = arith.constant 0 : i32
    %c0_i32_0 = arith.constant 0 : i32
    %c0_i32_1 = arith.constant 0 : i32
    %c0_i32_2 = arith.constant 0 : i32
    return %c0_i32, %c0_i32_0, %c0_i32_1 : i32, i32, i32
  }
  func.func @transform_8(%arg0: i32) -> (i32, i32, i32) {
    %c0_i32 = arith.constant 0 : i32
    %c0_i32_0 = arith.constant 0 : i32
    %c0_i32_1 = arith.constant 0 : i32
    %c0_i32_2 = arith.constant 0 : i32
    return %c0_i32, %c0_i32_0, %c0_i32_1 : i32, i32, i32
  }
  func.func @transform_9(%arg0: i32) -> (i32, i32, i32) {
    %c0_i32 = arith.constant 0 : i32
    %c0_i32_0 = arith.constant 0 : i32
    %c0_i32_1 = arith.constant 0 : i32
    %c0_i32_2 = arith.constant 0 : i32
    return %c0_i32, %c0_i32_0, %c0_i32_1 : i32, i32, i32
  }
  func.func @transform_10(%arg0: i32) -> (i32, i32, i32) {
    %c0_i32 = arith.constant 0 : i32
    %c0_i32_0 = arith.constant 0 : i32
    %c0_i32_1 = arith.constant 0 : i32
    %c0_i32_2 = arith.constant 0 : i32
    return %c0_i32, %c0_i32_0, %c0_i32_1 : i32, i32, i32
  }
  func.func @transform_11(%arg0: i32) -> (i32, i32, i32) {
    %c0_i32 = arith.constant 0 : i32
    %c0_i32_0 = arith.constant 0 : i32
    %c0_i32_1 = arith.constant 0 : i32
    %c0_i32_2 = arith.constant 0 : i32
    return %c0_i32, %c0_i32_0, %c0_i32_1 : i32, i32, i32
  }
  func.func @transform_12(%arg0: i32) -> (i32, i32, i32) {
    %c0_i32 = arith.constant 0 : i32
    %c0_i32_0 = arith.constant 0 : i32
    %c0_i32_1 = arith.constant 0 : i32
    %c0_i32_2 = arith.constant 0 : i32
    return %c0_i32, %c0_i32_0, %c0_i32_1 : i32, i32, i32
  }
  func.func @transform_13(%arg0: i32) -> (i32, i32, i32) {
    %c0_i32 = arith.constant 0 : i32
    %c0_i32_0 = arith.constant 0 : i32
    %c0_i32_1 = arith.constant 0 : i32
    %c0_i32_2 = arith.constant 0 : i32
    return %c0_i32, %c0_i32_0, %c0_i32_1 : i32, i32, i32
  }
  func.func @transform_14(%arg0: i32) -> (i32, i32, i32) {
    %c0_i32 = arith.constant 0 : i32
    %c0_i32_0 = arith.constant 0 : i32
    %c0_i32_1 = arith.constant 0 : i32
    %c0_i32_2 = arith.constant 0 : i32
    return %c0_i32, %c0_i32_0, %c0_i32_1 : i32, i32, i32
  }
  func.func @transform_15(%arg0: i32) -> (i32, i32, i32) {
    %c0_i32 = arith.constant 0 : i32
    %c0_i32_0 = arith.constant 0 : i32
    %c0_i32_1 = arith.constant 0 : i32
    %c0_i32_2 = arith.constant 0 : i32
    return %c0_i32, %c0_i32_0, %c0_i32_1 : i32, i32, i32
  }
  func.func @transform_16(%arg0: i32) -> (i32, i32, i32) {
    %c0_i32 = arith.constant 0 : i32
    %c0_i32_0 = arith.constant 0 : i32
    %c0_i32_1 = arith.constant 0 : i32
    %c0_i32_2 = arith.constant 0 : i32
    return %c0_i32, %c0_i32_0, %c0_i32_1 : i32, i32, i32
  }
  func.func @transform_17(%arg0: i32) -> (i32, i32, i32) {
    %c0_i32 = arith.constant 0 : i32
    %c0_i32_0 = arith.constant 0 : i32
    %c0_i32_1 = arith.constant 0 : i32
    %c0_i32_2 = arith.constant 0 : i32
    return %c0_i32, %c0_i32_0, %c0_i32_1 : i32, i32, i32
  }
  func.func @transform_18(%arg0: i32) -> (i32, i32, i32) {
    %c0_i32 = arith.constant 0 : i32
    %c0_i32_0 = arith.constant 0 : i32
    %c0_i32_1 = arith.constant 0 : i32
    %c0_i32_2 = arith.constant 0 : i32
    return %c0_i32, %c0_i32_0, %c0_i32_1 : i32, i32, i32
  }
  func.func @transform_19(%arg0: i32) -> (i32, i32, i32) {
    %c0_i32 = arith.constant 0 : i32
    %c0_i32_0 = arith.constant 0 : i32
    %c0_i32_1 = arith.constant 0 : i32
    %c0_i32_2 = arith.constant 0 : i32
    return %c0_i32, %c0_i32_0, %c0_i32_1 : i32, i32, i32
  }
  func.func @transform_20(%arg0: i32) -> (i32, i32, i32) {
    %c0_i32 = arith.constant 0 : i32
    %c0_i32_0 = arith.constant 0 : i32
    %c0_i32_1 = arith.constant 0 : i32
    %c0_i32_2 = arith.constant 0 : i32
    return %c0_i32, %c0_i32_0, %c0_i32_1 : i32, i32, i32
  }
  func.func @transform_21(%arg0: i32) -> (i32, i32, i32) {
    %c0_i32 = arith.constant 0 : i32
    %c0_i32_0 = arith.constant 0 : i32
    %c0_i32_1 = arith.constant 0 : i32
    %c0_i32_2 = arith.constant 0 : i32
    return %c0_i32, %c0_i32_0, %c0_i32_1 : i32, i32, i32
  }
  func.func @transform_22(%arg0: i32) -> (i32, i32, i32) {
    %c0_i32 = arith.constant 0 : i32
    %c0_i32_0 = arith.constant 0 : i32
    %c0_i32_1 = arith.constant 0 : i32
    %c0_i32_2 = arith.constant 0 : i32
    return %c0_i32, %c0_i32_0, %c0_i32_1 : i32, i32, i32
  }
  func.func @transform_23(%arg0: i32) -> (i32, i32, i32) {
    %c0_i32 = arith.constant 0 : i32
    %c0_i32_0 = arith.constant 0 : i32
    %c0_i32_1 = arith.constant 0 : i32
    %c0_i32_2 = arith.constant 0 : i32
    return %c0_i32, %c0_i32_0, %c0_i32_1 : i32, i32, i32
  }
  func.func @transform_24(%arg0: i32) -> (i32, i32) {
    %c0_i32 = arith.constant 0 : i32
    %c0_i32_0 = arith.constant 0 : i32
    %c0_i32_1 = arith.constant 0 : i32
    return %c0_i32, %c0_i32_0 : i32, i32
  }
  func.func @transform_25(%arg0: i32) -> (i32, i32) {
    %c0_i32 = arith.constant 0 : i32
    %c0_i32_0 = arith.constant 0 : i32
    %c0_i32_1 = arith.constant 0 : i32
    return %c0_i32, %c0_i32_0 : i32, i32
  }
  func.func @transform_26(%arg0: i32) -> (i32, i32, i32) {
    %c0_i32 = arith.constant 0 : i32
    %c0_i32_0 = arith.constant 0 : i32
    %c0_i32_1 = arith.constant 0 : i32
    return %arg0, %c0_i32, %c0_i32_0 : i32, i32, i32
  }
}

</mosaic_0001>

<bundles_post_ra>
// kernel: decoder_forward.1
= control target key start
LH: loop header
LB: loop body
LE: loop exit
PB: predicated region body
PF: predicated region fallthrough
CT: control target
= control target key end

     0   :  { %s7855_s0 = inlined_call_operand.hbm [shape: f32[2,8,32], index: 0, kind: input, shape index: {}]   ;;  %s7856_s1 = inlined_call_operand.hbm [shape: f32[2,8,32], index: 1, kind: input, shape index: {}]   ;;  %s7857_s2 = inlined_call_operand.hbm [shape: s32[2,8,8], index: 2, kind: input, shape index: {}]   ;;  %s7858_s3 = inlined_call_operand.vmem [shape: s32[2,1,8], index: 3, kind: input, shape index: {}]   ;;  %s7859_s4 = inlined_call_operand.vmem [shape: f32[2,1,32], index: 4, kind: input, shape index: {}]   ;;  %s7860_s5 = inlined_call_operand.vmem [shape: f32[2,1,32], index: 5, kind: input, shape index: {}]   ;;  %s7861_s6 = inlined_call_operand.vmem [shape: f32[2,32,96], index: 6, kind: input, shape index: {}]   ;;  %s7862_s7 = inlined_call_operand.vmem [shape: f32[2,1,96], index: 7, kind: input, shape index: {}]   ;;  %s7863_s8 = inlined_call_operand.vmem [shape: f32[2,32,32], index: 8, kind: input, shape index: {}]   ;;  %s7864_s9 = inlined_call_operand.vmem [shape: f32[2,1,32], index: 9, kind: input, shape index: {}]   ;;  %s7865_s10 = inlined_call_operand.vmem [shape: f32[2,1,32], index: 10, kind: input, shape index: {}]   ;;  %s7866_s11 = inlined_call_operand.vmem [shape: f32[2,1,32], index: 11, kind: input, shape index: {}]   ;;  %s7867_s12 = inlined_call_operand.vmem [shape: f32[2,32,32], index: 12, kind: input, shape index: {}]   ;;  %s7868_s13 = inlined_call_operand.hbm [shape: f32[2,1,32], index: 13, kind: input, shape index: {}]   ;;  %s7869_s14 = inlined_call_operand.hbm [shape: f32[2,32,64], index: 14, kind: input, shape index: {}]   ;;  %s7870_s15 = inlined_call_operand.hbm [shape: f32[2,1,64], index: 15, kind: input, shape index: {}]   ;;  %s7871_s16 = inlined_call_operand.hbm [shape: f32[2,32,32], index: 16, kind: input, shape index: {}]   ;;  %s7872_s17 = inlined_call_operand.hbm [shape: f32[2,1,32], index: 17, kind: input, shape index: {}]   ;;  %s7873_s18 = inlined_call_operand.vmem [shape: f32[2,1,32], index: 18, kind: input, shape index: {}]   ;;  %s7874_s19 = inlined_call_operand.vmem [shape: f32[2,1,32], index: 19, kind: input, shape index: {}]   ;;  %s7875_s20 = inlined_call_operand.hbm [shape: f32[2,32,64], index: 20, kind: input, shape index: {}]   ;;  %s7876_s21 = inlined_call_operand.hbm [shape: f32[2,1,64], index: 21, kind: input, shape index: {}]   ;;  %s7877_s22 = inlined_call_operand.vmem [shape: f32[2,64,32], index: 22, kind: input, shape index: {}]   ;;  %s7878_s23 = inlined_call_operand.hbm [shape: f32[2,1,32], index: 23, kind: input, shape index: {}]   ;;  %s7879_s24 = inlined_call_operand.vmem [shape: f32[1,32], index: 24, kind: input, shape index: {}]   ;;  %s7880_s25 = inlined_call_operand.vmem [shape: f32[1,32], index: 25, kind: input, shape index: {}]   ;;  %s7881_s26 = inlined_call_operand.hbm [shape: f32[2,8,32], index: 26, kind: output, shape index: {}]  }
   0x1   :  { %7946 = sst [smem:[#allocation34_spill]] %s7855_s0 }
   0x2   :  { %7947 = sst [smem:[#allocation35_spill]] %s7856_s1 }
   0x3   :  { %7948 = sst [smem:[#allocation36_spill]] %s7857_s2 }
   0x4   :  { %7949 = sst [smem:[#allocation37_spill]] %s7858_s3 }
   0x5   :  { %7950 = sst [smem:[#allocation38_spill]] %s7859_s4 }
   0x6   :  { %7951 = sst [smem:[#allocation39_spill]] %s7860_s5 }
   0x7   :  { %7952 = sst [smem:[#allocation40_spill]] %s7861_s6 }
   0x8   :  { %7953 = sst [smem:[#allocation41_spill]] %s7862_s7 }
   0x9   :  { %7954 = sst [smem:[#allocation42_spill]] %s7863_s8 }
   0xa   :  { %7955 = sst [smem:[#allocation43_spill]] %s7864_s9 }
   0xb   :  { %7956 = sst [smem:[#allocation44_spill]] %s7865_s10 }
   0xc   :  { %7957 = sst [smem:[#allocation45_spill]] %s7868_s13 }
   0xd   :  { %7958 = sst [smem:[#allocation46_spill]] %s7869_s14 }
   0xe   :  { %7959 = sst [smem:[#allocation47_spill]] %s7870_s15 }
   0xf   :  { %7960 = sst [smem:[#allocation48_spill]] %s7871_s16 }
  0x10   :  { %7961 = sst [smem:[#allocation49_spill]] %s7872_s17 }
  0x11   :  { %7962 = sst [smem:[#allocation50_spill]] %s7873_s18 }
  0x12   :  { %7963 = sst [smem:[#allocation51_spill]] %s7874_s19 }
  0x13   :  { %7964 = sst [smem:[#allocation52_spill]] %s7875_s20 }
  0x14   :  { %7965 = sst [smem:[#allocation53_spill]] %s7876_s21 }
  0x15   :  { %7966 = sst [smem:[#allocation54_spill]] %s7879_s24 }
  0x16   :  { %7967 = sst [smem:[#allocation55_spill]] %s7880_s25 }
  0x17   :  { %7968 = sst [smem:[#allocation56_spill]] %s7881_s26 }
  0x18   :  { %31 = vsyncpa [#allocation3], 0 }
  0x19   :  { %33 = vsyncpa [#allocation3 + $0x1], 0 }
  0x1a   :  { %34 = vsyncpa [#allocation6], 0 }
  0x1b   :  { %36 = vsyncpa [#allocation6 + $0x1], 0 }
  0x1c   :  { %37 = vsyncpa [#allocation9], 0 }
  0x1d   :  { %38 = vsyncpa [#allocation12], 0 }
  0x1e   :  { %39 = vsyncpa [#allocation15], 0 }
  0x1f   :  { %40 = vsyncpa [#allocation18], 0 }
  0x20   :  { %41 = vsyncpa [#allocation4], 0 }
  0x21   :  { %43 = vsyncpa [#allocation4 + $0x1], 0  ;;  %s6854_s27 = smov 0   ;;  %s6856_s3 = smov 0  }
  0x22   :  { %s6858_s7 = smov 0   ;;  %s6860_s28 = smov 0  }
  0x23 LB: > { %7969 = sst [smem:[#allocation28_spill]] %s6672_s27  ;;  %s6686_s8 = smov [#allocation8]   ;;  %s6684_s28 = sphi %s6860_s28, %s8045_s28   ;;  %s6680_s7 = sphi %s6858_s7, %s8049_s7   ;;  %s6676_s3 = sphi %s6856_s3, %s8048_s3   ;;  %s6672_s27 = sphi %s6854_s27, %s8047_s27  }
  0x24   : > { %7970 = sst [smem:[#allocation29_spill]] %s6684_s28  ;;  %s685_s4 = sshll.u32 %s6686_s8, 4  ;;  %s686_s4 = int_to_ptr.vmem [resolvable:$true] %s685_s4 }
  0x25   : > { %s6875_s29 = sadd.s32 4294967295, %s6684_s28   ;;  %p5434_p0 = scmp.ge.s32.totalorder %s6684_s28, 1 }
  0x26   : > { %p7906_p1 = scmp.eq.s32.totalorder %s6875_s29, 0  ;;  %p646_p2 = scmp.lt.s32.totalorder %s6684_s28, 3 }
  0x27   : > { %s6687_s9 = smov [#allocation11]   ;;  %s6688_s5 = smov [#allocation14]  }
  0x28   : > { %p6880_p3 = pnand %p5434_p0, %p646_p2  ;;  %s711_s30 = sshll.u32 %s6687_s9, 4  ;;  %s6893_s30 = int_to_ptr.vmem [resolvable:$true] %s711_s30 }
  0x29   : > { %s737_s10 = sshll.u32 %s6688_s5, 4  ;;  %s6319_s1 = scalar_lea.vmem %s686_s4, 32  ;;  %s6895_s10 = int_to_ptr.vmem [resolvable:$true] %s737_s10 }
  0x2a   : > { %s7971_s0 = scalar_select %p6880_p3, 1, 0 }
  0x2b   : > { %p6097_p5 = pneg %p6880_p3  ;;  %p6320_p8 = scmp.ne.s32.totalorder %s686_s4, %s6319_s1 }
  0x2c   : > { %p6327_p11 = scmp.lt.s32.totalorder %s686_s4, %s686_s4  ;;  %p6328_p12 = scmp.lt.s32.totalorder %s6319_s1, %s6319_s1 }
  0x2d   : > { %p6889_p6 = pnand %p6097_p5, %p7906_p1 }
  0x2e   : > { %p6329_p13 = por %p6328_p12, %p6327_p11 }
  0x2f   : > { %s7972_s2 = scalar_select %p6889_p6, 1, 0 }
  0x30   : > { %p6899_p7 = pneg %p6889_p6 }
  0x32   : > { %s7973_s6 = scalar_select %p6899_p7, 1, 0 }
  0x33   : > { %p6322_p9 = pnand %p6320_p8, %p6899_p7 }
  0x35   : > { %p6323_p10 = pneg %p6322_p9 }
  0x37   : > { %p6330_p0 = pnand %p6329_p13, %p6323_p10 }
  0x39   : > { %6333 = shalt.err (!%p6330_p0)
}
  0x3a   : > { %s7893_s8 = smov 16   ;;  %s7895_s9 = smov 1  }
  0x3b   : > { %s7974_s13 = sld [smem:[#allocation45_spill]]  ;;  %s6345_s25 = scalar_lea.vmem %s6893_s30, 32 }
  0x3c   : > { %p6346_p2 = scmp.ne.s32.totalorder %s6893_s30, %s6345_s25  ;;  %p6353_p9 = scmp.lt.s32.totalorder %s6893_s30, %s6893_s30 }
  0x3d   : > { %p6354_p10 = scmp.lt.s32.totalorder %s6345_s25, %s6345_s25 }
  0x3e   : > { %p6348_p5 = pnand %p6346_p2, %p6899_p7 }
  0x3f   : > { %p6355_p11 = por %p6354_p10, %p6353_p9 }
  0x40   : > { %p6349_p8 = pneg %p6348_p5 }
  0x41   : > { %6100 = dma.hbm_to_vmem [thread:$0]  (!%p6889_p6), %s7974_s13, 32, %s686_s4, [#allocation9], %s7893_s8, %s7893_s8, %s7895_s9  }
  0x42   : > { %p6356_p12 = pnand %p6355_p11, %p6349_p8 }
  0x44   : > { %6359 = shalt.err (!%p6356_p12)
}
  0x45   : > { %s7975_s15 = sld [smem:[#allocation47_spill]]  ;;  %s6371_s4 = scalar_lea.vmem %s6895_s10, 32 }
  0x46   : > { %p6372_p13 = scmp.ne.s32.totalorder %s6895_s10, %s6371_s4  ;;  %p6379_p5 = scmp.lt.s32.totalorder %s6895_s10, %s6895_s10 }
  0x47   : > { %p6380_p8 = scmp.lt.s32.totalorder %s6371_s4, %s6371_s4 }
  0x48   : > { %p6374_p0 = pnand %p6372_p13, %p6899_p7 }
  0x49   : > { %p6381_p9 = por %p6380_p8, %p6379_p5 }
  0x4a   : > { %p6375_p2 = pneg %p6374_p0 }
  0x4b   : > { %6106 = dma.hbm_to_vmem [thread:$0]  (!%p6889_p6), %s7975_s15, 32, %s6893_s30, [#allocation12], %s7893_s8, %s7893_s8, %s7895_s9  }
  0x4c   : > { %p6382_p10 = pnand %p6381_p9, %p6375_p2 }
  0x4e   : > { %6385 = shalt.err (!%p6382_p10)
}
  0x4f   : > { %s7976_s17 = sld [smem:[#allocation49_spill]]  ;;  %s6691_s30 = smov [#allocation17]  }
  0x50   : > { %s769_s1 = sshll.u32 %s6691_s30, 4  ;;  %s770_s1 = int_to_ptr.vmem [resolvable:$true] %s769_s1 }
  0x51   : > { %s6397_s26 = scalar_lea.vmem %s770_s1, 32  ;;  %p6405_p0 = scmp.lt.s32.totalorder %s770_s1, %s770_s1 }
  0x52   : > { %p6398_p11 = scmp.ne.s32.totalorder %s770_s1, %s6397_s26  ;;  %p6406_p2 = scmp.lt.s32.totalorder %s6397_s26, %s6397_s26 }
  0x54   : > { %p6400_p12 = pnand %p6398_p11, %p6899_p7  ;;  %p6407_p5 = por %p6406_p2, %p6405_p0 }
  0x55   : > { %6112 = dma.hbm_to_vmem [thread:$0]  (!%p6889_p6), %s7976_s17, 32, %s6895_s10, [#allocation15], %s7893_s8, %s7893_s8, %s7895_s9  }
  0x56   : > { %p6401_p13 = pneg %p6400_p12 }
  0x58   : > { %p6408_p8 = pnand %p6407_p5, %p6401_p13 }
  0x5a   : > { %6411 = shalt.err (!%p6408_p8)
}
  0x5b   : > { %s7977_s21 = sld [smem:[#allocation53_spill]]  ;;  %s5433_s25 = sadd.s32 4294967294, %s6684_s28  }
  0x5c   : > { %s6955_s5 = sadd.s32 1, %s6684_s28   ;;  %s56_s26 = sadd.s32 1, %s6680_s7 }
  0x5d   : > { %7978 = sst [smem:[#allocation30_spill]] %s6955_s5  ;;  %s53_s30 = ssub.s32 %s6684_s28, %s6955_s5 }
  0x5e   : > { %p54_p9 = scmp.eq.s32.totalorder %s53_s30, 0  ;;  %p63_p10 = scmp.ne.s32.totalorder %s6680_s7, %s6676_s3 }
  0x5f   : > { %p64_p11 = scmp.eq.s32.totalorder %s6684_s28, 0  ;;  %p69_p12 = scmp.ne.s32.totalorder %s6676_s3, %s6672_s27 }
  0x60   : > { %s6966_s4 = scalar_select %p54_p9, %s6680_s7, %s56_s26  }
  0x61   : > { %6118 = dma.hbm_to_vmem [thread:$0]  (!%p6889_p6), %s7977_s21, 32, %s770_s1, [#allocation18], %s7893_s8, %s7893_s8, %s7895_s9  }
  0x62   : > { %7979 = sst [smem:[#allocation31_spill]] %s6966_s4  ;;  %p65_p13 = por %p64_p11, %p63_p10 }
  0x63   : > { %p6970_p0 = por %p7906_p1, %p69_p12  ;;  %p633_p2 = scmp.eq.s32.totalorder %s6875_s29, 1 }
  0x64   : > { %p639_p5 = scmp.eq.s32.totalorder %s5433_s25, 1  ;;  %p6144_p8 = scmp.lt.s32.totalorder %s6684_s28, 2 }
  0x65   : > { %s7980_s10 = scalar_select %p6970_p0, 1, 0 }
  0x66   : > { %s7896_s1 = sand.u32 1, %s6680_s7   ;;  %p6977_p4 = por %p633_p2, %p63_p10 }
  0x67   : > { %p6981_p3 = por %p639_p5, %p69_p12  ;;  %s6987_s26 = sshll.u32 %s7896_s1, 3 }
  0x68   : > { %s7981_s8 = scalar_select %p6977_p4, 1, 0 }
  0x69   : > { %s7983_s30 = scalar_select %p6981_p3, 1, 0 }
  0x6a   : > { %7982 = sst [smem:[#allocation32_spill]] %s7981_s8  ;;  %s6990_s9 = sshll.u32 %s6684_s28, 7 }
  0x6b   : > { %7984 = sst [smem:[#allocation33_spill]] %s7983_s30  ;;  %p6992_p9 = pnand %p6144_p8, %p65_p13 }
  0x6c   : > { %s823_s25 = sand.u32 1, %s6684_s28   ;;  %s7986_s21 = sld [smem:[#allocation35_spill]] }
  0x6d   : > { %s827_s1 = scalar_lea.vmem [#allocation5], %s6987_s26  ;;  %s6692_s30 = smov [#allocation10]  }
  0x6e   : > { %s834_s5 = sshll.u32 %s827_s1, 4  ;;  %s698_s27 = sshll.u32 %s6692_s30, 4  ;;  %s7004_s5 = int_to_ptr.vmem [resolvable:$true] %s834_s5  ;;  %s699_s27 = int_to_ptr.vmem [resolvable:$true] %s698_s27 }
  0x6f   : > { %s7006_s8 = scalar_lea.sflag [#allocation6], %s823_s25  ;;  %p7012_p11 = pneg %p6992_p9 }
  0x71   : > { %s7987_s28 = scalar_select %p7012_p11, 1, 0 }
  0x72   : > { %s7001_s4 = scalar_lea.hbm %s7986_s21, %s6990_s9  ;;  %s6417_s1 = scalar_lea.hbm %s7986_s21, 256 }
  0x73   : > { %s6412_s24 = scalar_lea.hbm %s7001_s4, 128  ;;  %p6418_p2 = scmp.lt.s32.totalorder %s7001_s4, %s7986_s21 }
  0x74   : > { %p6413_p10 = scmp.ne.s32.totalorder %s7001_s4, %s6412_s24  ;;  %p6419_p5 = scmp.lt.s32.totalorder %s6417_s1, %s6412_s24 }
  0x76   : > { %p6415_p12 = pnand %p7012_p11, %p6413_p10  ;;  %p6420_p8 = por %p6419_p5, %p6418_p2 }
  0x78   : > { %p6416_p13 = pneg %p6415_p12 }
  0x7a   : > { %p6421_p1 = pnand %p6420_p8, %p6416_p13 }
  0x7c   : > { %6424 = shalt.err (!%p6421_p1)
}
  0x7d   : > { %s6425_s30 = scalar_lea.vmem %s7004_s5, 128  ;;  %s6693_s25 = smov [#allocation5]  }
  0x7e   : > { %p6426_p3 = scmp.ne.s32.totalorder %s7004_s5, %s6425_s30  ;;  %s6430_s15 = sshll.u32 %s6693_s25, 4  ;;  %s6431_s15 = int_to_ptr.vmem [resolvable:$false] %s6430_s15 }
  0x7f   : > { %s6432_s17 = scalar_lea.vmem %s6431_s15, 256  ;;  %p6433_p4 = scmp.lt.s32.totalorder %s7004_s5, %s6431_s15 }
  0x80   : > { %p6428_p10 = pnand %p6426_p3, %p7012_p11  ;;  %p6434_p0 = scmp.lt.s32.totalorder %s6432_s17, %s6425_s30 }
  0x82   : > { %p6429_p12 = pneg %p6428_p10  ;;  %p6435_p6 = por %p6434_p0, %p6433_p4 }
  0x84   : > { %p6436_p7 = pnand %p6435_p6, %p6429_p12 }
  0x86   : > { %6439 = shalt.err (!%p6436_p7)
}
  0x87   : > { %6128 = dma.hbm_to_vmem [thread:$0]  (!%p6992_p9), %s7001_s4, 128, %s7004_s5, %s7006_s8  }
  0x88   : > { %s6451_s18 = scalar_lea.vmem %s699_s27, 1024  ;;  %p7988_p3 = scmp.ne.s32.totalorder %s7973_s6, 0 }
  0x89   : > { %p6452_p1 = scmp.ne.s32.totalorder %s699_s27, %s6451_s18  ;;  %p6459_p5 = scmp.lt.s32.totalorder %s699_s27, %s699_s27 }
  0x8a   : > { %p6460_p8 = scmp.lt.s32.totalorder %s6451_s18, %s6451_s18 }
  0x8b   : > { %p6454_p13 = pnand %p6452_p1, %p7988_p3 }
  0x8c   : > { %p6461_p10 = por %p6460_p8, %p6459_p5 }
  0x8d   : > { %p6455_p2 = pneg %p6454_p13 }
  0x8f   : > { %p6462_p11 = pnand %p6461_p10, %p6455_p2 }
  0x91   : > { %6465 = shalt.err (!%p6462_p11)
}
  0x92   : > { %s6694_s19 = smov 128   ;;  %s6695_s24 = smov 8  }
  0x93   : > { %p7989_p4 = scmp.ne.s32.totalorder %s7972_s2, 0  ;;  %s7990_s14 = sld [smem:[#allocation46_spill]] }
  0x94   : > { %s6696_s1 = smov [#allocation13]   ;;  %s6697_s25 = smov [#allocation16]  }
  0x95   : > { %s724_s30 = sshll.u32 %s6696_s1, 4  ;;  %s756_s15 = sshll.u32 %s6697_s25, 4  ;;  %s725_s30 = int_to_ptr.vmem [resolvable:$true] %s724_s30  ;;  %s757_s15 = int_to_ptr.vmem [resolvable:$true] %s756_s15 }
  0x96   : > { %s6477_s17 = scalar_lea.vmem %s725_s30, 1024  ;;  %p6485_p11 = scmp.lt.s32.totalorder %s725_s30, %s725_s30 }
  0x97   : > { %p6478_p6 = scmp.ne.s32.totalorder %s725_s30, %s6477_s17  ;;  %p6486_p12 = scmp.lt.s32.totalorder %s6477_s17, %s6477_s17 }
  0x99   : > { %6103 = dma.hbm_to_vmem [thread:$0]  (!%p7989_p4), %s7990_s14, 1024, %s699_s27, [#allocation9], %s6694_s19, %s6694_s19, %s6695_s24  }
  0x9a   : > { %p6480_p7 = pnand %p6478_p6, %p7988_p3  ;;  %p6487_p1 = por %p6486_p12, %p6485_p11 }
  0x9c   : > { %p6481_p0 = pneg %p6480_p7 }
  0x9e   : > { %p6488_p13 = pnand %p6487_p1, %p6481_p0 }
  0xa0   : > { %6491 = shalt.err (!%p6488_p13)
}
  0xa1   : > { %s7991_s16 = sld [smem:[#allocation48_spill]]  ;;  %s6503_s5 = scalar_lea.vmem %s757_s15, 1024 }
  0xa2   : > { %p6504_p2 = scmp.ne.s32.totalorder %s757_s15, %s6503_s5  ;;  %p6511_p10 = scmp.lt.s32.totalorder %s757_s15, %s757_s15 }
  0xa3   : > { %p6512_p6 = scmp.lt.s32.totalorder %s6503_s5, %s6503_s5 }
  0xa4   : > { %p6506_p5 = pnand %p6504_p2, %p7988_p3 }
  0xa5   : > { %p6513_p7 = por %p6512_p6, %p6511_p10 }
  0xa6   : > { %p6507_p8 = pneg %p6506_p5 }
  0xa7   : > { %6109 = dma.hbm_to_vmem [thread:$0]  (!%p7989_p4), %s7991_s16, 1024, %s725_s30, [#allocation12], %s6694_s19, %s6694_s19, %s6695_s24  }
  0xa8   : > { %p6514_p0 = pnand %p6513_p7, %p6507_p8 }
  0xaa   : > { %6517 = shalt.err (!%p6514_p0)
}
  0xab   : > { %s7992_s20 = sld [smem:[#allocation52_spill]]  ;;  %s6698_s30 = smov [#allocation19]  }
  0xac   : > { %s785_s25 = sshll.u32 %s6698_s30, 4  ;;  %s786_s25 = int_to_ptr.vmem [resolvable:$true] %s785_s25 }
  0xad   : > { %s6529_s17 = scalar_lea.vmem %s786_s25, 32  ;;  %p6537_p13 = scmp.lt.s32.totalorder %s786_s25, %s786_s25 }
  0xae   : > { %p6530_p11 = scmp.ne.s32.totalorder %s786_s25, %s6529_s17  ;;  %p6538_p2 = scmp.lt.s32.totalorder %s6529_s17, %s6529_s17 }
  0xb0   : > { %p6532_p12 = pnand %p6530_p11, %p7988_p3  ;;  %p6539_p5 = por %p6538_p2, %p6537_p13 }
  0xb1   : > { %6115 = dma.hbm_to_vmem [thread:$0]  (!%p7989_p4), %s7992_s20, 1024, %s757_s15, [#allocation15], %s6694_s19, %s6694_s19, %s6695_s24  }
  0xb2   : > { %p6533_p1 = pneg %p6532_p12 }
  0xb4   : > { %p6540_p8 = pnand %p6539_p5, %p6533_p1 }
  0xb6   : > { %6543 = shalt.err (!%p6540_p8)
}
  0xb7   : > { %s7993_s27 = smov 1   ;;  %s7994_s18 = smov 16  }
  0xb8   : > { %6121 = dma.hbm_to_vmem [thread:$0]  (!%p7989_p4), %s7878_s23, 32, %s786_s25, [#allocation18], %s7994_s18, %s7994_s18, %s7993_s27  }
  0xb9   : > { %s7995_s15 = sld [smem:[#allocation34_spill]]  ;;  %s809_s2 = scalar_lea.vmem [#allocation2], %s6987_s26 }
  0xba   : > { %s816_s1 = sshll.u32 %s809_s2, 4  ;;  %s7996_s30 = sand.u32 1, %s6680_s7   ;;  %s817_s1 = int_to_ptr.vmem [resolvable:$true] %s816_s1 }
  0xbb   : > { %s806_s17 = scalar_lea.sflag [#allocation3], %s7996_s30  ;;  %p7997_p10 = scmp.ne.s32.totalorder %s7987_s28, 0 }
  0xbf   : > { %s7079_s4 = scalar_lea.hbm %s7995_s15, %s6990_s9  ;;  %s6549_s27 = scalar_lea.hbm %s7995_s15, 256 }
  0xc0   : > { %s6544_s14 = scalar_lea.hbm %s7079_s4, 128  ;;  %p6550_p4 = scmp.lt.s32.totalorder %s7079_s4, %s7995_s15 }
  0xc1   : > { %p6545_p3 = scmp.ne.s32.totalorder %s7079_s4, %s6544_s14  ;;  %p6551_p0 = scmp.lt.s32.totalorder %s6549_s27, %s6544_s14 }
  0xc3   : > { %p6547_p6 = pnand %p6545_p3, %p7997_p10  ;;  %p6552_p11 = por %p6551_p0, %p6550_p4 }
  0xc5   : > { %p6548_p7 = pneg %p6547_p6 }
  0xc7   : > { %p6553_p12 = pnand %p6552_p11, %p6548_p7 }
  0xc9   : > { %6556 = shalt.err (!%p6553_p12)
}
  0xca   : > { %s6557_s6 = scalar_lea.vmem %s817_s1, 128  ;;  %s6699_s24 = smov [#allocation2]  }
  0xcb   : > { %p6558_p1 = scmp.ne.s32.totalorder %s817_s1, %s6557_s6  ;;  %s6562_s2 = sshll.u32 %s6699_s24, 4  ;;  %s6563_s2 = int_to_ptr.vmem [resolvable:$false] %s6562_s2 }
  0xcc   : > { %s6564_s30 = scalar_lea.vmem %s6563_s2, 256  ;;  %p6565_p5 = scmp.lt.s32.totalorder %s817_s1, %s6563_s2 }
  0xcd   : > { %p6560_p13 = pnand %p6558_p1, %p7997_p10  ;;  %p6566_p8 = scmp.lt.s32.totalorder %s6564_s30, %s6557_s6 }
  0xcf   : > { %p6561_p2 = pneg %p6560_p13  ;;  %p6567_p3 = por %p6566_p8, %p6565_p5 }
  0xd1   : > { %p6568_p6 = pnand %p6567_p3, %p6561_p2 }
  0xd3   : > { %6571 = shalt.err (!%p6568_p6)
}
  0xd4   : > { %6125 = dma.hbm_to_vmem [thread:$0]  (!%p6992_p9), %s7079_s4, 128, %s817_s1, %s806_s17  }
  0xd5   : > { %s7998_s25 = sld [smem:[#allocation36_spill]]  ;;  %s845_s18 = scalar_lea.vmem [#allocation7], %s6987_s26 }
  0xd6   : > { %s852_s19 = sshll.u32 %s845_s18, 4  ;;  %s853_s19 = int_to_ptr.vmem [resolvable:$true] %s852_s19 }
  0xdb   : > { %s850_s27 = scalar_lea.hbm %s7998_s25, %s6990_s9  ;;  %s6577_s30 = scalar_lea.hbm %s7998_s25, 256 }
  0xdc   : > { %s6572_s24 = scalar_lea.hbm %s850_s27, 128  ;;  %p6578_p11 = scmp.lt.s32.totalorder %s850_s27, %s7998_s25 }
  0xdd   : > { %p6573_p7 = scmp.ne.s32.totalorder %s850_s27, %s6572_s24  ;;  %p6579_p12 = scmp.lt.s32.totalorder %s6577_s30, %s6572_s24 }
  0xdf   : > { %p6575_p4 = pnand %p6573_p7, %p7997_p10  ;;  %p6580_p1 = por %p6579_p12, %p6578_p11 }
  0xe1   : > { %p6576_p0 = pneg %p6575_p4 }
  0xe3   : > { %p6581_p13 = pnand %p6580_p1, %p6576_p0 }
  0xe5   : > { %6584 = shalt.err (!%p6581_p13)
}
  0xe6   : > { %s6585_s9 = scalar_lea.vmem %s853_s19, 128  ;;  %s6700_s26 = smov [#allocation7]  }
  0xe7   : > { %p6586_p2 = scmp.ne.s32.totalorder %s853_s19, %s6585_s9  ;;  %s6590_s4 = sshll.u32 %s6700_s26, 4  ;;  %s6591_s4 = int_to_ptr.vmem [resolvable:$false] %s6590_s4 }
  0xe8   : > { %s6592_s1 = scalar_lea.vmem %s6591_s4, 256  ;;  %p6593_p3 = scmp.lt.s32.totalorder %s853_s19, %s6591_s4 }
  0xe9   : > { %p6588_p5 = pnand %p6586_p2, %p7997_p10  ;;  %p6594_p6 = scmp.lt.s32.totalorder %s6592_s1, %s6585_s9 }
  0xeb   : > { %p6589_p8 = pneg %p6588_p5  ;;  %p6595_p7 = por %p6594_p6, %p6593_p3 }
  0xed   : > { %p6596_p4 = pnand %p6595_p7, %p6589_p8 }
  0xef   : > { %6599 = shalt.err (!%p6596_p4)
}
  0xf0   : > { %6131 = dma.hbm_to_vmem [thread:$0]  (!%p6992_p9), %s850_s27, 128, %s853_s19, %s7006_s8  }
  0xf1   : > { %p7999_p0 = scmp.ne.s32.totalorder %s7971_s0, 0 }
  0xf2   : > { %s7121_s16 = sand.u32 (!%p7999_p0), 1, %s6676_s3   ;;  %p8000_p10 = scmp.ne.s32.totalorder (!%p7999_p0), %s7980_s10, 0 }
  0xf3   : > { %867 = sbr.rel (%p7999_p0) target bundleno = 8730 (0x221a), region = 124  ;;  %s7124_s28 = sshll.u32 (!%p7999_p0), %s7121_s16, 3 }
  0xf4   : > { %s870_s15 = scalar_lea.sflag (!%p7999_p0), [#allocation3], %s7121_s16  ;;  %s873_s17 = scalar_lea.vmem (!%p7999_p0), [#allocation2], %s7124_s28 }
  0xf8   : > { %6643 = dma.done.wait (%p8000_p10), %s870_s15, 128  }
  0xf9   : > { %6645 = vsyncadd (%p8000_p10), %s870_s15, 4294967168  ;;  %s878_s13 = sand.u32 1, %s6875_s29   ;;  %s7928_s8 = scalar_lea.vmem [#allocation5], %s7124_s28 }
  0xfa   : > { %s879_s0 = scalar_lea.sflag [#allocation6], %s878_s13 }
  0xfb   : > { %6647 = dma.done.wait (%p8000_p10), %s879_s0, 256  }
  0xfc   : > { %6649 = vsyncadd (%p8000_p10), %s879_s0, 4294967040  ;;  %s891_s14 = scalar_lea.vmem [#allocation7], %s7124_s28  ;;  %p8001_p9 = scmp.eq.s32.totalorder %s6875_s29, 0 }
  0xfe   : > { %6651 = dma.done.wait (%p8001_p9), [#allocation9], 1056   ;;  %p8002_p11 = pmov %p8001_p9 }
  0xff   : > { %p8003_p12 = pmov %p8001_p9 }
 0x100   : > { %6653 = vsyncadd (%p8002_p11), [#allocation9], 4294966240 }
 0x101   : > { %6655 = dma.done.wait (%p8003_p12), [#allocation12], 1056   ;;  %p8004_p1 = pmov %p8001_p9 }
 0x103   : > { %6657 = vsyncadd (%p8004_p1), [#allocation12], 4294966240  ;;  %p8005_p13 = pmov %p8004_p1 }
 0x104   : > { %p8006_p2 = pmov %p8004_p1 }
 0x105   : > { %6659 = dma.done.wait (%p8005_p13), [#allocation15], 1056  }
 0x106   : > { %6661 = vsyncadd (%p8006_p2), [#allocation15], 4294966240  ;;  %p8007_p5 = pmov %p8004_p1 }
 0x107   : > { %p8008_p8 = pmov %p8004_p1 }
 0x108   : > { %6663 = dma.done.wait (%p8007_p5), [#allocation18], 64  }
 0x109   : > { %6665 = vsyncadd (%p8008_p8), [#allocation18], 4294967232  ;;  %vm1014_vm0 = vcmask 261120   ;;  %v7155_v0 = vld [vmem:[%s873_s17] sm:$0xff]  ;;  %s8009_s27 = sld [smem:[#allocation40_spill]]  ;;  %v6701_v8 = vmov 0.0  }
 0x10a   : > { %v1015_v1 = vsel %vm1014_vm0, %v7155_v0, 0.0  ;;  %5727 = vmatprep.subr.mxu1 %v6701_v8  ;;  %vm6702_vm1 = vmmov 0   ;;  %5748 = vmatprep.subr.mxu0 %v6701_v8  ;;  %s8011_s1 = sld [smem:[#allocation38_spill]]  ;;  %s7937_s19 = smov 96   ;;  %vm1138_vm4 = vcmask 64512   ;;  %v7234_v37 = vld [vmem:[%s891_s14] sm:$0xff] }
 0x10b   : > { %1016 = vadd.xlane.f32.xlu0 %v1015_v1  ;;  %5735 = vmatprep.mubr.msk.f32.mxu1 %vm6702_vm1, %v6701_v8  ;;  %s8012_s13 = sld [smem:[#allocation39_spill]]  ;;  %s7939_s24 = smov 88   ;;  %vm1214_vm5 = vcmp.eq.s32.totalorder %v7234_v37, 0  ;;  %vm1817_vm6 = vcmask 130048   ;;  %vm1819_vm7 = vcmask 195584   ;;  %vm3014_vm14 = vcmask 523264  }
 0x10c   : > { %5750 = vmatprep.mubr.msk.f32.mxu0 %vm6702_vm1, %v6701_v8  ;;  %s8013_s5 = sld [smem:[#allocation41_spill]]  ;;  %s7929_s6 = smov 80  }
 0x10d   : > { %s7935_s2 = smov 112   ;;  %s7926_s30 = smov 72  }
 0x10e   : > { %s7931_s9 = smov 104   ;;  %s7918_s14 = smov 64  }
 0x10f   : > { %s8010_s18 = smov %s8009_s27  ;;  %v1054_v7 = vld [vmem:[%s8009_s27 + $0x18] sm:$0xff]  ;;  %s7933_s27 = smov 120  }
 0x110   : > { %v1053_v9 = vld [vmem:[%s8010_s18 + $0x10] sm:$0xff]  ;;  %5728 = vmatpush3.msra.mxu1 %v1054_v7  ;;  %v1052_v10 = vld [vmem:[%s8010_s18 + $0x8] sm:$0xff]  ;;  %v1051_v11 = vld [vmem:[%s8010_s18] sm:$0xff]  ;;  %s7917_s26 = smov 48   ;;  %s7916_s4 = smov 40  }
 0x111   : > { %5729 = vmatprep.subr.mxu1 %v6701_v8  ;;  %v5463_v20 = vld [vmem:[%s8011_s1] ss:$0 sm:$0xff]  ;;  %s7919_s15 = smov 56   ;;  %s8014_s10 = sld [smem:[#allocation42_spill]] }
 0x112   : > { %5730 = vmatpush3.msra.mxu1 %v1053_v9  ;;  %v5464_v23 = vld [vmem:[%s8012_s13] ss:$0 sm:$0xff]  ;;  %s8015_s0 = sld [smem:[#allocation43_spill]]  ;;  %p1005_p3 = scmp.lt.s32.totalorder %s6875_s29, 1 }
 0x113   : > { %5731 = vmatprep.subr.mxu1 %v6701_v8  ;;  %v5465_v26 = vld [vmem:[%s8013_s5] ss:$0 sm:$0xff]  ;;  %s8026_s20 = smov 112   ;;  %s8027_s21 = smov 120  }
 0x114   : > { %5732 = vmatpush3.msra.mxu1 %v1052_v10  ;;  %s1006_s17 = scalar_select %p1005_p3, %s6875_s29, 1 }
 0x115   : > { %5733 = vmatprep.subr.mxu1 %v6701_v8 }
 0x116   : > { %5734 = vmatpush3.msra.mxu1 %v1051_v11 }
 0x117   : > { %5738 = vmatprep.subr.mxu1 %v6701_v8 }
 0x194   : > { %v1017_v2 = vpop.xlane.xlu0 %1016 }
 0x195   : > { %v1019_v3 = vmul.f32 0.03125, %v1017_v2 }
 0x197   : > { %v1020_v4 = vsub.f32 %v7155_v0, %v1019_v3 }
 0x199   : > { %v1021_v5 = vmul.f32 %v1020_v4, %v1020_v4  ;;  %v1040_v21 = vmul.f32 %v5463_v20, %v1020_v4 }
 0x19b   : > { %v1022_v6 = vsel %vm1014_vm0, %v1021_v5, 0.0 }
 0x19c   : > { %1023 = vadd.xlane.f32.xlu0 %v1022_v6 }
 0x225   : > { %v1024_v12 = vpop.xlane.xlu0 %1023 }
 0x226   : > { %v1026_v13 = vmul.f32 0.032258064, %v1024_v12 }
 0x228   : > { %6215 = vrsqrt.f32 %v1026_v13  ;;  %vm1029_vm2 = vcmp.eq.f32.partialorder %v1026_v13, inf  ;;  %v1032_v16 = vand.u32 2147483648, %v1026_v13  ;;  %vm1031_vm3 = vcmp.eq.f32.partialorder %v1026_v13, 0.0 }
 0x235   : > { %v6216_v14 = vpop.eup %6215 }
 0x236   : > { %v1028_v15 = vmul.f32 %v6216_v14, %v1026_v13 }
 0x238   : > { %v1030_v17 = vsel %vm1029_vm2, %v1026_v13, %v1028_v15 }
 0x239   : > { %v1033_v18 = vsel %vm1031_vm3, %v1032_v16, %v1030_v17 }
 0x23a   : > { %v1041_v19 = vadd.f32 1e-06, %v1033_v18 }
 0x23c   : > { %6217 = vrcp.f32 %v1041_v19 }
 0x249   : > { %v6218_v22 = vpop.eup %6217 }
 0x24a   : > { %v1043_v24 = vmul.f32 %v6218_v22, %v1040_v21 }
 0x24c   : > { %v1050_v25 = vadd.f32 %v5464_v23, %v1043_v24 }
 0x24e   : > { %5736 = vmatmul.mubr.msk.f32.vlgmr.msra.gmra.mxu1 %vm1014_vm0, %v1050_v25 }
 0x24f   : > { %5740 = vmatprep.mubr.msk.f32.mxu1 %vm6702_vm1, %v6701_v8 }
 0x30e   : > { %v1131_v27 = vpop.f32.mrf.mxu1 }
 0x30f   : > { %v7195_v28 = vadd.f32 %v5465_v26, %v1131_v27 }
 0x310   : > { %v5737_v29 = vpop.f32.mrf.mxu1 }
 0x311   : > { %1303 = vrot.lane.b32.xlu0 %v7195_v28, %s7933_s27  ;;  %1136 = vrot.lane.b32.xlu1 %v7195_v28, %s7937_s19 }
 0x315   : > { %1305 = vrot.lane.b32.xlu1 %v7195_v28, %s7939_s24 }
 0x319   : > { %1472 = vrot.lane.b32.xlu1 %v7195_v28, %s7929_s6 }
 0x31d   : > { %1470 = vrot.lane.b32.xlu1 %v7195_v28, %s7935_s2 }
 0x321   : > { %1639 = vrot.lane.b32.xlu1 %v7195_v28, %s7926_s30  ;;  %s8019_s30 = smov 8  }
 0x325   : > { %1637 = vrot.lane.b32.xlu1 %v7195_v28, %s7931_s9 }
 0x383   : > { %v1137_v30 = vpop.permute.xlu1 %1136  ;;  %v1304_v32 = vpop.permute.xlu0 %1303 }
 0x384   : > { %5739 = vmatpush3.xpose.msk.msra.mxu1 %vm1138_vm4, %v1137_v30 }
 0x385   : > { %5743 = vmatprep.subr.mxu1 %v6701_v8 }
 0x387   : > { %5741 = vmatmul.mubr.msk.f32.vlgmr.msra.gmra.mxu1 %vm1138_vm4, %v7195_v28  ;;  %v1306_v31 = vpop.permute.xlu1 %1305 }
 0x388   : > { %5749 = vmatpush3.xpose.msk.msra.mxu0 %vm1138_vm4, %v1306_v31  ;;  %5745 = vmatprep.mubr.msk.f32.mxu1 %vm6702_vm1, %v6701_v8 }
 0x389   : > { %5758 = vmatprep.subr.mxu0 %v6701_v8 }
 0x38b   : > { %5751 = vmatmul.mubr.msk.f32.vlgmr.msra.gmra.mxu0 %vm1138_vm4, %v1304_v32  ;;  %v1473_v33 = vpop.permute.xlu1 %1472  ;;  %v1824_v32 = vld [vmem:[%s8014_s10 + $0x18] sm:$0xff] }
 0x38c   : > { %5759 = vmatpush3.xpose.msk.msra.mxu0 %vm1138_vm4, %v1473_v33  ;;  %5760 = vmatprep.mubr.msk.f32.mxu0 %vm6702_vm1, %v6701_v8  ;;  %v1823_v33 = vld [vmem:[%s8014_s10 + $0x10] sm:$0xff] }
 0x38d   : > { %5768 = vmatprep.subr.mxu0 %v6701_v8 }
 0x38f   : > { %v1471_v34 = vpop.permute.xlu1 %1470 }
 0x390   : > { %5761 = vmatmul.mubr.msk.f32.vlgmr.msra.gmra.mxu0 %vm1138_vm4, %v1471_v34 }
 0x391   : > { %5770 = vmatprep.mubr.msk.f32.mxu0 %vm6702_vm1, %v6701_v8 }
 0x393   : > { %v1640_v35 = vpop.permute.xlu1 %1639 }
 0x394   : > { %5769 = vmatpush3.xpose.msk.msra.mxu0 %vm1138_vm4, %v1640_v35  ;;  %v1822_v35 = vld [vmem:[%s8014_s10 + $0x8] sm:$0xff] }
 0x395   : > { %5778 = vmatprep.subr.mxu0 %v6701_v8 }
 0x397   : > { %v1638_v36 = vpop.permute.xlu1 %1637 }
 0x398   : > { %5771 = vmatmul.mubr.msk.f32.vlgmr.msra.gmra.mxu0 %vm1138_vm4, %v1638_v36 }
 0x399   : > { %5786 = vmatprep.mubr.msk.f32.mxu0 %vm6702_vm1, %v6701_v8  ;;  %5779 = vmatpush3.msra.mxu0 %v1824_v32 }
 0x39a   : > { %5780 = vmatprep.subr.mxu0 %v6701_v8 }
 0x39b   : > { %5781 = vmatpush3.msra.mxu0 %v1823_v33 }
 0x39c   : > { %5782 = vmatprep.subr.mxu0 %v6701_v8 }
 0x39d   : > { %5783 = vmatpush3.msra.mxu0 %v1822_v35 }
 0x39e   : > { %5784 = vmatprep.subr.mxu0 %v6701_v8 }
 0x447   : > { %v1209_v38 = vpop.f32.mrf.mxu1 }
 0x448   : > { %v1213_v39 = vmul.f32 0.35355338, %v1209_v38  ;;  %v1821_v38 = vld [vmem:[%s8014_s10] sm:$0xff] }
 0x449   : > { %v5742_v40 = vpop.f32.mrf.mxu1  ;;  %5785 = vmatpush3.msra.mxu0 %v1821_v38 }
 0x44a   : > { %v1215_v41 = vsel %vm1214_vm5, -1e+09, %v1213_v39  ;;  %5800 = vmatprep.subr.mxu0 %v6701_v8 }
 0x44b   : > { %v1377_v42 = vpop.f32.mrf.mxu0  ;;  %v1216_v43 = vsel %vm1138_vm4, %v1215_v41, -inf }
 0x44c   : > { %v1381_v44 = vmul.f32 0.35355338, %v1377_v42  ;;  %1217 = vmax.xlane.f32.xlu1 %v1216_v43 }
 0x44d   : > { %v5752_v45 = vpop.f32.mrf.mxu0 }
 0x44e   : > { %v1382_v46 = vsel %vm1214_vm5, -1e+09, %v1381_v44 }
 0x44f   : > { %v1383_v47 = vsel %vm1138_vm4, %v1382_v46, -inf }
 0x450   : > { %1384 = vmax.xlane.f32.xlu0 %v1383_v47  ;;  %v1544_v48 = vpop.f32.mrf.mxu0 }
 0x451   : > { %v1548_v49 = vmul.f32 0.35355338, %v1544_v48 }
 0x452   : > { %v5762_v50 = vpop.f32.mrf.mxu0 }
 0x453   : > { %v1549_v51 = vsel %vm1214_vm5, -1e+09, %v1548_v49 }
 0x454   : > { %v1550_v52 = vsel %vm1138_vm4, %v1549_v51, -inf }
 0x455   : > { %1551 = vmax.xlane.f32.xlu1 %v1550_v52  ;;  %v5480_v52 = vld [vmem:[%s8015_s0] ss:$0 sm:$0xff] }
 0x458   : > { %v1711_v53 = vpop.f32.mrf.mxu0 }
 0x459   : > { %v1715_v54 = vmul.f32 0.35355338, %v1711_v53 }
 0x45a   : > { %v5772_v55 = vpop.f32.mrf.mxu0 }
 0x45b   : > { %v1716_v56 = vsel %vm1214_vm5, -1e+09, %v1715_v54 }
 0x45c   : > { %v1717_v57 = vsel %vm1138_vm4, %v1716_v56, -inf }
 0x45d   : > { %1718 = vmax.xlane.f32.xlu0 %v1717_v57 }
 0x466   : > { %1227 = vrot.lane.b32.xlu1 %v7195_v28, %s7918_s14  ;;  %s7922_s14 = smov 16  }
 0x4d5   : > { %v1218_v58 = vpop.xlane.xlu1 %1217 }
 0x4d6   : > { %v1219_v59 = vsub.f32 %v1215_v41, %v1218_v58 }
 0x4d8   : > { %v1220_v60 = vmul.f32 1.442695, %v1219_v59 }
 0x4d9   : > { %v1385_v61 = vpop.xlane.xlu0 %1384 }
 0x4da   : > { %6219 = vpow2.f32 %v1220_v60  ;;  %v1386_v62 = vsub.f32 %v1382_v46, %v1385_v61 }
 0x4dc   : > { %v1387_v63 = vmul.f32 1.442695, %v1386_v62  ;;  %v2030_v62 = vld [vmem:[#allocation10 + $0x18] sm:$0xff] }
 0x4de   : > { %6221 = vpow2.f32 %v1387_v63  ;;  %v1552_v1 = vpop.xlane.xlu1 %1551  ;;  %v2029_v63 = vld [vmem:[#allocation10 + $0x10] sm:$0xff] }
 0x4df   : > { %v1553_v2 = vsub.f32 %v1549_v51, %v1552_v1  ;;  %v1945_v1 = vld [vmem:[%s7867_s12 + $0x10] sm:$0xff] }
 0x4e1   : > { %v1554_v3 = vmul.f32 1.442695, %v1553_v2  ;;  %v2028_v2 = vld [vmem:[#allocation10 + $0x8] sm:$0xff] }
 0x4e2   : > { %v1228_v4 = vpop.permute.xlu1 %1227 }
 0x4e3   : > { %6223 = vpow2.f32 %v1554_v3  ;;  %5744 = vmatpush3.msra.mxu1 %v1228_v4  ;;  %v1944_v3 = vld [vmem:[%s7867_s12 + $0x8] sm:$0xff]  ;;  %v2027_v4 = vld [vmem:[#allocation10] sm:$0xff] }
 0x4e4   : > { %5753 = vmatprep.subr.mxu1 %v6701_v8 }
 0x4e6   : > { %v1719_v5 = vpop.xlane.xlu0 %1718 }
 0x4e7   : > { %v6220_v6 = vpop.eup %6219  ;;  %v1720_v7 = vsub.f32 %v1716_v56, %v1719_v5  ;;  %v1943_v5 = vld [vmem:[%s7867_s12] sm:$0xff] }
 0x4e8   : > { %v1222_v9 = vsel %vm1138_vm4, %v6220_v6, 0.0 }
 0x4e9   : > { %v1721_v10 = vmul.f32 1.442695, %v1720_v7  ;;  %1223 = vadd.xlane.f32.xlu1 %v1222_v9 }
 0x4eb   : > { %v6222_v11 = vpop.eup %6221  ;;  %6225 = vpow2.f32 %v1721_v10 }
 0x4ec   : > { %v1389_v12 = vsel %vm1138_vm4, %v6222_v11, 0.0 }
 0x4ed   : > { %1390 = vadd.xlane.f32.xlu0 %v1389_v12 }
 0x4f0   : > { %v6224_v13 = vpop.eup %6223 }
 0x4f1   : > { %v1556_v14 = vsel %vm1138_vm4, %v6224_v13, 0.0 }
 0x4f2   : > { %1557 = vadd.xlane.f32.xlu1 %v1556_v14 }
 0x4f8   : > { %v6226_v15 = vpop.eup %6225 }
 0x4f9   : > { %v1723_v16 = vsel %vm1138_vm4, %v6226_v15, 0.0 }
 0x4fa   : > { %1724 = vadd.xlane.f32.xlu0 %v1723_v16 }
 0x503   : > { %1561 = vrot.lane.b32.xlu1 %v7195_v28, %s7917_s26  ;;  %s7924_s26 = smov 8  }
 0x507   : > { %1728 = vrot.lane.b32.xlu1 %v7195_v28, %s7916_s4  ;;  %s7920_s4 = smov 24  }
 0x510   : > { %1394 = vrot.lane.b32.xlu0 %v7195_v28, %s7919_s15 }
 0x572   : > { %v1224_v17 = vpop.xlane.xlu1 %1223 }
 0x573   : > { %6227 = vrcp.f32 %v1224_v17 }
 0x576   : > { %v1391_v18 = vpop.xlane.xlu0 %1390 }
 0x577   : > { %6229 = vrcp.f32 %v1391_v18 }
 0x57b   : > { %v1558_v19 = vpop.xlane.xlu1 %1557 }
 0x57c   : > { %6231 = vrcp.f32 %v1558_v19  ;;  %v5482_v19 = vld [vmem:[%s7866_s11] ss:$0 sm:$0xff] }
 0x57f   : > { %v1562_v24 = vpop.permute.xlu1 %1561 }
 0x580   : > { %v6228_v20 = vpop.eup %6227 }
 0x581   : > { %v1226_v21 = vmul.f32 %v6228_v20, %v6220_v6  ;;  %v1009_v6 = vld [vmem:[%s7928_s8] sm:$0xff]  ;;  %s8028_s8 = smov 104  }
 0x583   : > { %v1725_v22 = vpop.xlane.xlu0 %1724  ;;  %5746 = vmatmul.mubr.msk.f32.vlgmr.msra.gmra.mxu1 %vm1138_vm4, %v1226_v21  ;;  %v1729_v29 = vpop.permute.xlu1 %1728 }
 0x584   : > { %v6230_v23 = vpop.eup %6229  ;;  %6233 = vrcp.f32 %v1725_v22  ;;  %5755 = vmatprep.mubr.msk.f32.mxu1 %vm6702_vm1, %v6701_v8  ;;  %v5485_v22 = vld [vmem:[#allocation11] ss:$0 sm:$0xff] }
 0x585   : > { %v1393_v26 = vmul.f32 %v6230_v23, %v6222_v11 }
 0x587   : > { %v1395_v25 = vpop.permute.xlu0 %1394 }
 0x588   : > { %5754 = vmatpush3.msra.mxu1 %v1395_v25 }
 0x589   : > { %v6232_v27 = vpop.eup %6231  ;;  %5756 = vmatmul.mubr.msk.f32.vlgmr.msra.gmra.mxu1 %vm1138_vm4, %v1393_v26  ;;  %5763 = vmatprep.subr.mxu1 %v6701_v8 }
 0x58a   : > { %5764 = vmatpush3.msra.mxu1 %v1562_v24  ;;  %5765 = vmatprep.mubr.msk.f32.mxu1 %vm6702_vm1, %v6701_v8  ;;  %v1560_v28 = vmul.f32 %v6232_v27, %v6224_v13  ;;  %v5483_v27 = vld [vmem:[#allocation8] ss:$0 sm:$0xff] }
 0x58b   : > { %5773 = vmatprep.subr.mxu1 %v6701_v8 }
 0x58d   : > { %5766 = vmatmul.mubr.msk.f32.vlgmr.msra.gmra.mxu1 %vm1138_vm4, %v1560_v28 }
 0x58e   : > { %5774 = vmatpush3.msra.mxu1 %v1729_v29  ;;  %5775 = vmatprep.mubr.msk.f32.mxu1 %vm6702_vm1, %v6701_v8 }
 0x58f   : > { %5789 = vmatprep.subr.mxu1 %v6701_v8 }
 0x591   : > { %v6234_v30 = vpop.eup %6233 }
 0x592   : > { %v1727_v31 = vmul.f32 %v6234_v30, %v6226_v15 }
 0x594   : > { %5776 = vmatmul.mubr.msk.f32.vlgmr.msra.gmra.mxu1 %vm1138_vm4, %v1727_v31 }
 0x595   : > { %5797 = vmatprep.mubr.msk.f32.mxu1 %vm6702_vm1, %v6701_v8 }
 0x643   : > { %v1299_v34 = vpop.f32.mrf.mxu1 }
 0x645   : > { %v5747_v36 = vpop.f32.mrf.mxu1 }
 0x646   : > { %v2190_v36 = vlaneseq }
 0x649   : > { %v1466_v39 = vpop.f32.mrf.mxu1 }
 0x64a   : > { %1805 = vrot.lane.b32.xlu0 %v1466_v39, %s7924_s26  ;;  %v2191_v39 = vshrl.u32 %v2190_v36, 7  ;;  %s8020_s26 = smov 16  }
 0x64b   : > { %v5757_v40 = vpop.f32.mrf.mxu1 }
 0x64c   : > { %v2192_v40 = vsub.s32 0, %v2191_v39 }
 0x64d   : > { %v1633_v41 = vpop.f32.mrf.mxu1 }
 0x64e   : > { %1809 = vrot.lane.b32.xlu1 %v1633_v41, %s7922_s14  ;;  %s8016_s14 = sld [smem:[#allocation44_spill]]  ;;  %v6717_v41 = vmov 0  }
 0x64f   : > { %v5767_v42 = vpop.f32.mrf.mxu1 }
 0x654   : > { %v1800_v43 = vpop.f32.mrf.mxu1  ;;  %v5481_v16 = vld [vmem:[%s8016_s14] ss:$0 sm:$0xff] }
 0x655   : > { %1813 = vrot.lane.b32.xlu0 %v1800_v43, %s7920_s4  ;;  %s8017_s4 = sld [smem:[#allocation37_spill]] }
 0x656   : > { %v5777_v44 = vpop.f32.mrf.mxu1 }
 0x65b   : > { %s1007_s15 = scalar_lea.vmem %s8017_s4, %s1006_s17  ;;  %s8018_s17 = smov 72  }
 0x65c   : > { %v1011_v38 = vld [vmem:[%s1007_s15] sm:$0x1]  ;;  %s8021_s4 = smov 24   ;;  %s8023_s15 = sld [smem:[#allocation51_spill]] }
 0x65d   : > { %vm2188_vm10 = vcmp.eq.s32.totalorder %v1011_v38, 0 }
 0x65e   : > { %v2189_v42 = vsel %vm2188_vm10, 1, %v6717_v41  ;;  %v2802_v41 = vld [vmem:[#allocation13 + $0x18] sm:$0xff] }
 0x65f   : > { %v7383_v43 = vrot.slane %v2189_v42, %v2192_v40  ;;  %v2801_v42 = vld [vmem:[#allocation13 + $0x10] sm:$0xff] }
 0x661   : > { %vm2194_vm11 = vcmp.eq.s32.totalorder %v7383_v43, 1 }
 0x6bc   : > { %v1806_v45 = vpop.permute.xlu0 %1805 }
 0x6bd   : > { %v1816_v47 = vsel %vm1138_vm4, %v1299_v34, %v1806_v45 }
 0x6c0   : > { %v1810_v46 = vpop.permute.xlu1 %1809 }
 0x6c1   : > { %v1818_v48 = vsel %vm1817_vm6, %v1816_v47, %v1810_v46 }
 0x6c7   : > { %v1814_v49 = vpop.permute.xlu0 %1813 }
 0x6c8   : > { %v1820_v50 = vsel %vm1819_vm7, %v1818_v48, %v1814_v49 }
 0x6c9   : > { %5787 = vmatmul.mubr.msk.f32.vlgmr.msra.gmra.mxu0 %vm1014_vm0, %v1820_v50 }
 0x6ca   : > { %5808 = vmatprep.mubr.msk.f32.mxu0 %vm6702_vm1, %v6701_v8  ;;  %5801 = vmatpush3.msra.mxu0 %v2030_v62 }
 0x6cb   : > { %5802 = vmatprep.subr.mxu0 %v6701_v8 }
 0x6cc   : > { %5803 = vmatpush3.msra.mxu0 %v2029_v63 }
 0x6cd   : > { %5804 = vmatprep.subr.mxu0 %v6701_v8 }
 0x6ce   : > { %5805 = vmatpush3.msra.mxu0 %v2028_v2 }
 0x6cf   : > { %5806 = vmatprep.subr.mxu0 %v6701_v8 }
 0x6d0   : > { %5807 = vmatpush3.msra.mxu0 %v2027_v4 }
 0x6d1   : > { %5809 = vmatmul.mubr.msk.f32.vlgmr.msra.gmra.mxu0 %vm1014_vm0, %v1009_v6  ;;  %5821 = vmatprep.subr.mxu0 %v6701_v8 }
 0x6d2   : > { %5823 = vmatprep.mubr.msk.f32.mxu0 %vm6702_vm1, %v6701_v8 }
 0x789   : > { %v1894_v51 = vpop.f32.mrf.mxu0 }
 0x78a   : > { %v1898_v53 = vadd.f32 %v1894_v51, %v7155_v0  ;;  %v1946_v0 = vld [vmem:[%s7867_s12 + $0x18] sm:$0xff] }
 0x78b   : > { %v5788_v54 = vpop.f32.mrf.mxu0  ;;  %5790 = vmatpush3.msra.mxu1 %v1946_v0 }
 0x78c   : > { %v7306_v55 = vadd.f32 %v5480_v52, %v1898_v53  ;;  %5791 = vmatprep.subr.mxu1 %v6701_v8 }
 0x78d   : > { %5792 = vmatpush3.msra.mxu1 %v1945_v1 }
 0x78e   : > { %v1909_v56 = vsel %vm1014_vm0, %v7306_v55, 0.0  ;;  %5793 = vmatprep.subr.mxu1 %v6701_v8 }
 0x78f   : > { %1910 = vadd.xlane.f32.xlu1 %v1909_v56  ;;  %5794 = vmatpush3.msra.mxu1 %v1944_v3 }
 0x790   : > { %5795 = vmatprep.subr.mxu1 %v6701_v8 }
 0x791   : > { %5796 = vmatpush3.msra.mxu1 %v1943_v5  ;;  %v2107_v23 = vpop.f32.mrf.mxu0 }
 0x792   : > { %5811 = vmatprep.subr.mxu1 %v6701_v8  ;;  %v7346_v24 = vadd.f32 %v5485_v22, %v2107_v23 }
 0x793   : > { %v5810_v25 = vpop.f32.mrf.mxu0 }
 0x818   : > { %v1911_v57 = vpop.xlane.xlu1 %1910 }
 0x819   : > { %v1912_v58 = vmul.f32 0.03125, %v1911_v57 }
 0x81b   : > { %v1913_v59 = vsub.f32 %v7306_v55, %v1912_v58 }
 0x81d   : > { %v1914_v60 = vmul.f32 %v1913_v59, %v1913_v59  ;;  %v1932_v17 = vmul.f32 %v5481_v16, %v1913_v59 }
 0x81f   : > { %v1915_v61 = vsel %vm1014_vm0, %v1914_v60, 0.0 }
 0x820   : > { %1916 = vadd.xlane.f32.xlu0 %v1915_v61 }
 0x836   : > { %2285 = vrot.lane.b32.xlu0 %v7346_v24, %s7933_s27 }
 0x8a9   : > { %v1917_v7 = vpop.xlane.xlu0 %1916 }
 0x8aa   : > { %v1918_v9 = vmul.f32 0.032258064, %v1917_v7 }
 0x8ac   : > { %6235 = vrsqrt.f32 %v1918_v9  ;;  %vm1921_vm8 = vcmp.eq.f32.partialorder %v1918_v9, inf  ;;  %v1924_v12 = vand.u32 2147483648, %v1918_v9  ;;  %vm1923_vm9 = vcmp.eq.f32.partialorder %v1918_v9, 0.0 }
 0x8ad   : > { %v2286_v26 = vpop.permute.xlu0 %2285 }
 0x8ae   : > { %5822 = vmatpush3.xpose.msk.msra.mxu0 %vm1138_vm4, %v2286_v26 }
 0x8af   : > { %5831 = vmatprep.subr.mxu0 %v6701_v8 }
 0x8b9   : > { %v6236_v10 = vpop.eup %6235 }
 0x8ba   : > { %v1920_v11 = vmul.f32 %v6236_v10, %v1918_v9 }
 0x8bc   : > { %v1922_v13 = vsel %vm1921_vm8, %v1918_v9, %v1920_v11 }
 0x8bd   : > { %v1925_v14 = vsel %vm1923_vm9, %v1924_v12, %v1922_v13 }
 0x8be   : > { %v1933_v15 = vadd.f32 1e-06, %v1925_v14 }
 0x8c0   : > { %6237 = vrcp.f32 %v1933_v15 }
 0x8cd   : > { %v6238_v18 = vpop.eup %6237 }
 0x8ce   : > { %v1935_v20 = vmul.f32 %v6238_v18, %v1932_v17 }
 0x8d0   : > { %v1942_v21 = vadd.f32 %v5482_v19, %v1935_v20 }
 0x8d2   : > { %5798 = vmatmul.mubr.msk.f32.vlgmr.msra.gmra.mxu1 %vm1014_vm0, %v1942_v21 }
 0x8d3   : > { %5813 = vmatprep.mubr.msk.f32.mxu1 %vm6702_vm1, %v6701_v8  ;;  %5812 = vmatpush3.xpose.msk.msra.mxu1 %vm1138_vm4, %v7346_v24 }
 0x8d4   : > { %5816 = vmatprep.subr.mxu1 %v6701_v8 }
 0x992   : > { %v2023_v28 = vpop.f32.mrf.mxu1 }
 0x993   : > { %v2024_v29 = vadd.f32 %v5483_v27, %v2023_v28 }
 0x994   : > { %v5799_v30 = vpop.f32.mrf.mxu1 }
 0x995   : > { %2450 = vrot.lane.b32.xlu0 %v2024_v29, %s7935_s2  ;;  %2283 = vrot.lane.b32.xlu1 %v2024_v29, %s7933_s27  ;;  %s8030_s27 = smov 56  }
 0x996   : > { %5814 = vmatmul.mubr.msk.f32.vlgmr.msra.gmra.mxu1 %vm1138_vm4, %v2024_v29 }
 0x997   : > { %5818 = vmatprep.mubr.msk.f32.mxu1 %vm6702_vm1, %v6701_v8 }
 0x999   : > { %2617 = vrot.lane.b32.xlu0 %v2024_v29, %s7931_s9  ;;  %2452 = vrot.lane.b32.xlu1 %v7346_v24, %s7935_s2  ;;  %s8024_s2 = smov 88  }
 0x99d   : > { %2619 = vrot.lane.b32.xlu1 %v7346_v24, %s7931_s9  ;;  %s8025_s9 = smov 96  }
 0xa07   : > { %v2284_v31 = vpop.permute.xlu1 %2283  ;;  %v2451_v33 = vpop.permute.xlu0 %2450 }
 0xa08   : > { %5824 = vmatmul.mubr.msk.f32.vlgmr.msra.gmra.mxu0 %vm1138_vm4, %v2284_v31 }
 0xa09   : > { %5833 = vmatprep.mubr.msk.f32.mxu0 %vm6702_vm1, %v6701_v8 }
 0xa0b   : > { %v2453_v32 = vpop.permute.xlu1 %2452  ;;  %v2618_v35 = vpop.permute.xlu0 %2617 }
 0xa0c   : > { %5832 = vmatpush3.xpose.msk.msra.mxu0 %vm1138_vm4, %v2453_v32 }
 0xa0d   : > { %5841 = vmatprep.subr.mxu0 %v6701_v8 }
 0xa0f   : > { %5834 = vmatmul.mubr.msk.f32.vlgmr.msra.gmra.mxu0 %vm1138_vm4, %v2451_v33  ;;  %v2620_v34 = vpop.permute.xlu1 %2619 }
 0xa10   : > { %5842 = vmatpush3.xpose.msk.msra.mxu0 %vm1138_vm4, %v2620_v34  ;;  %5843 = vmatprep.mubr.msk.f32.mxu0 %vm6702_vm1, %v6701_v8 }
 0xa11   : > { %5851 = vmatprep.subr.mxu0 %v6701_v8 }
 0xa13   : > { %5844 = vmatmul.mubr.msk.f32.vlgmr.msra.gmra.mxu0 %vm1138_vm4, %v2618_v35 }
 0xa14   : > { %5859 = vmatprep.mubr.msk.f32.mxu0 %vm6702_vm1, %v6701_v8  ;;  %5852 = vmatpush3.msra.mxu0 %v2802_v41 }
 0xa15   : > { %5853 = vmatprep.subr.mxu0 %v6701_v8 }
 0xa16   : > { %5854 = vmatpush3.msra.mxu0 %v2801_v42 }
 0xa17   : > { %5855 = vmatprep.subr.mxu0 %v6701_v8 }
 0xa56   : > { %v2183_v44 = vpop.f32.mrf.mxu1 }
 0xa57   : > { %v2187_v45 = vmul.f32 0.35355338, %v2183_v44  ;;  %v2800_v44 = vld [vmem:[#allocation13 + $0x8] sm:$0xff] }
 0xa58   : > { %v5815_v46 = vpop.f32.mrf.mxu1  ;;  %5856 = vmatpush3.msra.mxu0 %v2800_v44 }
 0xa59   : > { %v2195_v47 = vsel %vm2194_vm11, -1e+09, %v2187_v45  ;;  %5857 = vmatprep.subr.mxu0 %v6701_v8  ;;  %v2799_v45 = vld [vmem:[#allocation13] sm:$0xff] }
 0xa5a   : > { %v2196_v48 = vsel %vm1138_vm4, %v2195_v47, -inf  ;;  %5858 = vmatpush3.msra.mxu0 %v2799_v45 }
 0xa5b   : > { %2197 = vmax.xlane.f32.xlu1 %v2196_v48  ;;  %5873 = vmatprep.subr.mxu0 %v6701_v8 }
 0xac8   : > { %v2357_v49 = vpop.f32.mrf.mxu0 }
 0xac9   : > { %v2361_v50 = vmul.f32 0.35355338, %v2357_v49 }
 0xaca   : > { %v5825_v51 = vpop.f32.mrf.mxu0 }
 0xacb   : > { %v2362_v52 = vsel %vm2194_vm11, -1e+09, %v2361_v50 }
 0xacc   : > { %v2363_v53 = vsel %vm1138_vm4, %v2362_v52, -inf }
 0xacd   : > { %2364 = vmax.xlane.f32.xlu0 %v2363_v53 }
 0xacf   : > { %v2524_v54 = vpop.f32.mrf.mxu0 }
 0xad0   : > { %v2528_v56 = vmul.f32 0.35355338, %v2524_v54 }
 0xad1   : > { %v5835_v57 = vpop.f32.mrf.mxu0 }
 0xad2   : > { %v2529_v58 = vsel %vm2194_vm11, -1e+09, %v2528_v56 }
 0xad3   : > { %v2691_v59 = vpop.f32.mrf.mxu0  ;;  %v2530_v60 = vsel %vm1138_vm4, %v2529_v58, -inf }
 0xad4   : > { %v2695_v61 = vmul.f32 0.35355338, %v2691_v59  ;;  %2531 = vmax.xlane.f32.xlu0 %v2530_v60  ;;  %v5500_v60 = vld [vmem:[#allocation14] ss:$0 sm:$0xff] }
 0xad5   : > { %v5845_v62 = vpop.f32.mrf.mxu0 }
 0xad6   : > { %v2696_v63 = vsel %vm2194_vm11, -1e+09, %v2695_v61 }
 0xad7   : > { %v2697_v0 = vsel %vm1138_vm4, %v2696_v63, -inf }
 0xad8   : > { %2698 = vmax.xlane.f32.xlu1 %v2697_v0 }
 0xae4   : > { %v2198_v1 = vpop.xlane.xlu1 %2197 }
 0xae5   : > { %v2199_v2 = vsub.f32 %v2195_v47, %v2198_v1 }
 0xae7   : > { %v2200_v3 = vmul.f32 1.442695, %v2199_v2 }
 0xae9   : > { %6239 = vpow2.f32 %v2200_v3  ;;  %2374 = vrot.lane.b32.xlu1 %v7346_v24, %s7939_s24  ;;  %s8022_s24 = sld [smem:[#allocation50_spill]] }
 0xaf6   : > { %v6240_v4 = vpop.eup %6239 }
 0xaf7   : > { %v2202_v5 = vsel %vm1138_vm4, %v6240_v4, 0.0 }
 0xaf8   : > { %2203 = vadd.xlane.f32.xlu0 %v2202_v5 }
 0xb0e   : > { %2207 = vrot.lane.b32.xlu0 %v7346_v24, %s7937_s19  ;;  %s8031_s19 = smov 64  }
 0xb56   : > { %v2365_v6 = vpop.xlane.xlu0 %2364 }
 0xb57   : > { %v2366_v7 = vsub.f32 %v2362_v52, %v2365_v6  ;;  %v2924_v6 = vld [vmem:[#allocation16 + $0x18] sm:$0xff] }
 0xb59   : > { %v2367_v9 = vmul.f32 1.442695, %v2366_v7  ;;  %v2923_v7 = vld [vmem:[#allocation16 + $0x10] sm:$0xff] }
 0xb5b   : > { %6241 = vpow2.f32 %v2367_v9  ;;  %v2921_v9 = vld [vmem:[#allocation16] sm:$0xff] }
 0xb5d   : > { %v2532_v10 = vpop.xlane.xlu0 %2531 }
 0xb5e   : > { %v2533_v11 = vsub.f32 %v2529_v58, %v2532_v10  ;;  %v3013_v10 = vld [vmem:[%s7877_s22 + $0x38] sm:$0xff] }
 0xb60   : > { %v2534_v12 = vmul.f32 1.442695, %v2533_v11  ;;  %v3012_v11 = vld [vmem:[%s7877_s22 + $0x30] sm:$0xff] }
 0xb61   : > { %v2699_v13 = vpop.xlane.xlu1 %2698 }
 0xb62   : > { %6243 = vpow2.f32 %v2534_v12  ;;  %v2700_v14 = vsub.f32 %v2696_v63, %v2699_v13  ;;  %v3011_v12 = vld [vmem:[%s7877_s22 + $0x28] sm:$0xff]  ;;  %v3010_v13 = vld [vmem:[%s7877_s22 + $0x20] sm:$0xff] }
 0xb64   : > { %v2701_v15 = vmul.f32 1.442695, %v2700_v14  ;;  %v3009_v14 = vld [vmem:[%s7877_s22 + $0x18] sm:$0xff] }
 0xb65   : > { %v2375_v27 = vpop.permute.xlu1 %2374 }
 0xb66   : > { %6245 = vpow2.f32 %v2701_v15 }
 0xb68   : > { %v6242_v16 = vpop.eup %6241 }
 0xb69   : > { %v2369_v17 = vsel %vm1138_vm4, %v6242_v16, 0.0 }
 0xb6a   : > { %2370 = vadd.xlane.f32.xlu1 %v2369_v17 }
 0xb6f   : > { %v6244_v18 = vpop.eup %6243 }
 0xb70   : > { %v2536_v19 = vsel %vm1138_vm4, %v6244_v18, 0.0 }
 0xb71   : > { %2537 = vadd.xlane.f32.xlu0 %v2536_v19 }
 0xb73   : > { %v6246_v20 = vpop.eup %6245 }
 0xb74   : > { %v2703_v21 = vsel %vm1138_vm4, %v6246_v20, 0.0 }
 0xb75   : > { %2704 = vadd.xlane.f32.xlu1 %v2703_v21 }
 0xb81   : > { %v2204_v22 = vpop.xlane.xlu0 %2203 }
 0xb82   : > { %6247 = vrcp.f32 %v2204_v22 }
 0xb85   : > { %v2208_v23 = vpop.permute.xlu0 %2207 }
 0xb86   : > { %5817 = vmatpush3.msra.mxu1 %v2208_v23  ;;  %2541 = vrot.lane.b32.xlu1 %v7346_v24, %s7929_s6  ;;  %v5501_v23 = vld [vmem:[%s8022_s24] ss:$0 sm:$0xff]  ;;  %s8029_s6 = smov 80  }
 0xb87   : > { %2708 = vrot.lane.b32.xlu0 %v7346_v24, %s8018_s17  ;;  %5826 = vmatprep.subr.mxu1 %v6701_v8 }
 0xb8f   : > { %v6248_v25 = vpop.eup %6247 }
 0xb90   : > { %v2206_v26 = vmul.f32 %v6248_v25, %v6240_v4 }
 0xb92   : > { %5819 = vmatmul.mubr.msk.f32.vlgmr.msra.gmra.mxu1 %vm1138_vm4, %v2206_v26 }
 0xb93   : > { %5827 = vmatpush3.msra.mxu1 %v2375_v27  ;;  %5828 = vmatprep.mubr.msk.f32.mxu1 %vm6702_vm1, %v6701_v8  ;;  %v5502_v27 = vld [vmem:[%s8023_s15] ss:$0 sm:$0xff] }
 0xb94   : > { %5836 = vmatprep.subr.mxu1 %v6701_v8 }
 0xbf3   : > { %v2371_v28 = vpop.xlane.xlu1 %2370 }
 0xbf4   : > { %6249 = vrcp.f32 %v2371_v28 }
 0xbfa   : > { %v2538_v29 = vpop.xlane.xlu0 %2537 }
 0xbfb   : > { %6251 = vrcp.f32 %v2538_v29 }
 0xbfe   : > { %v2705_v30 = vpop.xlane.xlu1 %2704  ;;  %v2709_v35 = vpop.permute.xlu0 %2708 }
 0xbff   : > { %6253 = vrcp.f32 %v2705_v30  ;;  %v3008_v30 = vld [vmem:[%s7877_s22 + $0x10] sm:$0xff] }
 0xc01   : > { %v6250_v24 = vpop.eup %6249 }
 0xc02   : > { %v2542_v31 = vpop.permute.xlu1 %2541  ;;  %v2373_v32 = vmul.f32 %v6250_v24, %v6242_v16  ;;  %v3007_v24 = vld [vmem:[%s7877_s22 + $0x8] sm:$0xff] }
 0xc04   : > { %5829 = vmatmul.mubr.msk.f32.vlgmr.msra.gmra.mxu1 %vm1138_vm4, %v2373_v32  ;;  %v5503_v32 = vld [vmem:[#allocation17] ss:$0 sm:$0xff] }
 0xc05   : > { %5837 = vmatpush3.msra.mxu1 %v2542_v31  ;;  %5838 = vmatprep.mubr.msk.f32.mxu1 %vm6702_vm1, %v6701_v8  ;;  %v3006_v31 = vld [vmem:[%s7877_s22] sm:$0xff] }
 0xc06   : > { %5846 = vmatprep.subr.mxu1 %v6701_v8 }
 0xc08   : > { %v6252_v33 = vpop.eup %6251 }
 0xc09   : > { %v2540_v34 = vmul.f32 %v6252_v33, %v6244_v18 }
 0xc0b   : > { %5839 = vmatmul.mubr.msk.f32.vlgmr.msra.gmra.mxu1 %vm1138_vm4, %v2540_v34 }
 0xc0c   : > { %v6254_v36 = vpop.eup %6253  ;;  %5847 = vmatpush3.msra.mxu1 %v2709_v35  ;;  %5848 = vmatprep.mubr.msk.f32.mxu1 %vm6702_vm1, %v6701_v8 }
 0xc0d   : > { %v2707_v38 = vmul.f32 %v6254_v36, %v6246_v20  ;;  %5862 = vmatprep.subr.mxu1 %v6701_v8 }
 0xc0f   : > { %5849 = vmatmul.mubr.msk.f32.vlgmr.msra.gmra.mxu1 %vm1138_vm4, %v2707_v38 }
 0xc10   : > { %5870 = vmatprep.mubr.msk.f32.mxu1 %vm6702_vm1, %v6701_v8  ;;  %5863 = vmatpush3.msra.mxu1 %v2924_v6 }
 0xc11   : > { %5864 = vmatprep.subr.mxu1 %v6701_v8 }
 0xc12   : > { %5865 = vmatpush3.msra.mxu1 %v2923_v7 }
 0xc13   : > { %5866 = vmatprep.subr.mxu1 %v6701_v8 }
 0xc52   : > { %v2279_v39 = vpop.f32.mrf.mxu1 }
 0xc54   : > { %v5820_v40 = vpop.f32.mrf.mxu1 }
 0xcc4   : > { %v2446_v46 = vpop.f32.mrf.mxu1 }
 0xcc5   : > { %2785 = vrot.lane.b32.xlu1 %v2446_v46, %s8019_s30 }
 0xcc6   : > { %v5830_v47 = vpop.f32.mrf.mxu1 }
 0xccb   : > { %v2613_v48 = vpop.f32.mrf.mxu1 }
 0xccc   : > { %2789 = vrot.lane.b32.xlu0 %v2613_v48, %s8020_s26 }
 0xccd   : > { %v5840_v49 = vpop.f32.mrf.mxu1 }
 0xccf   : > { %v2780_v50 = vpop.f32.mrf.mxu1 }
 0xcd0   : > { %2793 = vrot.lane.b32.xlu1 %v2780_v50, %s8021_s4  ;;  %v5514_v50 = vld [vmem:[%s8010_s18 + $0x38] sm:$0xff] }
 0xcd1   : > { %v5850_v51 = vpop.f32.mrf.mxu1 }
 0xcd2   : > { %v5513_v51 = vld [vmem:[%s8010_s18 + $0x30] sm:$0xff] }
 0xd37   : > { %v2786_v52 = vpop.permute.xlu1 %2785 }
 0xd38   : > { %v2796_v54 = vsel %vm1138_vm4, %v2279_v39, %v2786_v52  ;;  %v5506_v39 = vld [vmem:[#allocation19] ss:$0 sm:$0xff]  ;;  %v5512_v52 = vld [vmem:[%s8010_s18 + $0x28] sm:$0xff] }
 0xd3e   : > { %v2790_v53 = vpop.permute.xlu0 %2789 }
 0xd3f   : > { %v2797_v56 = vsel %vm1817_vm6, %v2796_v54, %v2790_v53  ;;  %v5511_v53 = vld [vmem:[%s8010_s18 + $0x20] sm:$0xff] }
 0xd42   : > { %v2794_v57 = vpop.permute.xlu1 %2793 }
 0xd43   : > { %v2798_v58 = vsel %vm1819_vm7, %v2797_v56, %v2794_v57 }
 0xd44   : > { %5860 = vmatmul.mubr.msk.f32.vlgmr.msra.gmra.mxu0 %vm1014_vm0, %v2798_v58 }
 0xd45   : > { %5889 = vmatprep.mubr.msk.f32.mxu0 %vm6702_vm1, %v6701_v8  ;;  %5874 = vmatpush3.msra.mxu0 %v3013_v10 }
 0xd46   : > { %5875 = vmatprep.subr.mxu0 %v6701_v8 }
 0xd47   : > { %5876 = vmatpush3.msra.mxu0 %v3012_v11 }
 0xd48   : > { %5877 = vmatprep.subr.mxu0 %v6701_v8 }
 0xd49   : > { %5878 = vmatpush3.msra.mxu0 %v3011_v12 }
 0xd4a   : > { %5879 = vmatprep.subr.mxu0 %v6701_v8 }
 0xd4b   : > { %5880 = vmatpush3.msra.mxu0 %v3010_v13 }
 0xd4c   : > { %5881 = vmatprep.subr.mxu0 %v6701_v8 }
 0xd4d   : > { %5882 = vmatpush3.msra.mxu0 %v3009_v14 }
 0xd4e   : > { %5883 = vmatprep.subr.mxu0 %v6701_v8 }
 0xd4f   : > { %5884 = vmatpush3.msra.mxu0 %v3008_v30 }
 0xd50   : > { %5885 = vmatprep.subr.mxu0 %v6701_v8 }
 0xd51   : > { %5886 = vmatpush3.msra.mxu0 %v3007_v24 }
 0xd52   : > { %5887 = vmatprep.subr.mxu0 %v6701_v8 }
 0xd53   : > { %5888 = vmatpush3.msra.mxu0 %v3006_v31 }
 0xd54   : > { %5913 = vmatprep.subr.mxu0 %v6701_v8 }
 0xe04   : > { %v2872_v59 = vpop.f32.mrf.mxu0 }
 0xe05   : > { %v2876_v61 = vadd.f32 %v2872_v59, %v7306_v55  ;;  %v2922_v55 = vld [vmem:[#allocation16 + $0x8] sm:$0xff] }
 0xe06   : > { %v5861_v62 = vpop.f32.mrf.mxu0  ;;  %5867 = vmatpush3.msra.mxu1 %v2922_v55 }
 0xe07   : > { %v7440_v63 = vadd.f32 %v5500_v60, %v2876_v61  ;;  %5868 = vmatprep.subr.mxu1 %v6701_v8 }
 0xe08   : > { %5869 = vmatpush3.msra.mxu1 %v2921_v9 }
 0xe09   : > { %v2887_v0 = vsel %vm1014_vm0, %v7440_v63, 0.0  ;;  %5892 = vmatprep.subr.mxu1 %v6701_v8 }
 0xe0a   : > { %2888 = vadd.xlane.f32.xlu0 %v2887_v0 }
 0xe93   : > { %v2889_v1 = vpop.xlane.xlu0 %2888 }
 0xe94   : > { %v2890_v2 = vmul.f32 0.03125, %v2889_v1 }
 0xe96   : > { %v2891_v3 = vsub.f32 %v7440_v63, %v2890_v2  ;;  %v5510_v2 = vld [vmem:[%s8012_s13 + $0x1] ss:$0 sm:$0xff] }
 0xe98   : > { %v2892_v4 = vmul.f32 %v2891_v3, %v2891_v3  ;;  %v2910_v25 = vmul.f32 %v5501_v23, %v2891_v3 }
 0xe9a   : > { %v2893_v5 = vsel %vm1014_vm0, %v2892_v4, 0.0 }
 0xe9b   : > { %2894 = vadd.xlane.f32.xlu1 %v2893_v5  ;;  %v5516_v5 = vld [vmem:[%s8013_s5 + $0x1] ss:$0 sm:$0xff] }
 0xf24   : > { %v2895_v15 = vpop.xlane.xlu1 %2894 }
 0xf25   : > { %v2896_v16 = vmul.f32 0.032258064, %v2895_v15 }
 0xf27   : > { %6255 = vrsqrt.f32 %v2896_v16  ;;  %vm2899_vm12 = vcmp.eq.f32.partialorder %v2896_v16, inf  ;;  %v2902_v19 = vand.u32 2147483648, %v2896_v16  ;;  %vm2901_vm13 = vcmp.eq.f32.partialorder %v2896_v16, 0.0 }
 0xf34   : > { %v6256_v17 = vpop.eup %6255 }
 0xf35   : > { %v2898_v18 = vmul.f32 %v6256_v17, %v2896_v16 }
 0xf37   : > { %v2900_v20 = vsel %vm2899_vm12, %v2896_v16, %v2898_v18 }
 0xf38   : > { %v2903_v21 = vsel %vm2901_vm13, %v2902_v19, %v2900_v20 }
 0xf39   : > { %v2911_v22 = vadd.f32 1e-06, %v2903_v21 }
 0xf3b   : > { %6257 = vrcp.f32 %v2911_v22 }
 0xf48   : > { %v6258_v26 = vpop.eup %6257 }
 0xf49   : > { %v2913_v28 = vmul.f32 %v6258_v26, %v2910_v25 }
 0xf4b   : > { %v2920_v29 = vadd.f32 %v5502_v27, %v2913_v28 }
 0xf4d   : > { %5871 = vmatmul.mubr.msk.f32.vlgmr.msra.gmra.mxu1 %vm1014_vm0, %v2920_v29 }
 0xf4e   : > { %5900 = vmatprep.mubr.msk.f32.mxu1 %vm6702_vm1, %v6701_v8  ;;  %5893 = vmatpush3.msra.mxu1 %v5514_v50 }
 0xf4f   : > { %5894 = vmatprep.subr.mxu1 %v6701_v8 }
 0xf50   : > { %5895 = vmatpush3.msra.mxu1 %v5513_v51 }
 0xf51   : > { %5896 = vmatprep.subr.mxu1 %v6701_v8 }
 0xf52   : > { %5897 = vmatpush3.msra.mxu1 %v5512_v52 }
 0xf53   : > { %5898 = vmatprep.subr.mxu1 %v6701_v8 }
 0xf54   : > { %5899 = vmatpush3.msra.mxu1 %v5511_v53 }
 0xf55   : > { %5903 = vmatprep.subr.mxu1 %v6701_v8 }
0x100d   : > { %v3001_v33 = vpop.f32.mrf.mxu1 }
0x100e   : > { %v3002_v34 = vadd.f32 %v5503_v32, %v3001_v33 }
0x100f   : > { %v5872_v35 = vpop.f32.mrf.mxu1 }
0x1010   : > { %v3005_v36 = vmax.f32 %v3002_v34, 0.0 }
0x1012   : > { %5890 = vmatmul.mubr.msk.f32.vlgmr.msra.gmra.mxu0 %vm3014_vm14, %v3005_v36 }
0x1013   : > { %5915 = vmatprep.mubr.msk.f32.mxu0 %vm6702_vm1, %v6701_v8 }
0x10d2   : > { %v3084_v38 = vpop.f32.mrf.mxu0 }
0x10d3   : > { %v3088_v40 = vadd.f32 %v3084_v38, %v7440_v63  ;;  %v5509_v63 = vld [vmem:[%s8011_s1 + $0x1] ss:$0 sm:$0xff]  ;;  %s8033_s1 = smov 40  }
0x10d4   : > { %v5891_v41 = vpop.f32.mrf.mxu0 }
0x10d5   : > { %v7495_v42 = vadd.f32 %v5506_v39, %v3088_v40 }
0x10d7   : > { %v3101_v44 = vsel %vm1014_vm0, %v7495_v42, 0.0 }
0x10d8   : > { %3102 = vadd.xlane.f32.xlu0 %v3101_v44 }
0x1161   : > { %v3103_v45 = vpop.xlane.xlu0 %3102 }
0x1162   : > { %v3104_v46 = vmul.f32 0.03125, %v3103_v45 }
0x1164   : > { %v3105_v47 = vsub.f32 %v7495_v42, %v3104_v46 }
0x1166   : > { %v3106_v48 = vmul.f32 %v3105_v47, %v3105_v47  ;;  %v3124_v0 = vmul.f32 %v5509_v63, %v3105_v47 }
0x1168   : > { %v3107_v49 = vsel %vm1014_vm0, %v3106_v48, 0.0 }
0x1169   : > { %3108 = vadd.xlane.f32.xlu0 %v3107_v49 }
0x11f2   : > { %v3109_v54 = vpop.xlane.xlu0 %3108 }
0x11f3   : > { %v3110_v56 = vmul.f32 0.032258064, %v3109_v54 }
0x11f5   : > { %6259 = vrsqrt.f32 %v3110_v56  ;;  %vm3113_vm15 = vcmp.eq.f32.partialorder %v3110_v56, inf  ;;  %v3116_v59 = vand.u32 2147483648, %v3110_v56  ;;  %vm3115_vm2 = vcmp.eq.f32.partialorder %v3110_v56, 0.0 }
0x1202   : > { %v6260_v57 = vpop.eup %6259 }
0x1203   : > { %v3112_v58 = vmul.f32 %v6260_v57, %v3110_v56 }
0x1205   : > { %v3114_v60 = vsel %vm3113_vm15, %v3110_v56, %v3112_v58 }
0x1206   : > { %v3117_v61 = vsel %vm3115_vm2, %v3116_v59, %v3114_v60 }
0x1207   : > { %v3125_v62 = vadd.f32 1e-06, %v3117_v61 }
0x1209   : > { %6261 = vrcp.f32 %v3125_v62 }
0x1216   : > { %v6262_v1 = vpop.eup %6261 }
0x1217   : > { %v3127_v3 = vmul.f32 %v6262_v1, %v3124_v0 }
0x1219   : > { %v3134_v4 = vadd.f32 %v5510_v2, %v3127_v3 }
0x121b   : > { %5901 = vmatmul.mubr.msk.f32.vlgmr.msra.gmra.mxu1 %vm1014_vm0, %v3134_v4 }
0x121c   : > { %5905 = vmatprep.mubr.msk.f32.mxu1 %vm6702_vm1, %v6701_v8 }
0x12db   : > { %v3217_v6 = vpop.f32.mrf.mxu1 }
0x12dc   : > { %v7529_v7 = vadd.f32 %v5516_v5, %v3217_v6 }
0x12dd   : > { %v5902_v55 = vpop.f32.mrf.mxu1 }
0x12de   : > { %3389 = vrot.lane.b32.xlu0 %v7529_v7, %s8024_s2  ;;  %3222 = vrot.lane.b32.xlu1 %v7529_v7, %s8025_s9 }
0x12e2   : > { %3554 = vrot.lane.b32.xlu0 %v7529_v7, %s8026_s20  ;;  %3387 = vrot.lane.b32.xlu1 %v7529_v7, %s8027_s21 }
0x12e6   : > { %3721 = vrot.lane.b32.xlu0 %v7529_v7, %s8028_s8  ;;  %3556 = vrot.lane.b32.xlu1 %v7529_v7, %s8029_s6 }
0x12ea   : > { %3723 = vrot.lane.b32.xlu1 %v7529_v7, %s8018_s17 }
0x1350   : > { %v3390_v9 = vpop.permute.xlu0 %3389  ;;  %v3223_v10 = vpop.permute.xlu1 %3222 }
0x1351   : > { %5904 = vmatpush3.xpose.msk.msra.mxu1 %vm1138_vm4, %v3223_v10  ;;  %5914 = vmatpush3.xpose.msk.msra.mxu0 %vm1138_vm4, %v3390_v9 }
0x1352   : > { %5923 = vmatprep.subr.mxu0 %v6701_v8  ;;  %5908 = vmatprep.subr.mxu1 %v6701_v8 }
0x1354   : > { %5906 = vmatmul.mubr.msk.f32.vlgmr.msra.gmra.mxu1 %vm1138_vm4, %v7529_v7  ;;  %v3388_v11 = vpop.permute.xlu1 %3387  ;;  %v3555_v13 = vpop.permute.xlu0 %3554 }
0x1355   : > { %5916 = vmatmul.mubr.msk.f32.vlgmr.msra.gmra.mxu0 %vm1138_vm4, %v3388_v11  ;;  %5910 = vmatprep.mubr.msk.f32.mxu1 %vm6702_vm1, %v6701_v8  ;;  %v5533_v11 = vld [vmem:[%s8014_s10 + $0x38] sm:$0xff] }
0x1356   : > { %5925 = vmatprep.mubr.msk.f32.mxu0 %vm6702_vm1, %v6701_v8 }
0x1358   : > { %v3557_v12 = vpop.permute.xlu1 %3556  ;;  %v3722_v15 = vpop.permute.xlu0 %3721 }
0x1359   : > { %5924 = vmatpush3.xpose.msk.msra.mxu0 %vm1138_vm4, %v3557_v12 }
0x135a   : > { %5933 = vmatprep.subr.mxu0 %v6701_v8 }
0x135c   : > { %5926 = vmatmul.mubr.msk.f32.vlgmr.msra.gmra.mxu0 %vm1138_vm4, %v3555_v13  ;;  %v3724_v14 = vpop.permute.xlu1 %3723 }
0x135d   : > { %5934 = vmatpush3.xpose.msk.msra.mxu0 %vm1138_vm4, %v3724_v14  ;;  %5935 = vmatprep.mubr.msk.f32.mxu0 %vm6702_vm1, %v6701_v8 }
0x135e   : > { %5943 = vmatprep.subr.mxu0 %v6701_v8 }
0x1360   : > { %5936 = vmatmul.mubr.msk.f32.vlgmr.msra.gmra.mxu0 %vm1138_vm4, %v3722_v15 }
0x1361   : > { %5951 = vmatprep.mubr.msk.f32.mxu0 %vm6702_vm1, %v6701_v8  ;;  %5944 = vmatpush3.msra.mxu0 %v5533_v11 }
0x1362   : > { %5945 = vmatprep.subr.mxu0 %v6701_v8 }
0x1414   : > { %v3294_v16 = vpop.f32.mrf.mxu1 }
0x1415   : > { %v3298_v17 = vmul.f32 0.35355338, %v3294_v16  ;;  %v3461_v18 = vpop.f32.mrf.mxu0  ;;  %v5532_v16 = vld [vmem:[%s8014_s10 + $0x30] sm:$0xff] }
0x1416   : > { %v3465_v19 = vmul.f32 0.35355338, %v3461_v18  ;;  %v5907_v20 = vpop.f32.mrf.mxu1  ;;  %5946 = vmatpush3.msra.mxu0 %v5532_v16  ;;  %v5530_v18 = vld [vmem:[%s8014_s10 + $0x20] sm:$0xff] }
0x1417   : > { %v5917_v21 = vpop.f32.mrf.mxu0  ;;  %v3299_v22 = vsel %vm1214_vm5, -1e+09, %v3298_v17  ;;  %v5531_v17 = vld [vmem:[%s8014_s10 + $0x28] sm:$0xff]  ;;  %5947 = vmatprep.subr.mxu0 %v6701_v8 }
0x1418   : > { %v3300_v23 = vsel %vm1138_vm4, %v3299_v22, -inf  ;;  %v3466_v25 = vsel %vm1214_vm5, -1e+09, %v3465_v19  ;;  %5948 = vmatpush3.msra.mxu0 %v5531_v17 }
0x1419   : > { %3301 = vmax.xlane.f32.xlu1 %v3300_v23  ;;  %v3467_v26 = vsel %vm1138_vm4, %v3466_v25, -inf  ;;  %5949 = vmatprep.subr.mxu0 %v6701_v8 }
0x141a   : > { %3468 = vmax.xlane.f32.xlu0 %v3467_v26  ;;  %5950 = vmatpush3.msra.mxu0 %v5530_v18 }
0x141b   : > { %5965 = vmatprep.subr.mxu0 %v6701_v8 }
0x141c   : > { %v3628_v27 = vpop.f32.mrf.mxu0 }
0x141d   : > { %v3632_v28 = vmul.f32 0.35355338, %v3628_v27 }
0x141e   : > { %v5927_v29 = vpop.f32.mrf.mxu0 }
0x141f   : > { %v3633_v30 = vsel %vm1214_vm5, -1e+09, %v3632_v28 }
0x1420   : > { %v3795_v24 = vpop.f32.mrf.mxu0  ;;  %v3634_v31 = vsel %vm1138_vm4, %v3633_v30, -inf }
0x1421   : > { %v3799_v32 = vmul.f32 0.35355338, %v3795_v24  ;;  %3635 = vmax.xlane.f32.xlu0 %v3634_v31  ;;  %v5536_v24 = vld [vmem:[%s8015_s0 + $0x1] ss:$0 sm:$0xff] }
0x1422   : > { %v5937_v33 = vpop.f32.mrf.mxu0 }
0x1423   : > { %v3800_v34 = vsel %vm1214_vm5, -1e+09, %v3799_v32 }
0x1424   : > { %v3801_v35 = vsel %vm1138_vm4, %v3800_v34, -inf }
0x1425   : > { %3802 = vmax.xlane.f32.xlu1 %v3801_v35 }
0x1436   : > { %3478 = vrot.lane.b32.xlu1 %v7529_v7, %s8030_s27  ;;  %s8032_s27 = smov 48  }
0x14a2   : > { %v3302_v36 = vpop.xlane.xlu1 %3301 }
0x14a3   : > { %v3303_v38 = vsub.f32 %v3299_v22, %v3302_v36  ;;  %v3469_v39 = vpop.xlane.xlu0 %3468 }
0x14a4   : > { %v3470_v40 = vsub.f32 %v3466_v25, %v3469_v39 }
0x14a5   : > { %v3304_v41 = vmul.f32 1.442695, %v3303_v38 }
0x14a6   : > { %v3471_v44 = vmul.f32 1.442695, %v3470_v40 }
0x14a7   : > { %6263 = vpow2.f32 %v3304_v41  ;;  %v4119_v41 = vld [vmem:[#allocation10 + $0x38] sm:$0xff] }
0x14a8   : > { %6265 = vpow2.f32 %v3471_v44  ;;  %v4118_v44 = vld [vmem:[#allocation10 + $0x30] sm:$0xff] }
0x14aa   : > { %v3636_v53 = vpop.xlane.xlu0 %3635 }
0x14ab   : > { %v3637_v54 = vsub.f32 %v3633_v30, %v3636_v53 }
0x14ad   : > { %v3638_v56 = vmul.f32 1.442695, %v3637_v54 }
0x14ae   : > { %v3803_v45 = vpop.xlane.xlu1 %3802 }
0x14af   : > { %v3804_v46 = vsub.f32 %v3800_v34, %v3803_v45  ;;  %v5543_v45 = vld [vmem:[%s7867_s12 + $0x30] sm:$0xff] }
0x14b1   : > { %v3805_v47 = vmul.f32 1.442695, %v3804_v46  ;;  %v4117_v46 = vld [vmem:[#allocation10 + $0x28] sm:$0xff] }
0x14b2   : > { %v3479_v59 = vpop.permute.xlu1 %3478 }
0x14b3   : > { %6267 = vpow2.f32 %v3805_v47  ;;  %v5542_v47 = vld [vmem:[%s7867_s12 + $0x28] sm:$0xff] }
0x14b4   : > { %v6264_v37 = vpop.eup %6263  ;;  %6269 = vpow2.f32 %v3638_v56 }
0x14b5   : > { %v6266_v48 = vpop.eup %6265  ;;  %v3306_v49 = vsel %vm1138_vm4, %v6264_v37, 0.0 }
0x14b6   : > { %3307 = vadd.xlane.f32.xlu0 %v3306_v49  ;;  %v3473_v50 = vsel %vm1138_vm4, %v6266_v48, 0.0 }
0x14b7   : > { %3474 = vadd.xlane.f32.xlu1 %v3473_v50 }
0x14c0   : > { %v6268_v51 = vpop.eup %6267 }
0x14c1   : > { %v3807_v52 = vsel %vm1138_vm4, %v6268_v51, 0.0  ;;  %v6270_v57 = vpop.eup %6269 }
0x14c2   : > { %3808 = vadd.xlane.f32.xlu1 %v3807_v52  ;;  %v3640_v58 = vsel %vm1138_vm4, %v6270_v57, 0.0 }
0x14cc   : > { %3311 = vrot.lane.b32.xlu0 %v7529_v7, %s8031_s19  ;;  %s1004_s19 = scalar_lea.vmem [#allocation20], %s7124_s28 }
0x14cd   : > { %s5235_s18 = sshll.u32 %s1004_s19, 4  ;;  %s5236_s18 = int_to_ptr.vmem [resolvable:$true] %s5235_s18 }
0x14d3   : > { %3645 = vrot.lane.b32.xlu1 %v7529_v7, %s8032_s27  ;;  %s8037_s27 = sld [smem:[#allocation55_spill]] }
0x14eb   : > { %3641 = vadd.xlane.f32.xlu0 %v3640_v58 }
0x1501   : > { %3812 = vrot.lane.b32.xlu0 %v7529_v7, %s8033_s1  ;;  %s8034_s1 = scalar_lea.vmem [#allocation5], %s7124_s28 }
0x1502   : > { %v6307_v49 = vld [vmem:[%s8034_s1] sm:$0xff]  ;;  %s5582_s1 = sshll.u32 %s6875_s29, 7 }
0x153f   : > { %v3308_v60 = vpop.xlane.xlu0 %3307 }
0x1540   : > { %6271 = vrcp.f32 %v3308_v60  ;;  %v3475_v61 = vpop.xlane.xlu1 %3474 }
0x1541   : > { %6273 = vrcp.f32 %v3475_v61 }
0x1543   : > { %v3312_v62 = vpop.permute.xlu0 %3311 }
0x1544   : > { %5909 = vmatpush3.msra.mxu1 %v3312_v62  ;;  %v5540_v62 = vld [vmem:[%s7866_s11 + $0x1] ss:$0 sm:$0xff] }
0x1545   : > { %5918 = vmatprep.subr.mxu1 %v6701_v8 }
0x154b   : > { %v3809_v0 = vpop.xlane.xlu1 %3808 }
0x154d   : > { %v6272_v63 = vpop.eup %6271 }
0x154e   : > { %v3310_v1 = vmul.f32 %v6272_v63, %v6264_v37  ;;  %v6274_v2 = vpop.eup %6273  ;;  %v4116_v37 = vld [vmem:[#allocation10 + $0x20] sm:$0xff] }
0x154f   : > { %v3477_v3 = vmul.f32 %v6274_v2, %v6266_v48  ;;  %v3646_v4 = vpop.permute.xlu1 %3645  ;;  %v5541_v48 = vld [vmem:[%s7867_s12 + $0x20] sm:$0xff] }
0x1550   : > { %5911 = vmatmul.mubr.msk.f32.vlgmr.msra.gmra.mxu1 %vm1138_vm4, %v3310_v1  ;;  %v5547_v1 = vld [vmem:[#allocation11 + $0x1] ss:$0 sm:$0xff] }
0x1551   : > { %5919 = vmatpush3.msra.mxu1 %v3479_v59  ;;  %5920 = vmatprep.mubr.msk.f32.mxu1 %vm6702_vm1, %v6701_v8  ;;  %v5539_v59 = vld [vmem:[%s8016_s14 + $0x1] ss:$0 sm:$0xff] }
0x1552   : > { %5928 = vmatprep.subr.mxu1 %v6701_v8 }
0x1554   : > { %5921 = vmatmul.mubr.msk.f32.vlgmr.msra.gmra.mxu1 %vm1138_vm4, %v3477_v3 }
0x1555   : > { %5929 = vmatpush3.msra.mxu1 %v3646_v4  ;;  %5930 = vmatprep.mubr.msk.f32.mxu1 %vm6702_vm1, %v6701_v8 }
0x1556   : > { %5938 = vmatprep.subr.mxu1 %v6701_v8 }
0x1574   : > { %v3642_v5 = vpop.xlane.xlu0 %3641 }
0x1575   : > { %6275 = vrcp.f32 %v3642_v5 }
0x1576   : > { %6277 = vrcp.f32 %v3809_v0 }
0x1578   : > { %v3813_v9 = vpop.permute.xlu0 %3812 }
0x1582   : > { %v6276_v6 = vpop.eup %6275 }
0x1583   : > { %v3644_v7 = vmul.f32 %v6276_v6, %v6270_v57  ;;  %v6278_v55 = vpop.eup %6277  ;;  %v5545_v6 = vld [vmem:[#allocation8 + $0x1] ss:$0 sm:$0xff] }
0x1584   : > { %v3811_v10 = vmul.f32 %v6278_v55, %v6268_v51 }
0x1585   : > { %5931 = vmatmul.mubr.msk.f32.vlgmr.msra.gmra.mxu1 %vm1138_vm4, %v3644_v7 }
0x1586   : > { %5939 = vmatpush3.msra.mxu1 %v3813_v9  ;;  %5940 = vmatprep.mubr.msk.f32.mxu1 %vm6702_vm1, %v6701_v8 }
0x1587   : > { %5954 = vmatprep.subr.mxu1 %v6701_v8 }
0x1589   : > { %5941 = vmatmul.mubr.msk.f32.vlgmr.msra.gmra.mxu1 %vm1138_vm4, %v3811_v10 }
0x158a   : > { %5962 = vmatprep.mubr.msk.f32.mxu1 %vm6702_vm1, %v6701_v8 }
0x1610   : > { %v3383_v12 = vpop.f32.mrf.mxu1 }
0x1612   : > { %v5912_v13 = vpop.f32.mrf.mxu1 }
0x1614   : > { %v3550_v14 = vpop.f32.mrf.mxu1 }
0x1615   : > { %3889 = vrot.lane.b32.xlu1 %v3550_v14, %s8019_s30 }
0x1616   : > { %v5922_v15 = vpop.f32.mrf.mxu1 }
0x1645   : > { %v3717_v19 = vpop.f32.mrf.mxu1 }
0x1646   : > { %3893 = vrot.lane.b32.xlu0 %v3717_v19, %s8020_s26 }
0x1647   : > { %v5932_v20 = vpop.f32.mrf.mxu1 }
0x1649   : > { %v3884_v21 = vpop.f32.mrf.mxu1 }
0x164a   : > { %3897 = vrot.lane.b32.xlu1 %v3884_v21, %s8021_s4 }
0x164b   : > { %v5942_v22 = vpop.f32.mrf.mxu1 }
0x1687   : > { %v3890_v23 = vpop.permute.xlu1 %3889 }
0x1688   : > { %v3900_v26 = vsel %vm1138_vm4, %v3383_v12, %v3890_v23 }
0x16b8   : > { %v3894_v25 = vpop.permute.xlu0 %3893 }
0x16b9   : > { %v3901_v27 = vsel %vm1817_vm6, %v3900_v26, %v3894_v25 }
0x16bc   : > { %v3898_v28 = vpop.permute.xlu1 %3897 }
0x16bd   : > { %v3902_v29 = vsel %vm1819_vm7, %v3901_v27, %v3898_v28 }
0x16be   : > { %5952 = vmatmul.mubr.msk.f32.vlgmr.msra.gmra.mxu0 %vm1014_vm0, %v3902_v29 }
0x16bf   : > { %5973 = vmatprep.mubr.msk.f32.mxu0 %vm6702_vm1, %v6701_v8  ;;  %5966 = vmatpush3.msra.mxu0 %v4119_v41 }
0x16c0   : > { %5967 = vmatprep.subr.mxu0 %v6701_v8 }
0x16c1   : > { %5968 = vmatpush3.msra.mxu0 %v4118_v44 }
0x16c2   : > { %5969 = vmatprep.subr.mxu0 %v6701_v8 }
0x16c3   : > { %5970 = vmatpush3.msra.mxu0 %v4117_v46 }
0x16c4   : > { %5971 = vmatprep.subr.mxu0 %v6701_v8 }
0x16c5   : > { %5972 = vmatpush3.msra.mxu0 %v4116_v37 }
0x16c6   : > { %5974 = vmatmul.mubr.msk.f32.vlgmr.msra.gmra.mxu0 %vm1014_vm0, %v6307_v49  ;;  %5986 = vmatprep.subr.mxu0 %v6701_v8 }
0x16c7   : > { %5988 = vmatprep.mubr.msk.f32.mxu0 %vm6702_vm1, %v6701_v8 }
0x177e   : > { %v3977_v30 = vpop.f32.mrf.mxu0 }
0x177f   : > { %v3981_v31 = vadd.f32 %v3977_v30, %v7495_v42  ;;  %v5544_v42 = vld [vmem:[%s7867_s12 + $0x38] sm:$0xff] }
0x1780   : > { %v5953_v32 = vpop.f32.mrf.mxu0  ;;  %5955 = vmatpush3.msra.mxu1 %v5544_v42 }
0x1781   : > { %v7635_v33 = vadd.f32 %v5536_v24, %v3981_v31  ;;  %5956 = vmatprep.subr.mxu1 %v6701_v8 }
0x1782   : > { %5957 = vmatpush3.msra.mxu1 %v5543_v45 }
0x1783   : > { %v3995_v34 = vsel %vm1014_vm0, %v7635_v33, 0.0  ;;  %5958 = vmatprep.subr.mxu1 %v6701_v8 }
0x1784   : > { %3996 = vadd.xlane.f32.xlu0 %v3995_v34  ;;  %5959 = vmatpush3.msra.mxu1 %v5542_v47 }
0x1785   : > { %5960 = vmatprep.subr.mxu1 %v6701_v8 }
0x1786   : > { %5961 = vmatpush3.msra.mxu1 %v5541_v48  ;;  %v4194_v2 = vpop.f32.mrf.mxu0 }
0x1787   : > { %5976 = vmatprep.subr.mxu1 %v6701_v8  ;;  %v7675_v3 = vadd.f32 %v5547_v1, %v4194_v2 }
0x1788   : > { %v5975_v4 = vpop.f32.mrf.mxu0 }
0x179a   : > { %4365 = vrot.lane.b32.xlu0 %v7675_v3, %s8027_s21 }
0x179e   : > { %4532 = vrot.lane.b32.xlu0 %v7675_v3, %s8026_s20 }
0x17a2   : > { %4699 = vrot.lane.b32.xlu0 %v7675_v3, %s8028_s8 }
0x180d   : > { %v3997_v35 = vpop.xlane.xlu0 %3996 }
0x180e   : > { %v3998_v36 = vmul.f32 0.03125, %v3997_v35 }
0x1810   : > { %v3999_v38 = vsub.f32 %v7635_v33, %v3998_v36 }
0x1811   : > { %v4366_v5 = vpop.permute.xlu0 %4365 }
0x1812   : > { %v4000_v39 = vmul.f32 %v3999_v38, %v3999_v38  ;;  %v4018_v60 = vmul.f32 %v5539_v59, %v3999_v38  ;;  %5987 = vmatpush3.xpose.msk.msra.mxu0 %vm1138_vm4, %v4366_v5 }
0x1813   : > { %5996 = vmatprep.subr.mxu0 %v6701_v8 }
0x1814   : > { %v4001_v40 = vsel %vm1014_vm0, %v4000_v39, 0.0 }
0x1815   : > { %4002 = vadd.xlane.f32.xlu1 %v4001_v40  ;;  %v4533_v10 = vpop.permute.xlu0 %4532 }
0x1819   : > { %v4700_v13 = vpop.permute.xlu0 %4699 }
0x189e   : > { %v4003_v50 = vpop.xlane.xlu1 %4002 }
0x189f   : > { %v4004_v51 = vmul.f32 0.032258064, %v4003_v50 }
0x18a1   : > { %6279 = vrsqrt.f32 %v4004_v51  ;;  %vm4007_vm3 = vcmp.eq.f32.partialorder %v4004_v51, inf  ;;  %v4010_v54 = vand.u32 2147483648, %v4004_v51  ;;  %vm4009_vm5 = vcmp.eq.f32.partialorder %v4004_v51, 0.0 }
0x18ae   : > { %v6280_v52 = vpop.eup %6279 }
0x18af   : > { %v4006_v53 = vmul.f32 %v6280_v52, %v4004_v51 }
0x18b1   : > { %v4008_v56 = vsel %vm4007_vm3, %v4004_v51, %v4006_v53 }
0x18b2   : > { %v4011_v57 = vsel %vm4009_vm5, %v4010_v54, %v4008_v56 }
0x18b3   : > { %v4019_v58 = vadd.f32 1e-06, %v4011_v57 }
0x18b5   : > { %6281 = vrcp.f32 %v4019_v58 }
0x18c2   : > { %v6282_v61 = vpop.eup %6281 }
0x18c3   : > { %v4021_v63 = vmul.f32 %v6282_v61, %v4018_v60 }
0x18c5   : > { %v4028_v0 = vadd.f32 %v5540_v62, %v4021_v63 }
0x18c7   : > { %5963 = vmatmul.mubr.msk.f32.vlgmr.msra.gmra.mxu1 %vm1014_vm0, %v4028_v0 }
0x18c8   : > { %5978 = vmatprep.mubr.msk.f32.mxu1 %vm6702_vm1, %v6701_v8  ;;  %5977 = vmatpush3.xpose.msk.msra.mxu1 %vm1138_vm4, %v7675_v3 }
0x18c9   : > { %5981 = vmatprep.subr.mxu1 %v6701_v8 }
0x1987   : > { %v4111_v7 = vpop.f32.mrf.mxu1 }
0x1988   : > { %v4112_v55 = vadd.f32 %v5545_v6, %v4111_v7 }
0x1989   : > { %v5964_v9 = vpop.f32.mrf.mxu1 }
0x198a   : > { %4363 = vrot.lane.b32.xlu1 %v4112_v55, %s8027_s21  ;;  %5979 = vmatmul.mubr.msk.f32.vlgmr.msra.gmra.mxu1 %vm1138_vm4, %v4112_v55  ;;  %s8036_s21 = sld [smem:[#allocation32_spill]] }
0x198b   : > { %5983 = vmatprep.mubr.msk.f32.mxu1 %vm6702_vm1, %v6701_v8 }
0x198e   : > { %4530 = vrot.lane.b32.xlu1 %v4112_v55, %s8026_s20  ;;  %s8035_s20 = sld [smem:[#allocation54_spill]] }
0x1990   : > { %p8039_p7 = scmp.ne.s32.totalorder %s8036_s21, 0 }
0x1992   : > { %4697 = vrot.lane.b32.xlu1 %v4112_v55, %s8028_s8 }
0x19fc   : > { %v4364_v11 = vpop.permute.xlu1 %4363 }
0x19fd   : > { %5989 = vmatmul.mubr.msk.f32.vlgmr.msra.gmra.mxu0 %vm1138_vm4, %v4364_v11  ;;  %v4883_v11 = vld [vmem:[#allocation13 + $0x38] sm:$0xff] }
0x19fe   : > { %5997 = vmatpush3.xpose.msk.msra.mxu0 %vm1138_vm4, %v4533_v10  ;;  %5998 = vmatprep.mubr.msk.f32.mxu0 %vm6702_vm1, %v6701_v8 }
0x19ff   : > { %6006 = vmatprep.subr.mxu0 %v6701_v8 }
0x1a00   : > { %v4531_v12 = vpop.permute.xlu1 %4530 }
0x1a01   : > { %5999 = vmatmul.mubr.msk.f32.vlgmr.msra.gmra.mxu0 %vm1138_vm4, %v4531_v12  ;;  %v4882_v12 = vld [vmem:[#allocation13 + $0x30] sm:$0xff] }
0x1a02   : > { %6007 = vmatpush3.xpose.msk.msra.mxu0 %vm1138_vm4, %v4700_v13  ;;  %6008 = vmatprep.mubr.msk.f32.mxu0 %vm6702_vm1, %v6701_v8  ;;  %v4881_v13 = vld [vmem:[#allocation13 + $0x28] sm:$0xff] }
0x1a03   : > { %6016 = vmatprep.subr.mxu0 %v6701_v8 }
0x1a04   : > { %v4698_v14 = vpop.permute.xlu1 %4697 }
0x1a05   : > { %6009 = vmatmul.mubr.msk.f32.vlgmr.msra.gmra.mxu0 %vm1138_vm4, %v4698_v14  ;;  %v4880_v14 = vld [vmem:[#allocation13 + $0x20] sm:$0xff] }
0x1a06   : > { %6024 = vmatprep.mubr.msk.f32.mxu0 %vm6702_vm1, %v6701_v8  ;;  %6017 = vmatpush3.msra.mxu0 %v4883_v11 }
0x1a07   : > { %6018 = vmatprep.subr.mxu0 %v6701_v8 }
0x1a08   : > { %6019 = vmatpush3.msra.mxu0 %v4882_v12 }
0x1a09   : > { %6020 = vmatprep.subr.mxu0 %v6701_v8 }
0x1a0a   : > { %6021 = vmatpush3.msra.mxu0 %v4881_v13 }
0x1a0b   : > { %6022 = vmatprep.subr.mxu0 %v6701_v8 }
0x1a0c   : > { %6023 = vmatpush3.msra.mxu0 %v4880_v14 }
0x1a0d   : > { %6038 = vmatprep.subr.mxu0 %v6701_v8 }
0x1a4a   : > { %v4270_v15 = vpop.f32.mrf.mxu1 }
0x1a4b   : > { %v4274_v16 = vmul.f32 0.35355338, %v4270_v15 }
0x1a4c   : > { %v5980_v17 = vpop.f32.mrf.mxu1 }
0x1a4d   : > { %v4275_v18 = vsel %vm2194_vm11, -1e+09, %v4274_v16 }
0x1a4e   : > { %v4276_v19 = vsel %vm1138_vm4, %v4275_v18, -inf }
0x1a4f   : > { %4277 = vmax.xlane.f32.xlu0 %v4276_v19 }
0x1abd   : > { %v4437_v20 = vpop.f32.mrf.mxu0 }
0x1abe   : > { %v4441_v21 = vmul.f32 0.35355338, %v4437_v20 }
0x1abf   : > { %v5990_v22 = vpop.f32.mrf.mxu0 }
0x1ac0   : > { %v4442_v23 = vsel %vm2194_vm11, -1e+09, %v4441_v21 }
0x1ac1   : > { %v4604_v25 = vpop.f32.mrf.mxu0  ;;  %v4443_v26 = vsel %vm1138_vm4, %v4442_v23, -inf }
0x1ac2   : > { %v4608_v27 = vmul.f32 0.35355338, %v4604_v25  ;;  %4444 = vmax.xlane.f32.xlu1 %v4443_v26 }
0x1ac3   : > { %v6000_v28 = vpop.f32.mrf.mxu0 }
0x1ac4   : > { %v4609_v29 = vsel %vm2194_vm11, -1e+09, %v4608_v27 }
0x1ac5   : > { %v4771_v30 = vpop.f32.mrf.mxu0  ;;  %v4610_v24 = vsel %vm1138_vm4, %v4609_v29, -inf }
0x1ac6   : > { %v4775_v31 = vmul.f32 0.35355338, %v4771_v30  ;;  %4611 = vmax.xlane.f32.xlu0 %v4610_v24 }
0x1ac7   : > { %v6010_v32 = vpop.f32.mrf.mxu0 }
0x1ac8   : > { %v4776_v34 = vsel %vm2194_vm11, -1e+09, %v4775_v31 }
0x1ac9   : > { %v4777_v35 = vsel %vm1138_vm4, %v4776_v34, -inf }
0x1aca   : > { %4778 = vmax.xlane.f32.xlu0 %v4777_v35 }
0x1ad3   : > { %4287 = vrot.lane.b32.xlu1 %v7675_v3, %s8025_s9 }
0x1ad8   : > { %v4278_v36 = vpop.xlane.xlu0 %4277 }
0x1ad9   : > { %v4279_v38 = vsub.f32 %v4275_v18, %v4278_v36 }
0x1adb   : > { %v4280_v39 = vmul.f32 1.442695, %v4279_v38 }
0x1add   : > { %6283 = vpow2.f32 %v4280_v39 }
0x1aea   : > { %v6284_v40 = vpop.eup %6283 }
0x1aeb   : > { %v4282_v41 = vsel %vm1138_vm4, %v6284_v40, 0.0 }
0x1af7   : > { %4283 = vadd.xlane.f32.xlu1 %v4282_v41  ;;  %v5008_v41 = vld [vmem:[#allocation16 + $0x30] sm:$0xff] }
0x1b4b   : > { %v4445_v44 = vpop.xlane.xlu1 %4444 }
0x1b4c   : > { %v4446_v42 = vsub.f32 %v4442_v23, %v4445_v44  ;;  %v5006_v44 = vld [vmem:[#allocation16 + $0x20] sm:$0xff] }
0x1b4e   : > { %v4447_v45 = vmul.f32 1.442695, %v4446_v42  ;;  %v5576_v42 = vld [vmem:[%s7877_s22 + $0x78] sm:$0xff] }
0x1b4f   : > { %v4288_v46 = vpop.permute.xlu1 %4287  ;;  %v4612_v43 = vpop.xlane.xlu0 %4611 }
0x1b50   : > { %6285 = vpow2.f32 %v4447_v45  ;;  %v4613_v47 = vsub.f32 %v4609_v29, %v4612_v43  ;;  %5982 = vmatpush3.msra.mxu1 %v4288_v46  ;;  %v5562_v29 = vld [vmem:[#allocation14 + $0x1] ss:$0 sm:$0xff]  ;;  %v5574_v46 = vld [vmem:[%s7877_s22 + $0x68] sm:$0xff]  ;;  %v5573_v43 = vld [vmem:[%s7877_s22 + $0x60] sm:$0xff] }
0x1b51   : > { %5991 = vmatprep.subr.mxu1 %v6701_v8  ;;  %v5575_v45 = vld [vmem:[%s7877_s22 + $0x70] sm:$0xff] }
0x1b52   : > { %v4614_v37 = vmul.f32 1.442695, %v4613_v47  ;;  %v5572_v47 = vld [vmem:[%s7877_s22 + $0x58] sm:$0xff] }
0x1b53   : > { %v4779_v48 = vpop.xlane.xlu0 %4778 }
0x1b54   : > { %6287 = vpow2.f32 %v4614_v37  ;;  %v4780_v49 = vsub.f32 %v4776_v34, %v4779_v48 }
0x1b56   : > { %v4781_v50 = vmul.f32 1.442695, %v4780_v49 }
0x1b58   : > { %6289 = vpow2.f32 %v4781_v50 }
0x1b5d   : > { %v6286_v51 = vpop.eup %6285 }
0x1b5e   : > { %v4449_v52 = vsel %vm1138_vm4, %v6286_v51, 0.0 }
0x1b5f   : > { %4450 = vadd.xlane.f32.xlu0 %v4449_v52 }
0x1b61   : > { %v6288_v53 = vpop.eup %6287 }
0x1b62   : > { %v4616_v54 = vsel %vm1138_vm4, %v6288_v53, 0.0 }
0x1b63   : > { %4617 = vadd.xlane.f32.xlu1 %v4616_v54 }
0x1b65   : > { %v6290_v56 = vpop.eup %6289 }
0x1b66   : > { %v4783_v57 = vsel %vm1138_vm4, %v6290_v56, 0.0 }
0x1b67   : > { %4784 = vadd.xlane.f32.xlu0 %v4783_v57 }
0x1b74   : > { %4621 = vrot.lane.b32.xlu1 %v7675_v3, %s8029_s6 }
0x1b78   : > { %4788 = vrot.lane.b32.xlu1 %v7675_v3, %s8018_s17  ;;  %s8038_s17 = sld [smem:[#allocation56_spill]] }
0x1b7d   : > { %4454 = vrot.lane.b32.xlu0 %v7675_v3, %s8024_s2  ;;  %s6718_s2 = smov [#allocation20]  }
0x1b7e   : > { %s6604_s9 = sshll.u32 %s6718_s2, 4  ;;  %s6605_s9 = int_to_ptr.vmem [resolvable:$false] %s6604_s9 }
0x1b7f   : > { %s6606_s29 = scalar_lea.vmem %s6605_s9, 256  ;;  %p6607_p10 = scmp.lt.s32.totalorder %s5236_s18, %s6605_s9 }
0x1b80   : > { %v4284_v58 = vpop.xlane.xlu1 %4283 }
0x1b81   : > { %6291 = vrcp.f32 %v4284_v58 }
0x1b8e   : > { %v6292_v59 = vpop.eup %6291 }
0x1b8f   : > { %v4286_v60 = vmul.f32 %v6292_v59, %v6284_v40  ;;  %v5009_v40 = vld [vmem:[#allocation16 + $0x38] sm:$0xff]  ;;  %v5566_v59 = vld [vmem:[%s8023_s15 + $0x1] ss:$0 sm:$0xff] }
0x1b91   : > { %5984 = vmatmul.mubr.msk.f32.vlgmr.msra.gmra.mxu1 %vm1138_vm4, %v4286_v60 }
0x1b92   : > { %5993 = vmatprep.mubr.msk.f32.mxu1 %vm6702_vm1, %v6701_v8 }
0x1be8   : > { %v4451_v61 = vpop.xlane.xlu0 %4450 }
0x1be9   : > { %6293 = vrcp.f32 %v4451_v61 }
0x1bec   : > { %v4618_v62 = vpop.xlane.xlu1 %4617 }
0x1bed   : > { %6295 = vrcp.f32 %v4618_v62  ;;  %v5571_v62 = vld [vmem:[%s7877_s22 + $0x50] sm:$0xff] }
0x1bf0   : > { %v4785_v63 = vpop.xlane.xlu0 %4784  ;;  %v4622_v2 = vpop.permute.xlu1 %4621 }
0x1bf1   : > { %6297 = vrcp.f32 %v4785_v63  ;;  %v5570_v63 = vld [vmem:[%s7877_s22 + $0x48] sm:$0xff] }
0x1bf4   : > { %v4455_v0 = vpop.permute.xlu0 %4454  ;;  %v4789_v6 = vpop.permute.xlu1 %4788 }
0x1bf5   : > { %5992 = vmatpush3.msra.mxu1 %v4455_v0  ;;  %v5569_v0 = vld [vmem:[%s7877_s22 + $0x40] sm:$0xff] }
0x1bf6   : > { %v6294_v1 = vpop.eup %6293  ;;  %6001 = vmatprep.subr.mxu1 %v6701_v8 }
0x1bf7   : > { %v4453_v3 = vmul.f32 %v6294_v1, %v6286_v51  ;;  %v5567_v1 = vld [vmem:[#allocation17 + $0x1] ss:$0 sm:$0xff] }
0x1bf9   : > { %5994 = vmatmul.mubr.msk.f32.vlgmr.msra.gmra.mxu1 %vm1138_vm4, %v4453_v3 }
0x1bfa   : > { %v6296_v4 = vpop.eup %6295  ;;  %6002 = vmatpush3.msra.mxu1 %v4622_v2  ;;  %6003 = vmatprep.mubr.msk.f32.mxu1 %vm6702_vm1, %v6701_v8 }
0x1bfb   : > { %6011 = vmatprep.subr.mxu1 %v6701_v8  ;;  %v4620_v5 = vmul.f32 %v6296_v4, %v6288_v53 }
0x1bfd   : > { %6004 = vmatmul.mubr.msk.f32.vlgmr.msra.gmra.mxu1 %vm1138_vm4, %v4620_v5 }
0x1bfe   : > { %v6298_v7 = vpop.eup %6297  ;;  %6012 = vmatpush3.msra.mxu1 %v4789_v6  ;;  %6013 = vmatprep.mubr.msk.f32.mxu1 %vm6702_vm1, %v6701_v8 }
0x1bff   : > { %v4787_v55 = vmul.f32 %v6298_v7, %v6290_v56  ;;  %6027 = vmatprep.subr.mxu1 %v6701_v8  ;;  %v5565_v56 = vld [vmem:[%s8022_s24 + $0x1] ss:$0 sm:$0xff]  ;;  %v5578_v7 = vld [vmem:[#allocation19 + $0x1] ss:$0 sm:$0xff] }
0x1c01   : > { %6014 = vmatmul.mubr.msk.f32.vlgmr.msra.gmra.mxu1 %vm1138_vm4, %v4787_v55 }
0x1c02   : > { %6035 = vmatprep.mubr.msk.f32.mxu1 %vm6702_vm1, %v6701_v8  ;;  %6028 = vmatpush3.msra.mxu1 %v5009_v40 }
0x1c03   : > { %6029 = vmatprep.subr.mxu1 %v6701_v8 }
0x1c04   : > { %6030 = vmatpush3.msra.mxu1 %v5008_v41 }
0x1c05   : > { %6031 = vmatprep.subr.mxu1 %v6701_v8 }
0x1c51   : > { %v4359_v9 = vpop.f32.mrf.mxu1 }
0x1c53   : > { %v5985_v10 = vpop.f32.mrf.mxu1 }
0x1cb9   : > { %v4526_v15 = vpop.f32.mrf.mxu1 }
0x1cba   : > { %4865 = vrot.lane.b32.xlu0 %v4526_v15, %s8019_s30  ;;  %s5233_s30 = scalar_lea.hbm %s8038_s17, %s5582_s1 }
0x1cbb   : > { %v5995_v16 = vpop.f32.mrf.mxu1 }
0x1cbd   : > { %v4693_v17 = vpop.f32.mrf.mxu1 }
0x1cbe   : > { %4869 = vrot.lane.b32.xlu1 %v4693_v17, %s8020_s26  ;;  %s5222_s26 = scalar_lea.sflag [#allocation4], %s7121_s16 }
0x1cbf   : > { %v6005_v18 = vpop.f32.mrf.mxu1 }
0x1cc1   : > { %v4860_v19 = vpop.f32.mrf.mxu1 }
0x1cc2   : > { %4873 = vrot.lane.b32.xlu0 %v4860_v19, %s8021_s4  ;;  %s6600_s4 = scalar_lea.vmem %s5236_s18, 128 }
0x1cc3   : > { %v6015_v20 = vpop.f32.mrf.mxu1  ;;  %p6601_p6 = scmp.ne.s32.totalorder %s5236_s18, %s6600_s4  ;;  %p6608_p9 = scmp.lt.s32.totalorder %s6606_s29, %s6600_s4 }
0x1cc5   : > { %p6602_p4 = pnand %p6601_p6, %p8039_p7  ;;  %p6609_p11 = por %p6608_p9, %p6607_p10 }
0x1cc7   : > { %p6603_p0 = pneg %p6602_p4 }
0x1cc9   : > { %p6610_p12 = pnand %p6609_p11, %p6603_p0 }
0x1d2c   : > { %v4866_v21 = vpop.permute.xlu0 %4865 }
0x1d2d   : > { %v4876_v23 = vsel %vm1138_vm4, %v4359_v9, %v4866_v21 }
0x1d30   : > { %v4870_v22 = vpop.permute.xlu1 %4869 }
0x1d31   : > { %v4877_v25 = vsel %vm1817_vm6, %v4876_v23, %v4870_v22 }
0x1d34   : > { %v4874_v26 = vpop.permute.xlu0 %4873 }
0x1d35   : > { %v4878_v27 = vsel %vm1819_vm7, %v4877_v25, %v4874_v26  ;;  %v5579_v25 = vld [vmem:[%s8035_s20] ss:$0 sm:$0xff] }
0x1d36   : > { %6025 = vmatmul.mubr.msk.f32.vlgmr.msra.gmra.mxu0 %vm1014_vm0, %v4878_v27 }
0x1d37   : > { %6054 = vmatprep.mubr.msk.f32.mxu0 %vm6702_vm1, %v6701_v8  ;;  %6039 = vmatpush3.msra.mxu0 %v5576_v42 }
0x1d38   : > { %6040 = vmatprep.subr.mxu0 %v6701_v8 }
0x1d39   : > { %6041 = vmatpush3.msra.mxu0 %v5575_v45 }
0x1d3a   : > { %6042 = vmatprep.subr.mxu0 %v6701_v8 }
0x1d3b   : > { %6043 = vmatpush3.msra.mxu0 %v5574_v46 }
0x1d3c   : > { %6044 = vmatprep.subr.mxu0 %v6701_v8 }
0x1d3d   : > { %6045 = vmatpush3.msra.mxu0 %v5573_v43 }
0x1d3e   : > { %6046 = vmatprep.subr.mxu0 %v6701_v8 }
0x1d3f   : > { %6047 = vmatpush3.msra.mxu0 %v5572_v47 }
0x1d40   : > { %6048 = vmatprep.subr.mxu0 %v6701_v8 }
0x1d41   : > { %6049 = vmatpush3.msra.mxu0 %v5571_v62 }
0x1d42   : > { %6050 = vmatprep.subr.mxu0 %v6701_v8 }
0x1d43   : > { %6051 = vmatpush3.msra.mxu0 %v5570_v63 }
0x1d44   : > { %6052 = vmatprep.subr.mxu0 %v6701_v8 }
0x1d45   : > { %6053 = vmatpush3.msra.mxu0 %v5569_v0 }
0x1df6   : > { %v4953_v28 = vpop.f32.mrf.mxu0 }
0x1df7   : > { %v4957_v30 = vadd.f32 %v4953_v28, %v7635_v33  ;;  %v5007_v33 = vld [vmem:[#allocation16 + $0x28] sm:$0xff] }
0x1df8   : > { %v6026_v24 = vpop.f32.mrf.mxu0  ;;  %6032 = vmatpush3.msra.mxu1 %v5007_v33  ;;  %v5580_v28 = vld [vmem:[%s8037_s27] ss:$0 sm:$0xff] }
0x1df9   : > { %v7761_v31 = vadd.f32 %v5562_v29, %v4957_v30  ;;  %6033 = vmatprep.subr.mxu1 %v6701_v8 }
0x1dfa   : > { %6034 = vmatpush3.msra.mxu1 %v5006_v44 }
0x1dfb   : > { %v4971_v32 = vsel %vm1014_vm0, %v7761_v31, 0.0 }
0x1dfc   : > { %4972 = vadd.xlane.f32.xlu1 %v4971_v32 }
0x1e85   : > { %v4973_v34 = vpop.xlane.xlu1 %4972 }
0x1e86   : > { %v4974_v35 = vmul.f32 0.03125, %v4973_v34 }
0x1e88   : > { %v4975_v36 = vsub.f32 %v7761_v31, %v4974_v35 }
0x1e8a   : > { %v4976_v38 = vmul.f32 %v4975_v36, %v4975_v36  ;;  %v4994_v57 = vmul.f32 %v5565_v56, %v4975_v36 }
0x1e8c   : > { %v4977_v39 = vsel %vm1014_vm0, %v4976_v38, 0.0 }
0x1e8d   : > { %4978 = vadd.xlane.f32.xlu0 %v4977_v39 }
0x1f16   : > { %v4979_v37 = vpop.xlane.xlu0 %4978 }
0x1f17   : > { %v4980_v48 = vmul.f32 0.032258064, %v4979_v37 }
0x1f19   : > { %6299 = vrsqrt.f32 %v4980_v48  ;;  %vm4983_vm1 = vcmp.eq.f32.partialorder %v4980_v48, inf  ;;  %v4986_v51 = vand.u32 2147483648, %v4980_v48  ;;  %vm4985_vm4 = vcmp.eq.f32.partialorder %v4980_v48, 0.0 }
0x1f26   : > { %v6300_v49 = vpop.eup %6299 }
0x1f27   : > { %v4982_v50 = vmul.f32 %v6300_v49, %v4980_v48 }
0x1f29   : > { %v4984_v52 = vsel %vm4983_vm1, %v4980_v48, %v4982_v50 }
0x1f2a   : > { %v4987_v53 = vsel %vm4985_vm4, %v4986_v51, %v4984_v52 }
0x1f2b   : > { %v4995_v54 = vadd.f32 1e-06, %v4987_v53 }
0x1f2d   : > { %6301 = vrcp.f32 %v4995_v54 }
0x1f3a   : > { %v6302_v58 = vpop.eup %6301 }
0x1f3b   : > { %v4997_v60 = vmul.f32 %v6302_v58, %v4994_v57 }
0x1f3d   : > { %v5004_v61 = vadd.f32 %v5566_v59, %v4997_v60 }
0x1f3f   : > { %6036 = vmatmul.mubr.msk.f32.vlgmr.msra.gmra.mxu1 %vm1014_vm0, %v5004_v61 }
0x1fff   : > { %v5087_v2 = vpop.f32.mrf.mxu1 }
0x2000   : > { %v5088_v3 = vadd.f32 %v5567_v1, %v5087_v2 }
0x2001   : > { %v6037_v4 = vpop.f32.mrf.mxu1 }
0x2002   : > { %v5091_v5 = vmax.f32 %v5088_v3, 0.0 }
0x2004   : > { %6055 = vmatmul.mubr.msk.f32.vlgmr.msra.gmra.mxu0 %vm3014_vm14, %v5091_v5 }
0x20c4   : > { %v5170_v6 = vpop.f32.mrf.mxu0 }
0x20c5   : > { %v5174_v55 = vadd.f32 %v5170_v6, %v7761_v31 }
0x20c6   : > { %v6056_v9 = vpop.f32.mrf.mxu0 }
0x20c7   : > { %v5183_v10 = vadd.f32 %v5578_v7, %v5174_v55 }
0x20c9   : > { %v5186_v11 = vsel %vm1014_vm0, %v5183_v10, 0.0 }
0x20ca   : > { %5187 = vadd.xlane.f32.xlu0 %v5186_v11 }
0x2153   : > { %v5188_v12 = vpop.xlane.xlu0 %5187 }
0x2154   : > { %v5189_v13 = vmul.f32 0.03125, %v5188_v12 }
0x2156   : > { %v5190_v8 = vsub.f32 %v5183_v10, %v5189_v13 }
0x2158   : > { %v5191_v14 = vmul.f32 %v5190_v8, %v5190_v8  ;;  %v5209_v26 = vmul.f32 %v5579_v25, %v5190_v8 }
0x215a   : > { %v5192_v15 = vsel %vm1014_vm0, %v5191_v14, 0.0 }
0x215b   : > { %5193 = vadd.xlane.f32.xlu1 %v5192_v15 }
0x21e4   : > { %v5194_v16 = vpop.xlane.xlu1 %5193 }
0x21e5   : > { %v5195_v17 = vmul.f32 0.032258064, %v5194_v16 }
0x21e7   : > { %6303 = vrsqrt.f32 %v5195_v17  ;;  %vm5198_vm6 = vcmp.eq.f32.partialorder %v5195_v17, inf  ;;  %v5201_v20 = vand.u32 2147483648, %v5195_v17  ;;  %vm5200_vm7 = vcmp.eq.f32.partialorder %v5195_v17, 0.0 }
0x21f4   : > { %v6304_v18 = vpop.eup %6303 }
0x21f5   : > { %v5197_v19 = vmul.f32 %v6304_v18, %v5195_v17 }
0x21f7   : > { %v5199_v21 = vsel %vm5198_vm6, %v5195_v17, %v5197_v19 }
0x21f8   : > { %v5202_v22 = vsel %vm5200_vm7, %v5201_v20, %v5199_v21 }
0x21f9   : > { %v5210_v23 = vadd.f32 1e-06, %v5202_v22 }
0x21fb   : > { %6305 = vrcp.f32 %v5210_v23 }
0x2208   : > { %v6306_v27 = vpop.eup %6305 }
0x2209   : > { %v5212_v29 = vmul.f32 %v6306_v27, %v5209_v26 }
0x220b   : > { %v5219_v30 = vadd.f32 %v5580_v28, %v5212_v29 }
0x220d   : > { %5220 = vst.msk [vmem:[%s1004_s19] sm:$0xff] %vm1014_vm0, %v5219_v30 }
0x220e   : > { %6613 = shalt.err (!%p6610_p12)
}
0x220f   : > { %s6614_s28 = scalar_lea.hbm %s5233_s30, 128  ;;  %s6618_s8 = scalar_lea.hbm %s8038_s17, 256 }
0x2210   : > { %p6615_p1 = scmp.ne.s32.totalorder %s5233_s30, %s6614_s28  ;;  %p6619_p5 = scmp.lt.s32.totalorder %s5233_s30, %s8038_s17 }
0x2211   : > { %p6620_p8 = scmp.lt.s32.totalorder %s6618_s8, %s6614_s28 }
0x2212   : > { %p6616_p13 = pnand %p6615_p1, %p8039_p7 }
0x2213   : > { %p6621_p3 = por %p6620_p8, %p6619_p5 }
0x2214   : > { %p6617_p2 = pneg %p6616_p13 }
0x2216   : > { %p6622_p6 = pnand %p6621_p3, %p6617_p2 }
0x2218   : > { %6625 = shalt.err (!%p6622_p6)
}
0x2219   : > { %6095 = dma.vmem_to_hbm [thread:$0]  (%p8039_p7), %s5236_s18, 128, %s5233_s30, %s5222_s26  }
0x221a PF: > { %s8040_s1 = sld [smem:[#allocation28_spill]] }
0x221b   : > { %s8041_s19 = sld [smem:[#allocation33_spill]] }
0x221c   : > { %s8042_s13 = sld [smem:[#allocation29_spill]] }
0x2220   : > { %s5247_s5 = sand.u32 1, %s8040_s1  }
0x2221   : > { %p8043_p4 = scmp.ne.s32.totalorder %s8041_s19, 0  ;;  %s5248_s4 = scalar_lea.sflag [#allocation4], %s5247_s5 }
0x2222   : > { %p8044_p0 = scmp.ge.s32.totalorder %s8042_s13, 2 }
0x2224   : > { %p6133_p10 = pnand %p8044_p0, %p8043_p4 }
0x2226   : > { %p6134_p9 = pneg %p6133_p10 }
0x2228   : > { %6667 = dma.done.wait (%p6134_p9), %s5248_s4, 128  }
0x2229   : > { %6669 = vsyncadd (%p6134_p9), %s5248_s4, 4294967168  ;;  %s8045_s28 = sld [smem:[#allocation30_spill]]  ;;  %s8047_s27 = smov %s6676_s3 }
0x222a   : > { %s8046_s2 = sld [smem:[#allocation31_spill]]  ;;  %s8048_s3 = smov %s6680_s7 }
0x222f   : > { %p46_p11 = scmp.ge.s32.totalorder %s8045_s28, 4  }
0x2230   : > { %s8049_s7 = smov %s8046_s2 }
0x2231   :  { %48 = sbr.rel (!%p46_p11) target bundleno = 35 (0x23), region = 248 }
0x2236   :  { %5253 = vsyncpa [#allocation3], 1 }
0x2237   :  { %5255 = vsyncpa [#allocation3 + $0x1], 1 }
0x2238   :  { %5256 = vsyncpa [#allocation6], 1 }
0x2239   :  { %5258 = vsyncpa [#allocation6 + $0x1], 1 }
0x223a   :  { %5259 = vsyncpa [#allocation9], 1 }
0x223b   :  { %5260 = vsyncpa [#allocation12], 1 }
0x223c   :  { %5261 = vsyncpa [#allocation15], 1 }
0x223d   :  { %5262 = vsyncpa [#allocation18], 1 }
0x223e   :  { %5263 = vsyncpa [#allocation4], 1 }
0x223f   :  { %5265 = vsyncpa [#allocation4 + $0x1], 1 }

</bundles_post_ra>
